<compile_context>
chip_gen: v5e
topology: v5e:2x2
jax: 0.10.0
libtpu: 0.0.40
codegen_flags: <defaults>
</compile_context>

<pallas_src>
import functools

import jax
import jax.numpy as jnp
from jax.experimental import pallas as pl
from jax.experimental.pallas import tpu as pltpu  # noqa: F401  (no grid / manual DMA needed in this rev)

LANE = 128  # TPU lane width; the one HBM-resident activation is padded to it.


# ---------------------------------------------------------------------------
# Pallas kernels
# ---------------------------------------------------------------------------
def _conv1_kernel(cols_ref, w_ref, b_ref, o_ref):
    """conv1 as a matmul: out = relu(cols @ w + b).  grid=() -> full VMEM blocks."""
    acc = jnp.dot(cols_ref[...], w_ref[...], preferred_element_type=jnp.float32)
    acc = jnp.maximum(acc + b_ref[...], 0.0)          # (1, N) bias broadcasts
    o_ref[...] = acc.astype(o_ref.dtype)              # bf16, lane-dense (N=128)


def _tail_kernel(cols2_ref, w2_ref, b2_ref, w3_ref, b3_ref,
                 wf1_ref, bf1_ref, wf2_ref, bf2_ref, wh_ref, bh_ref, o_ref):
    """Fused conv2 + conv3 + fc1 + fc2 + merged dueling heads.

    cols2 rows are ordered (patch, batch) so each conv3 tap is a contiguous
    row slice; conv3 (1x1 spatial output) becomes a statically-unrolled sum of
    9 tiny matmuls.  All intermediates stay on-chip; weights (~1.3 MiB bf16)
    are VMEM-resident for the whole call.
    """
    batch = o_ref.shape[0]
    n_tap = w3_ref.shape[0]

    c2 = jnp.dot(cols2_ref[...], w2_ref[...], preferred_element_type=jnp.float32)
    c2 = jnp.maximum(c2 + b2_ref[...], 0.0).astype(jnp.bfloat16)        # (9B, 64)

    acc3 = jnp.zeros((batch, w3_ref.shape[2]), jnp.float32)
    for p in range(n_tap):                                               # static unroll
        acc3 = acc3 + jnp.dot(c2[p * batch:(p + 1) * batch, :], w3_ref[p],
                              preferred_element_type=jnp.float32)
    c3 = jnp.maximum(acc3 + b3_ref[...], 0.0).astype(jnp.bfloat16)       # (B, 64)

    f1 = jnp.dot(c3, wf1_ref[...], preferred_element_type=jnp.float32)
    f1 = jnp.maximum(f1 + bf1_ref[...], 0.0).astype(jnp.bfloat16)        # (B, 1024)
    f2 = jnp.dot(f1, wf2_ref[...], preferred_element_type=jnp.float32)
    f2 = jnp.maximum(f2 + bf2_ref[...], 0.0).astype(jnp.bfloat16)        # (B, 512)
    out = jnp.dot(f2, wh_ref[...], preferred_element_type=jnp.float32)
    o_ref[...] = (out + bh_ref[...]).astype(o_ref.dtype)                 # (B, 8)


# ---------------------------------------------------------------------------
# pallas_call wrappers
# ---------------------------------------------------------------------------
def _full_spec(shape):
    # grid=() -> one invocation, full-array block resident in VMEM.
    return pl.BlockSpec(shape, lambda: (0,) * len(shape))


def conv1_matmul(cols, w, b):
    """cols: (M, K) bf16, w: (K, N) bf16, b: (1, N) f32 -> (M, N) bf16."""
    M, K = cols.shape
    N = w.shape[1]
    cost = pl.CostEstimate(flops=2 * M * K * N, transcendentals=0,
                           bytes_accessed=2 * (M * K + K * N + M * N) + 4 * N)
    return pl.pallas_call(
        _conv1_kernel,
        out_shape=jax.ShapeDtypeStruct((M, N), jnp.bfloat16),
        in_specs=[_full_spec((M, K)), _full_spec((K, N)), _full_spec((1, N))],
        out_specs=_full_spec((M, N)),
        cost_estimate=cost,
    )(cols, w, b)


def fused_tail(cols2, p):
    """Single Pallas call for conv2 + conv3 + fc1 + fc2 + merged heads."""
    PB, K2 = cols2.shape
    n_tap, c3_in, c3_out = p["conv3_w"].shape
    B = PB // n_tap
    H1 = p["fc1_w"].shape[1]
    H2 = p["fc2_w"].shape[1]
    NH = p["head_w"].shape[1]
    flops = 2 * (PB * K2 * c3_in + B * n_tap * c3_in * c3_out
                 + B * c3_out * H1 + B * H1 * H2 + B * H2 * NH)
    w_bytes = 2 * (K2 * c3_in + n_tap * c3_in * c3_out + c3_out * H1
                   + H1 * H2 + H2 * NH)
    cost = pl.CostEstimate(
        flops=flops, transcendentals=0,
        bytes_accessed=w_bytes + 2 * PB * K2
        + 4 * (c3_in + c3_out + H1 + H2 + NH + B * NH))
    return pl.pallas_call(
        _tail_kernel,
        out_shape=jax.ShapeDtypeStruct((B, NH), jnp.float32),
        in_specs=[_full_spec((PB, K2)),
                  _full_spec(p["conv2_w"].shape), _full_spec(p["conv2_b"].shape),
                  _full_spec(p["conv3_w"].shape), _full_spec(p["conv3_b"].shape),
                  _full_spec(p["fc1_w"].shape), _full_spec(p["fc1_b"].shape),
                  _full_spec(p["fc2_w"].shape), _full_spec(p["fc2_b"].shape),
                  _full_spec(p["head_w"].shape), _full_spec(p["head_b"].shape)],
        out_specs=_full_spec((B, NH)),
        cost_estimate=cost,
    )(cols2, p["conv2_w"], p["conv2_b"], p["conv3_w"], p["conv3_b"],
      p["fc1_w"], p["fc1_b"], p["fc2_w"], p["fc2_b"],
      p["head_w"], p["head_b"])


# ---------------------------------------------------------------------------
# im2col wrapper glue (XLA, outside the kernels; NHWC, no transposes between
# conv layers — one NCHW->NHWC transpose at the network input boundary).
# ---------------------------------------------------------------------------
def _im2col_nhwc(x, ksize, stride, *, patch_major=False):
    """NHWC -> im2col columns with feature order (kh, kw, c).

    patch_major=False: rows ordered (b, ho, wo)  -> (B*Ho*Wo, K*K*C)
    patch_major=True : rows ordered (ho, wo, b)  -> (Ho*Wo*B, K*K*C)
    """
    B, H, W, C = x.shape
    Ho = (H - ksize) // stride + 1
    Wo = (W - ksize) // stride + 1
    cols = [x[:, kh:kh + Ho * stride:stride, kw:kw + Wo * stride:stride, :]
            for kh in range(ksize) for kw in range(ksize)]
    patches = jnp.concatenate(cols, axis=-1)              # (B, Ho, Wo, K*K*C)
    if patch_major:
        patches = jnp.transpose(patches, (1, 2, 0, 3))    # (Ho, Wo, B, K*K*C)
    return patches.reshape(-1, ksize * ksize * C), (B, Ho, Wo)


# ---------------------------------------------------------------------------
# Parameter construction & packing
# ---------------------------------------------------------------------------
def init_params(key, input_dims, n_actions):
    """Raw PyTorch-layout parameters (deterministic, synthetic)."""
    C, H, W = input_dims
    ks = jax.random.split(key, 14)

    def u(k, shape, scale):
        return jax.random.uniform(k, shape, jnp.float32, -scale, scale)

    p = {}
    p["conv1_w"] = u(ks[0], (32, C, 8, 8), 0.05)
    p["conv1_b"] = u(ks[1], (32,), 0.05)
    p["conv2_w"] = u(ks[2], (64, 32, 4, 4), 0.05)
    p["conv2_b"] = u(ks[3], (64,), 0.05)
    p["conv3_w"] = u(ks[4], (64, 64, 3, 3), 0.05)
    p["conv3_b"] = u(ks[5], (64,), 0.05)

    h1 = (H - 8) // 4 + 1
    h2 = (h1 - 4) // 2 + 1
    h3 = h2 - 3 + 1
    fc_in = 64 * h3 * h3

    p["fc1_w"] = u(ks[6], (fc_in, 1024), 0.05)
    p["fc1_b"] = u(ks[7], (1024,), 0.05)
    p["fc2_w"] = u(ks[8], (1024, 512), 0.05)
    p["fc2_b"] = u(ks[9], (512,), 0.05)
    p["val_w"] = u(ks[10], (512, 1), 0.05)
    p["val_b"] = u(ks[11], (1,), 0.05)
    p["adv_w"] = u(ks[12], (512, n_actions), 0.05)
    p["adv_b"] = u(ks[13], (n_actions,), 0.05)
    return p


def _pad_axis(x, axis, target):
    pad = target - x.shape[axis]
    if pad <= 0:
        return x
    widths = [(0, 0)] * x.ndim
    widths[axis] = (0, pad)
    return jnp.pad(x, widths)


def _round_up(n, m):
    return ((n + m - 1) // m) * m


def pack_params(params):
    """Reorder raw params into kernel-friendly bf16 slabs (once, off hot path).

    No K-side zero padding anywhere.  Only conv1's output channels are padded
    to LANE (its activation is the only one written back to HBM; padded
    channels have zero weight & bias so ReLU keeps them zero and they are
    sliced off in the wrapper).  Biases stay f32 (f32 epilogue).
    """
    bf16 = jnp.bfloat16

    def conv_w(w):                     # OIHW -> (K*K*Cin, Cout), rows (kh, kw, c)
        cout, cin, kh, kw = w.shape
        return jnp.transpose(w, (2, 3, 1, 0)).reshape(kh * kw * cin, cout)

    # Fused flatten path requires conv3's spatial output to be exactly 1x1.
    # TODO(synk): general h3 > 1 flatten path.
    assert params["fc1_w"].shape[0] == params["conv3_w"].shape[0]

    p = {}
    p["conv1_w"] = _pad_axis(conv_w(params["conv1_w"]), 1, LANE).astype(bf16)  # (256,128)
    p["conv1_b"] = _pad_axis(params["conv1_b"], 0, LANE).reshape(1, LANE)
    p["conv2_w"] = conv_w(params["conv2_w"]).astype(bf16)                       # (512, 64)
    p["conv2_b"] = params["conv2_b"].reshape(1, -1)
    cout3, cin3, k3, _ = params["conv3_w"].shape
    p["conv3_w"] = conv_w(params["conv3_w"]).reshape(k3 * k3, cin3, cout3).astype(bf16)  # (9,64,64)
    p["conv3_b"] = params["conv3_b"].reshape(1, -1)
    p["fc1_w"] = params["fc1_w"].astype(bf16)                                   # (64, 1024)
    p["fc1_b"] = params["fc1_b"].reshape(1, -1)
    p["fc2_w"] = params["fc2_w"].astype(bf16)                                   # (1024, 512)
    p["fc2_b"] = params["fc2_b"].reshape(1, -1)
    head_w = jnp.concatenate([params["val_w"], params["adv_w"]], axis=1)        # (512, 1+A)
    head_b = jnp.concatenate([params["val_b"], params["adv_b"]], axis=0)
    nh = _round_up(head_w.shape[1], 8)
    p["head_w"] = _pad_axis(head_w, 1, nh).astype(bf16)                         # (512, 8)
    p["head_b"] = _pad_axis(head_b, 0, nh).reshape(1, nh)
    return p


# ---------------------------------------------------------------------------
# Forward pass (mirrors Network.forward)
# ---------------------------------------------------------------------------
def forward(packed, state, *, n_actions):
    # One NCHW -> NHWC transpose at the boundary; NHWC + bf16 everywhere after.
    x = jnp.transpose(state, (0, 2, 3, 1)).astype(jnp.bfloat16)
    cols1, (B, Ho, Wo) = _im2col_nhwc(x, 8, 4)                        # (B*64, 256)
    c1 = conv1_matmul(cols1, packed["conv1_w"], packed["conv1_b"])    # (B*64, 128)
    c2_cin = packed["conv2_w"].shape[0] // (4 * 4)                    # real conv1 Cout (32)
    c1 = c1.reshape(B, Ho, Wo, LANE)[..., :c2_cin]                    # drop lane padding
    cols2, _ = _im2col_nhwc(c1, 4, 2, patch_major=True)               # (9*B, 512), rows (p, b)
    out = fused_tail(cols2, packed)                                   # (B, 8) f32
    value = out[:, :1]
    advantage = out[:, 1:1 + n_actions]
    return value, advantage


# pure-JAX f32 reference (PyTorch semantics) for the correctness check
def forward_ref(params, state):
    def conv(x, w, b, s):
        y = jax.lax.conv_general_dilated(
            x, w, window_strides=(s, s), padding="VALID",
            dimension_numbers=("NCHW", "OIHW", "NCHW"))
        return jax.nn.relu(y + b[None, :, None, None])

    c1 = conv(state, params["conv1_w"], params["conv1_b"], 4)
    c2 = conv(c1, params["conv2_w"], params["conv2_b"], 2)
    c3 = conv(c2, params["conv3_w"], params["conv3_b"], 1)
    flat = c3.reshape(c3.shape[0], -1)
    f1 = jax.nn.relu(flat @ params["fc1_w"] + params["fc1_b"])
    f2 = jax.nn.relu(f1 @ params["fc2_w"] + params["fc2_b"])
    return (f2 @ params["val_w"] + params["val_b"],
            f2 @ params["adv_w"] + params["adv_b"])


if __name__ == "__main__":
    key = jax.random.PRNGKey(0)
    n_actions = 6
    input_dims = (4, 36, 36)     # small but valid for the 8/4, 4/2, 3/1 stack
    batch = 2

    k_param, k_state = jax.random.split(key)
    params = init_params(k_param, input_dims, n_actions)
    state = jax.random.uniform(k_state, (batch,) + input_dims, jnp.float32)

    packed = pack_params(params)     # one-time weight reorder / bf16 cast

    fwd = jax.jit(functools.partial(forward, n_actions=n_actions))
    value, advantage = fwd(packed, state)
    jax.block_until_ready((value, advantage))

    assert value.shape == (batch, 1) and advantage.shape == (batch, n_actions)

    # Reference with the same bf16-rounded weights (tight check: kernel error
    # here comes only from bf16 activation rounding, f32 accumulation).
    def bf16_round(x):
        return x.astype(jnp.bfloat16).astype(jnp.float32)
    params_bf = {k: (bf16_round(v) if k.endswith("_w") else v)
                 for k, v in params.items()}
    v_bf, a_bf = forward_ref(params_bf, state)
    assert jnp.allclose(value, v_bf, atol=1e-2, rtol=1e-2)
    assert jnp.allclose(advantage, a_bf, atol=1e-2, rtol=1e-2)

    # Full-f32 PyTorch-semantics reference (looser: includes bf16 weight cast).
    v_ref, a_ref = forward_ref(params, state)
    assert jnp.allclose(value, v_ref, atol=2e-2, rtol=2e-2)
    assert jnp.allclose(advantage, a_ref, atol=2e-2, rtol=2e-2)

    print("KERNEL_OK")
</pallas_src>

<mosaic_0001>
module attributes {stable_mosaic.version = 11 : i64} {
  func.func @_conv1_kernel(%arg0: memref<128x256xbf16, #tpu.memory_space<vmem>>, %arg1: memref<256x128xbf16, #tpu.memory_space<vmem>>, %arg2: memref<1x128xf32, #tpu.memory_space<vmem>>, %arg3: memref<128x128xbf16, #tpu.memory_space<vmem>>) attributes {dimension_semantics = [], scalar_prefetch = 0 : i64, scratch_operands = 0 : i64, tpu.core_type = #tpu.core_type<tc>} {
    %c0 = arith.constant 0 : index
    %c0_0 = arith.constant 0 : index
    %0 = vector.load %arg0[%c0, %c0_0] : memref<128x256xbf16, #tpu.memory_space<vmem>>, vector<128x256xbf16>
    %c0_1 = arith.constant 0 : index
    %c0_2 = arith.constant 0 : index
    %1 = vector.load %arg1[%c0_1, %c0_2] : memref<256x128xbf16, #tpu.memory_space<vmem>>, vector<256x128xbf16>
    %cst = arith.constant dense<0.000000e+00> : vector<128x128xf32>
    %2 = tpu.matmul %0, %1, %cst {dimension_numbers = #tpu.dot_dimension_numbers<[1], [0], [0], [1], [0, 0, 1, 1], [], []>} : vector<128x256xbf16>, vector<256x128xbf16>, vector<128x128xf32> -> vector<128x128xf32>
    %c0_3 = arith.constant 0 : index
    %c0_4 = arith.constant 0 : index
    %3 = vector.load %arg2[%c0_3, %c0_4] : memref<1x128xf32, #tpu.memory_space<vmem>>, vector<1x128xf32>
    %4 = vector.broadcast %3 : vector<1x128xf32> to vector<128x128xf32>
    %5 = arith.addf %2, %4 : vector<128x128xf32>
    %cst_5 = arith.constant 0.000000e+00 : f32
    %6 = vector.broadcast %cst_5 : f32 to vector<128x128xf32>
    %7 = arith.maximumf %5, %6 : vector<128x128xf32>
    %8 = arith.truncf %7 : vector<128x128xf32> to vector<128x128xbf16>
    %c0_6 = arith.constant 0 : index
    %c0_7 = arith.constant 0 : index
    %9 = vector.load %arg3[%c0_6, %c0_7] : memref<128x128xbf16, #tpu.memory_space<vmem>>, vector<128x128xbf16>
    tpu.vector_store %arg3[%c0_6, %c0_7], %8 {strides = array<i32>} : memref<128x128xbf16, #tpu.memory_space<vmem>>, vector<128x128xbf16>,
    return
  }
}

module attributes {stable_mosaic.version = 11 : i64} {
  func.func @_tail_kernel(%arg0: memref<18x512xbf16, #tpu.memory_space<vmem>>, %arg1: memref<512x64xbf16, #tpu.memory_space<vmem>>, %arg2: memref<1x64xf32, #tpu.memory_space<vmem>>, %arg3: memref<9x64x64xbf16, #tpu.memory_space<vmem>>, %arg4: memref<1x64xf32, #tpu.memory_space<vmem>>, %arg5: memref<64x1024xbf16, #tpu.memory_space<vmem>>, %arg6: memref<1x1024xf32, #tpu.memory_space<vmem>>, %arg7: memref<1024x512xbf16, #tpu.memory_space<vmem>>, %arg8: memref<1x512xf32, #tpu.memory_space<vmem>>, %arg9: memref<512x8xbf16, #tpu.memory_space<vmem>>, %arg10: memref<1x8xf32, #tpu.memory_space<vmem>>, %arg11: memref<2x8xf32, #tpu.memory_space<vmem>>) attributes {dimension_semantics = [], scalar_prefetch = 0 : i64, scratch_operands = 0 : i64, tpu.core_type = #tpu.core_type<tc>} {
    %c0 = arith.constant 0 : index
    %c0_0 = arith.constant 0 : index
    %0 = vector.load %arg0[%c0, %c0_0] : memref<18x512xbf16, #tpu.memory_space<vmem>>, vector<18x512xbf16>
    %c0_1 = arith.constant 0 : index
    %c0_2 = arith.constant 0 : index
    %1 = vector.load %arg1[%c0_1, %c0_2] : memref<512x64xbf16, #tpu.memory_space<vmem>>, vector<512x64xbf16>
    %cst = arith.constant dense<0.000000e+00> : vector<18x64xf32>
    %2 = tpu.matmul %0, %1, %cst {dimension_numbers = #tpu.dot_dimension_numbers<[1], [0], [0], [1], [0, 0, 1, 1], [], []>} : vector<18x512xbf16>, vector<512x64xbf16>, vector<18x64xf32> -> vector<18x64xf32>
    %c0_3 = arith.constant 0 : index
    %c0_4 = arith.constant 0 : index
    %3 = vector.load %arg2[%c0_3, %c0_4] : memref<1x64xf32, #tpu.memory_space<vmem>>, vector<1x64xf32>
    %4 = vector.broadcast %3 : vector<1x64xf32> to vector<18x64xf32>
    %5 = arith.addf %2, %4 : vector<18x64xf32>
    %cst_5 = arith.constant 0.000000e+00 : f32
    %6 = vector.broadcast %cst_5 : f32 to vector<18x64xf32>
    %7 = arith.maximumf %5, %6 : vector<18x64xf32>
    %8 = arith.truncf %7 : vector<18x64xf32> to vector<18x64xbf16>
    %cst_6 = arith.constant 0.000000e+00 : f32
    %9 = vector.broadcast %cst_6 : f32 to vector<2x64xf32>
    %10 = vector.extract_strided_slice %8 {offsets = [0, 0], sizes = [2, 64], strides = [1, 1]} : vector<18x64xbf16> to vector<2x64xbf16>
    %c0_7 = arith.constant 0 : index
    %c0_8 = arith.constant 0 : index
    %c0_9 = arith.constant 0 : index
    %11 = vector.load %arg3[%c0_7, %c0_8, %c0_9] : memref<9x64x64xbf16, #tpu.memory_space<vmem>>, vector<1x64x64xbf16>
    %12 = vector.shape_cast %11 : vector<1x64x64xbf16> to vector<64x64xbf16>
    %cst_10 = arith.constant dense<0.000000e+00> : vector<2x64xf32>
    %13 = tpu.matmul %10, %12, %cst_10 {dimension_numbers = #tpu.dot_dimension_numbers<[1], [0], [0], [1], [0, 0, 1, 1], [], []>} : vector<2x64xbf16>, vector<64x64xbf16>, vector<2x64xf32> -> vector<2x64xf32>
    %14 = arith.addf %9, %13 : vector<2x64xf32>
    %15 = vector.extract_strided_slice %8 {offsets = [2, 0], sizes = [2, 64], strides = [1, 1]} : vector<18x64xbf16> to vector<2x64xbf16>
    %c1 = arith.constant 1 : index
    %c0_11 = arith.constant 0 : index
    %c0_12 = arith.constant 0 : index
    %16 = vector.load %arg3[%c1, %c0_11, %c0_12] : memref<9x64x64xbf16, #tpu.memory_space<vmem>>, vector<1x64x64xbf16>
    %17 = vector.shape_cast %16 : vector<1x64x64xbf16> to vector<64x64xbf16>
    %cst_13 = arith.constant dense<0.000000e+00> : vector<2x64xf32>
    %18 = tpu.matmul %15, %17, %cst_13 {dimension_numbers = #tpu.dot_dimension_numbers<[1], [0], [0], [1], [0, 0, 1, 1], [], []>} : vector<2x64xbf16>, vector<64x64xbf16>, vector<2x64xf32> -> vector<2x64xf32>
    %19 = arith.addf %14, %18 : vector<2x64xf32>
    %20 = vector.extract_strided_slice %8 {offsets = [4, 0], sizes = [2, 64], strides = [1, 1]} : vector<18x64xbf16> to vector<2x64xbf16>
    %c2 = arith.constant 2 : index
    %c0_14 = arith.constant 0 : index
    %c0_15 = arith.constant 0 : index
    %21 = vector.load %arg3[%c2, %c0_14, %c0_15] : memref<9x64x64xbf16, #tpu.memory_space<vmem>>, vector<1x64x64xbf16>
    %22 = vector.shape_cast %21 : vector<1x64x64xbf16> to vector<64x64xbf16>
    %cst_16 = arith.constant dense<0.000000e+00> : vector<2x64xf32>
    %23 = tpu.matmul %20, %22, %cst_16 {dimension_numbers = #tpu.dot_dimension_numbers<[1], [0], [0], [1], [0, 0, 1, 1], [], []>} : vector<2x64xbf16>, vector<64x64xbf16>, vector<2x64xf32> -> vector<2x64xf32>
    %24 = arith.addf %19, %23 : vector<2x64xf32>
    %25 = vector.extract_strided_slice %8 {offsets = [6, 0], sizes = [2, 64], strides = [1, 1]} : vector<18x64xbf16> to vector<2x64xbf16>
    %c3 = arith.constant 3 : index
    %c0_17 = arith.constant 0 : index
    %c0_18 = arith.constant 0 : index
    %26 = vector.load %arg3[%c3, %c0_17, %c0_18] : memref<9x64x64xbf16, #tpu.memory_space<vmem>>, vector<1x64x64xbf16>
    %27 = vector.shape_cast %26 : vector<1x64x64xbf16> to vector<64x64xbf16>
    %cst_19 = arith.constant dense<0.000000e+00> : vector<2x64xf32>
    %28 = tpu.matmul %25, %27, %cst_19 {dimension_numbers = #tpu.dot_dimension_numbers<[1], [0], [0], [1], [0, 0, 1, 1], [], []>} : vector<2x64xbf16>, vector<64x64xbf16>, vector<2x64xf32> -> vector<2x64xf32>
    %29 = arith.addf %24, %28 : vector<2x64xf32>
    %30 = vector.extract_strided_slice %8 {offsets = [8, 0], sizes = [2, 64], strides = [1, 1]} : vector<18x64xbf16> to vector<2x64xbf16>
    %c4 = arith.constant 4 : index
    %c0_20 = arith.constant 0 : index
    %c0_21 = arith.constant 0 : index
    %31 = vector.load %arg3[%c4, %c0_20, %c0_21] : memref<9x64x64xbf16, #tpu.memory_space<vmem>>, vector<1x64x64xbf16>
    %32 = vector.shape_cast %31 : vector<1x64x64xbf16> to vector<64x64xbf16>
    %cst_22 = arith.constant dense<0.000000e+00> : vector<2x64xf32>
    %33 = tpu.matmul %30, %32, %cst_22 {dimension_numbers = #tpu.dot_dimension_numbers<[1], [0], [0], [1], [0, 0, 1, 1], [], []>} : vector<2x64xbf16>, vector<64x64xbf16>, vector<2x64xf32> -> vector<2x64xf32>
    %34 = arith.addf %29, %33 : vector<2x64xf32>
    %35 = vector.extract_strided_slice %8 {offsets = [10, 0], sizes = [2, 64], strides = [1, 1]} : vector<18x64xbf16> to vector<2x64xbf16>
    %c5 = arith.constant 5 : index
    %c0_23 = arith.constant 0 : index
    %c0_24 = arith.constant 0 : index
    %36 = vector.load %arg3[%c5, %c0_23, %c0_24] : memref<9x64x64xbf16, #tpu.memory_space<vmem>>, vector<1x64x64xbf16>
    %37 = vector.shape_cast %36 : vector<1x64x64xbf16> to vector<64x64xbf16>
    %cst_25 = arith.constant dense<0.000000e+00> : vector<2x64xf32>
    %38 = tpu.matmul %35, %37, %cst_25 {dimension_numbers = #tpu.dot_dimension_numbers<[1], [0], [0], [1], [0, 0, 1, 1], [], []>} : vector<2x64xbf16>, vector<64x64xbf16>, vector<2x64xf32> -> vector<2x64xf32>
    %39 = arith.addf %34, %38 : vector<2x64xf32>
    %40 = vector.extract_strided_slice %8 {offsets = [12, 0], sizes = [2, 64], strides = [1, 1]} : vector<18x64xbf16> to vector<2x64xbf16>
    %c6 = arith.constant 6 : index
    %c0_26 = arith.constant 0 : index
    %c0_27 = arith.constant 0 : index
    %41 = vector.load %arg3[%c6, %c0_26, %c0_27] : memref<9x64x64xbf16, #tpu.memory_space<vmem>>, vector<1x64x64xbf16>
    %42 = vector.shape_cast %41 : vector<1x64x64xbf16> to vector<64x64xbf16>
    %cst_28 = arith.constant dense<0.000000e+00> : vector<2x64xf32>
    %43 = tpu.matmul %40, %42, %cst_28 {dimension_numbers = #tpu.dot_dimension_numbers<[1], [0], [0], [1], [0, 0, 1, 1], [], []>} : vector<2x64xbf16>, vector<64x64xbf16>, vector<2x64xf32> -> vector<2x64xf32>
    %44 = arith.addf %39, %43 : vector<2x64xf32>
    %45 = vector.extract_strided_slice %8 {offsets = [14, 0], sizes = [2, 64], strides = [1, 1]} : vector<18x64xbf16> to vector<2x64xbf16>
    %c7 = arith.constant 7 : index
    %c0_29 = arith.constant 0 : index
    %c0_30 = arith.constant 0 : index
    %46 = vector.load %arg3[%c7, %c0_29, %c0_30] : memref<9x64x64xbf16, #tpu.memory_space<vmem>>, vector<1x64x64xbf16>
    %47 = vector.shape_cast %46 : vector<1x64x64xbf16> to vector<64x64xbf16>
    %cst_31 = arith.constant dense<0.000000e+00> : vector<2x64xf32>
    %48 = tpu.matmul %45, %47, %cst_31 {dimension_numbers = #tpu.dot_dimension_numbers<[1], [0], [0], [1], [0, 0, 1, 1], [], []>} : vector<2x64xbf16>, vector<64x64xbf16>, vector<2x64xf32> -> vector<2x64xf32>
    %49 = arith.addf %44, %48 : vector<2x64xf32>
    %50 = vector.extract_strided_slice %8 {offsets = [16, 0], sizes = [2, 64], strides = [1, 1]} : vector<18x64xbf16> to vector<2x64xbf16>
    %c8 = arith.constant 8 : index
    %c0_32 = arith.constant 0 : index
    %c0_33 = arith.constant 0 : index
    %51 = vector.load %arg3[%c8, %c0_32, %c0_33] : memref<9x64x64xbf16, #tpu.memory_space<vmem>>, vector<1x64x64xbf16>
    %52 = vector.shape_cast %51 : vector<1x64x64xbf16> to vector<64x64xbf16>
    %cst_34 = arith.constant dense<0.000000e+00> : vector<2x64xf32>
    %53 = tpu.matmul %50, %52, %cst_34 {dimension_numbers = #tpu.dot_dimension_numbers<[1], [0], [0], [1], [0, 0, 1, 1], [], []>} : vector<2x64xbf16>, vector<64x64xbf16>, vector<2x64xf32> -> vector<2x64xf32>
    %54 = arith.addf %49, %53 : vector<2x64xf32>
    %c0_35 = arith.constant 0 : index
    %c0_36 = arith.constant 0 : index
    %55 = vector.load %arg4[%c0_35, %c0_36] : memref<1x64xf32, #tpu.memory_space<vmem>>, vector<1x64xf32>
    %56 = vector.broadcast %55 : vector<1x64xf32> to vector<2x64xf32>
    %57 = arith.addf %54, %56 : vector<2x64xf32>
    %cst_37 = arith.constant 0.000000e+00 : f32
    %58 = vector.broadcast %cst_37 : f32 to vector<2x64xf32>
    %59 = arith.maximumf %57, %58 : vector<2x64xf32>
    %60 = arith.truncf %59 : vector<2x64xf32> to vector<2x64xbf16>
    %c0_38 = arith.constant 0 : index
    %c0_39 = arith.constant 0 : index
    %61 = vector.load %arg5[%c0_38, %c0_39] : memref<64x1024xbf16, #tpu.memory_space<vmem>>, vector<64x1024xbf16>
    %cst_40 = arith.constant dense<0.000000e+00> : vector<2x1024xf32>
    %62 = tpu.matmul %60, %61, %cst_40 {dimension_numbers = #tpu.dot_dimension_numbers<[1], [0], [0], [1], [0, 0, 1, 1], [], []>} : vector<2x64xbf16>, vector<64x1024xbf16>, vector<2x1024xf32> -> vector<2x1024xf32>
    %c0_41 = arith.constant 0 : index
    %c0_42 = arith.constant 0 : index
    %63 = vector.load %arg6[%c0_41, %c0_42] : memref<1x1024xf32, #tpu.memory_space<vmem>>, vector<1x1024xf32>
    %64 = vector.broadcast %63 : vector<1x1024xf32> to vector<2x1024xf32>
    %65 = arith.addf %62, %64 : vector<2x1024xf32>
    %cst_43 = arith.constant 0.000000e+00 : f32
    %66 = vector.broadcast %cst_43 : f32 to vector<2x1024xf32>
    %67 = arith.maximumf %65, %66 : vector<2x1024xf32>
    %68 = arith.truncf %67 : vector<2x1024xf32> to vector<2x1024xbf16>
    %c0_44 = arith.constant 0 : index
    %c0_45 = arith.constant 0 : index
    %69 = vector.load %arg7[%c0_44, %c0_45] : memref<1024x512xbf16, #tpu.memory_space<vmem>>, vector<1024x512xbf16>
    %cst_46 = arith.constant dense<0.000000e+00> : vector<2x512xf32>
    %70 = tpu.matmul %68, %69, %cst_46 {dimension_numbers = #tpu.dot_dimension_numbers<[1], [0], [0], [1], [0, 0, 1, 1], [], []>} : vector<2x1024xbf16>, vector<1024x512xbf16>, vector<2x512xf32> -> vector<2x512xf32>
    %c0_47 = arith.constant 0 : index
    %c0_48 = arith.constant 0 : index
    %71 = vector.load %arg8[%c0_47, %c0_48] : memref<1x512xf32, #tpu.memory_space<vmem>>, vector<1x512xf32>
    %72 = vector.broadcast %71 : vector<1x512xf32> to vector<2x512xf32>
    %73 = arith.addf %70, %72 : vector<2x512xf32>
    %cst_49 = arith.constant 0.000000e+00 : f32
    %74 = vector.broadcast %cst_49 : f32 to vector<2x512xf32>
    %75 = arith.maximumf %73, %74 : vector<2x512xf32>
    %76 = arith.truncf %75 : vector<2x512xf32> to vector<2x512xbf16>
    %c0_50 = arith.constant 0 : index
    %c0_51 = arith.constant 0 : index
    %77 = vector.load %arg9[%c0_50, %c0_51] : memref<512x8xbf16, #tpu.memory_space<vmem>>, vector<512x8xbf16>
    %cst_52 = arith.constant dense<0.000000e+00> : vector<2x8xf32>
    %78 = tpu.matmul %76, %77, %cst_52 {dimension_numbers = #tpu.dot_dimension_numbers<[1], [0], [0], [1], [0, 0, 1, 1], [], []>} : vector<2x512xbf16>, vector<512x8xbf16>, vector<2x8xf32> -> vector<2x8xf32>
    %c0_53 = arith.constant 0 : index
    %c0_54 = arith.constant 0 : index
    %79 = vector.load %arg10[%c0_53, %c0_54] : memref<1x8xf32, #tpu.memory_space<vmem>>, vector<1x8xf32>
    %80 = vector.broadcast %79 : vector<1x8xf32> to vector<2x8xf32>
    %81 = arith.addf %78, %80 : vector<2x8xf32>
    %c0_55 = arith.constant 0 : index
    %c0_56 = arith.constant 0 : index
    %82 = vector.load %arg11[%c0_55, %c0_56] : memref<2x8xf32, #tpu.memory_space<vmem>>, vector<2x8xf32>
    tpu.vector_store %arg11[%c0_55, %c0_56], %81 {strides = array<i32>} : memref<2x8xf32, #tpu.memory_space<vmem>>, vector<2x8xf32>,
    return
  }
}

</mosaic_0001>

<bundles_post_ra>
// kernel: forward.2
= control target key start
LH: loop header
LB: loop body
LE: loop exit
PB: predicated region body
PF: predicated region fallthrough
CT: control target
= control target key end

     0   :  { %s825_s1 = inlined_call_operand.vmem [shape: bf16[256,128], index: 1, kind: input, shape index: {}]   ;;  %s826_s2 = inlined_call_operand.vmem [shape: f32[1,128], index: 2, kind: input, shape index: {}]   ;;  %s827_s0 = inlined_call_operand.vmem [shape: bf16[128,256], index: 0, kind: input, shape index: {}]   ;;  %s828_s3 = inlined_call_operand.vmem [shape: bf16[128,128], index: 3, kind: output, shape index: {}]  }
   0x1   :  { %v543_v0 = vld [vmem:[%s825_s1 + $0x38] sm:$0xff]  ;;  %v542_v2 = vld [vmem:[%s825_s1 + $0x30] sm:$0xff]  ;;  %v541_v4 = vld [vmem:[%s825_s1 + $0x28] sm:$0xff] }
   0x2   :  { %v551_v1 = vld [vmem:[%s825_s1 + $0x78] sm:$0xff]  ;;  %242 = vmatpush.bf16.msra.mxu0 %v543_v0  ;;  %599 = vmatpush.bf16.msra.mxu2 %v543_v0  ;;  %v550_v3 = vld [vmem:[%s825_s1 + $0x70] sm:$0xff]  ;;  %v549_v5 = vld [vmem:[%s825_s1 + $0x68] sm:$0xff] }
   0x3   :  { %291 = vmatpush.bf16.msra.mxu1 %v551_v1  ;;  %607 = vmatpush.bf16.msra.mxu3 %v551_v1  ;;  %v540_v6 = vld [vmem:[%s825_s1 + $0x20] sm:$0xff]  ;;  %v539_v8 = vld [vmem:[%s825_s1 + $0x18] sm:$0xff]  ;;  %v538_v10 = vld [vmem:[%s825_s1 + $0x10] sm:$0xff] }
   0x4   :  { %v548_v7 = vld [vmem:[%s825_s1 + $0x60] sm:$0xff]  ;;  %v547_v9 = vld [vmem:[%s825_s1 + $0x58] sm:$0xff]  ;;  %v546_v11 = vld [vmem:[%s825_s1 + $0x50] sm:$0xff] }
   0x5   :  { %v537_v12 = vld [vmem:[%s825_s1 + $0x8] sm:$0xff]  ;;  %v536_v14 = vld [vmem:[%s825_s1] sm:$0xff]  ;;  %v402_v28 = vld [vmem:[%s827_s0 + $0x10] sm:$0xf] }
   0x6   :  { %243 = vmatpush.bf16.msra.mxu0 %v542_v2  ;;  %600 = vmatpush.bf16.msra.mxu2 %v542_v2  ;;  %v545_v13 = vld [vmem:[%s825_s1 + $0x48] sm:$0xff]  ;;  %v544_v15 = vld [vmem:[%s825_s1 + $0x40] sm:$0xff]  ;;  %v523_v29 = vld [vmem:[%s827_s0 + $0x14] sm:$0xf0] }
   0x7   :  { %292 = vmatpush.bf16.msra.mxu1 %v550_v3  ;;  %608 = vmatpush.bf16.msra.mxu3 %v550_v3  ;;  %v394_v16 = vld [vmem:[%s827_s0] sm:$0xf]  ;;  %v521_v17 = vld [vmem:[%s827_s0 + $0x4] sm:$0xf0]  ;;  %v520_v20 = vld [vmem:[%s827_s0 + $0x4] sm:$0xf]  ;;  %v403_v36 = vor.u32 %v523_v29, %v402_v28 }
   0x8   :  { %v426_v18 = vld [vmem:[%s827_s0 + $0x40] sm:$0xf]  ;;  %v529_v19 = vld [vmem:[%s827_s0 + $0x44] sm:$0xf0]  ;;  %v396_v21 = vld [vmem:[%s827_s0 + $0x8] sm:$0xf0]  ;;  %v395_v24 = vor.u32 %v521_v17, %v394_v16 }
   0x9   :  { %v528_v22 = vld [vmem:[%s827_s0 + $0x44] sm:$0xf]  ;;  %v428_v23 = vld [vmem:[%s827_s0 + $0x48] sm:$0xf0]  ;;  %v427_v25 = vor.u32 %v529_v19, %v426_v18  ;;  %v399_v26 = vor.u32 %v520_v20, %v396_v21  ;;  %v434_v30 = vld [vmem:[%s827_s0 + $0x50] sm:$0xf] }
   0xa   :  { %244 = vmatpush.bf16.msra.mxu0 %v541_v4  ;;  %601 = vmatpush.bf16.msra.mxu2 %v541_v4  ;;  %v431_v27 = vor.u32 %v528_v22, %v428_v23  ;;  %v531_v31 = vld [vmem:[%s827_s0 + $0x54] sm:$0xf0]  ;;  %v522_v32 = vld [vmem:[%s827_s0 + $0x14] sm:$0xf]  ;;  %v404_v33 = vld [vmem:[%s827_s0 + $0x18] sm:$0xf0] }
   0xb   :  { %293 = vmatpush.bf16.msra.mxu1 %v549_v5  ;;  %609 = vmatpush.bf16.msra.mxu3 %v549_v5  ;;  %v530_v34 = vld [vmem:[%s827_s0 + $0x54] sm:$0xf]  ;;  %v436_v35 = vld [vmem:[%s827_s0 + $0x58] sm:$0xf0]  ;;  %v435_v37 = vor.u32 %v531_v31, %v434_v30  ;;  %v407_v38 = vor.u32 %v522_v32, %v404_v33  ;;  %v410_v40 = vld [vmem:[%s827_s0 + $0x20] sm:$0xf] }
   0xc   :  { %v439_v39 = vor.u32 %v530_v34, %v436_v35  ;;  %v525_v41 = vld [vmem:[%s827_s0 + $0x24] sm:$0xf0]  ;;  %v442_v42 = vld [vmem:[%s827_s0 + $0x60] sm:$0xf]  ;;  %v524_v44 = vld [vmem:[%s827_s0 + $0x24] sm:$0xf] }
   0xd   :  { %v533_v43 = vld [vmem:[%s827_s0 + $0x64] sm:$0xf0]  ;;  %v412_v45 = vld [vmem:[%s827_s0 + $0x28] sm:$0xf0]  ;;  %v532_v46 = vld [vmem:[%s827_s0 + $0x64] sm:$0xf]  ;;  %v411_v48 = vor.u32 %v525_v41, %v410_v40 }
   0xe   :  { %245 = vmatpush.bf16.msra.mxu0 %v540_v6  ;;  %602 = vmatpush.bf16.msra.mxu2 %v540_v6  ;;  %v444_v47 = vld [vmem:[%s827_s0 + $0x68] sm:$0xf0]  ;;  %v443_v49 = vor.u32 %v533_v43, %v442_v42  ;;  %v415_v50 = vor.u32 %v524_v44, %v412_v45  ;;  %v418_v52 = vld [vmem:[%s827_s0 + $0x30] sm:$0xf]  ;;  %v527_v53 = vld [vmem:[%s827_s0 + $0x34] sm:$0xf0] }
   0xf   :  { %294 = vmatpush.bf16.msra.mxu1 %v548_v7  ;;  %610 = vmatpush.bf16.msra.mxu3 %v548_v7  ;;  %v447_v51 = vor.u32 %v532_v46, %v444_v47  ;;  %v450_v54 = vld [vmem:[%s827_s0 + $0x70] sm:$0xf]  ;;  %v535_v55 = vld [vmem:[%s827_s0 + $0x74] sm:$0xf0]  ;;  %v526_v56 = vld [vmem:[%s827_s0 + $0x34] sm:$0xf]  ;;  %v419_v60 = vor.u32 %v527_v53, %v418_v52 }
  0x10   :  { %v420_v57 = vld [vmem:[%s827_s0 + $0x38] sm:$0xf0]  ;;  %v534_v58 = vld [vmem:[%s827_s0 + $0x74] sm:$0xf]  ;;  %v451_v61 = vor.u32 %v535_v55, %v450_v54  ;;  %v783_v1 = vld [vmem:[%s826_s2] ss:$0 sm:$0xff] }
  0x11   :  { %v452_v59 = vld [vmem:[%s827_s0 + $0x78] sm:$0xf0]  ;;  %v423_v62 = vor.u32 %v526_v56, %v420_v57 }
  0x12   :  { %246 = vmatpush.bf16.msra.mxu0 %v539_v8  ;;  %603 = vmatpush.bf16.msra.mxu2 %v539_v8  ;;  %v455_v63 = vor.u32 %v534_v58, %v452_v59 }
  0x13   :  { %295 = vmatpush.bf16.msra.mxu1 %v547_v9  ;;  %611 = vmatpush.bf16.msra.mxu3 %v547_v9 }
  0x16   :  { %247 = vmatpush.bf16.msra.mxu0 %v538_v10  ;;  %604 = vmatpush.bf16.msra.mxu2 %v538_v10 }
  0x17   :  { %296 = vmatpush.bf16.msra.mxu1 %v546_v11  ;;  %612 = vmatpush.bf16.msra.mxu3 %v546_v11 }
  0x1a   :  { %248 = vmatpush.bf16.msra.mxu0 %v537_v12  ;;  %605 = vmatpush.bf16.msra.mxu2 %v537_v12 }
  0x1b   :  { %297 = vmatpush.bf16.msra.mxu1 %v545_v13  ;;  %613 = vmatpush.bf16.msra.mxu3 %v545_v13 }
  0x1e   :  { %249 = vmatpush.bf16.msra.mxu0 %v536_v14  ;;  %606 = vmatpush.bf16.msra.mxu2 %v536_v14 }
  0x1f   :  { %298 = vmatpush.bf16.msra.mxu1 %v544_v15  ;;  %614 = vmatpush.bf16.msra.mxu3 %v544_v15 }
  0x21   :  { %250 = vmatmul.bf16.vlgmr.msra.gmra.mxu0 %v395_v24  ;;  %270 = vmatmul.bf16.vlgmr.msra.gmra.mxu2 %v427_v25 }
  0x22   :  { %299 = vmatmul.bf16.vlgmr.msra.gmra.mxu1 %v399_v26  ;;  %319 = vmatmul.bf16.vlgmr.msra.gmra.mxu3 %v431_v27 }
  0x31   :  { %255 = vmatmul.bf16.gmra.mxu0 %v403_v36  ;;  %275 = vmatmul.bf16.gmra.mxu2 %v435_v37 }
  0x32   :  { %304 = vmatmul.bf16.gmra.mxu1 %v407_v38  ;;  %324 = vmatmul.bf16.gmra.mxu3 %v439_v39 }
  0x41   :  { %260 = vmatmul.bf16.gmra.mxu0 %v411_v48  ;;  %280 = vmatmul.bf16.gmra.mxu2 %v443_v49 }
  0x42   :  { %309 = vmatmul.bf16.gmra.mxu1 %v415_v50  ;;  %329 = vmatmul.bf16.gmra.mxu3 %v447_v51 }
  0x51   :  { %265 = vmatmul.bf16.gmra.mxu0 %v419_v60  ;;  %285 = vmatmul.bf16.gmra.mxu2 %v451_v61 }
  0x52   :  { %314 = vmatmul.bf16.gmra.mxu1 %v423_v62  ;;  %334 = vmatmul.bf16.gmra.mxu3 %v455_v63 }
  0x9e   :  { %v251_v0 = vpop.f32.mrf.mxu0 }
  0x9f   :  { %v300_v2 = vpop.f32.mrf.mxu1  ;;  %v252_v3 = vadd.f32 %v783_v1, %v251_v0 }
  0xa1   :  { %v301_v7 = vadd.f32 %v300_v2, %v252_v3 }
  0xa3   :  { %v340_v12 = vmax.f32 %v301_v7, 0.0 }
  0xa4   :  { %v271_v4 = vpop.f32.mrf.mxu2 }
  0xa5   :  { %v320_v5 = vpop.f32.mrf.mxu3  ;;  %v272_v10 = vadd.f32 %v783_v1, %v271_v4 }
  0xa6   :  { %v253_v6 = vpop.f32.mrf.mxu0 }
  0xa7   :  { %v254_v8 = vadd.f32 %v783_v1, %v253_v6  ;;  %v302_v9 = vpop.f32.mrf.mxu1  ;;  %v321_v15 = vadd.f32 %v320_v5, %v272_v10 }
  0xa9   :  { %v303_v11 = vadd.f32 %v302_v9, %v254_v8  ;;  %v348_v22 = vmax.f32 %v321_v15, 0.0 }
  0xab   :  { %v341_v13 = vmax.f32 %v303_v11, 0.0 }
  0xac   :  { %v273_v14 = vpop.f32.mrf.mxu2 }
  0xad   :  { %v555_v16 = vpack.c.bf16 %v341_v13, %v340_v12  ;;  %v274_v17 = vadd.f32 %v783_v1, %v273_v14  ;;  %v322_v18 = vpop.f32.mrf.mxu3 }
  0xae   :  { %v256_v19 = vpop.f32.mrf.mxu0 }
  0xaf   :  { %556 = vst [vmem:[%s828_s3] sm:$0xff] %v555_v16   ;;  %v323_v20 = vadd.f32 %v322_v18, %v274_v17  ;;  %v305_v21 = vpop.f32.mrf.mxu1  ;;  %v257_v25 = vadd.f32 %v783_v1, %v256_v19 }
  0xb1   :  { %v349_v23 = vmax.f32 %v323_v20, 0.0  ;;  %v306_v29 = vadd.f32 %v305_v21, %v257_v25 }
  0xb3   :  { %v575_v24 = vpack.c.bf16 %v349_v23, %v348_v22  ;;  %v342_v34 = vmax.f32 %v306_v29, 0.0 }
  0xb4   :  { %v276_v26 = vpop.f32.mrf.mxu2 }
  0xb5   :  { %595 = vst [vmem:[%s828_s3 + $0x20] sm:$0xff] %v575_v24   ;;  %v325_v27 = vpop.f32.mrf.mxu3  ;;  %v277_v32 = vadd.f32 %v783_v1, %v276_v26 }
  0xb6   :  { %v258_v28 = vpop.f32.mrf.mxu0 }
  0xb7   :  { %v259_v30 = vadd.f32 %v783_v1, %v258_v28  ;;  %v307_v31 = vpop.f32.mrf.mxu1  ;;  %v326_v37 = vadd.f32 %v325_v27, %v277_v32 }
  0xb9   :  { %v308_v33 = vadd.f32 %v307_v31, %v259_v30  ;;  %v350_v44 = vmax.f32 %v326_v37, 0.0 }
  0xbb   :  { %v343_v35 = vmax.f32 %v308_v33, 0.0 }
  0xbc   :  { %v278_v36 = vpop.f32.mrf.mxu2 }
  0xbd   :  { %v560_v38 = vpack.c.bf16 %v343_v35, %v342_v34  ;;  %v279_v39 = vadd.f32 %v783_v1, %v278_v36  ;;  %v327_v40 = vpop.f32.mrf.mxu3 }
  0xbe   :  { %v261_v41 = vpop.f32.mrf.mxu0 }
  0xbf   :  { %592 = vst [vmem:[%s828_s3 + $0x8] sm:$0xff] %v560_v38   ;;  %v328_v42 = vadd.f32 %v327_v40, %v279_v39  ;;  %v310_v43 = vpop.f32.mrf.mxu1  ;;  %v262_v47 = vadd.f32 %v783_v1, %v261_v41 }
  0xc1   :  { %v351_v45 = vmax.f32 %v328_v42, 0.0  ;;  %v311_v51 = vadd.f32 %v310_v43, %v262_v47 }
  0xc3   :  { %v580_v46 = vpack.c.bf16 %v351_v45, %v350_v44  ;;  %v344_v56 = vmax.f32 %v311_v51, 0.0 }
  0xc4   :  { %v281_v48 = vpop.f32.mrf.mxu2 }
  0xc5   :  { %596 = vst [vmem:[%s828_s3 + $0x28] sm:$0xff] %v580_v46   ;;  %v330_v49 = vpop.f32.mrf.mxu3  ;;  %v282_v54 = vadd.f32 %v783_v1, %v281_v48 }
  0xc6   :  { %v263_v50 = vpop.f32.mrf.mxu0 }
  0xc7   :  { %v264_v52 = vadd.f32 %v783_v1, %v263_v50  ;;  %v312_v53 = vpop.f32.mrf.mxu1  ;;  %v331_v59 = vadd.f32 %v330_v49, %v282_v54 }
  0xc9   :  { %v313_v55 = vadd.f32 %v312_v53, %v264_v52  ;;  %v352_v3 = vmax.f32 %v331_v59, 0.0 }
  0xcb   :  { %v345_v57 = vmax.f32 %v313_v55, 0.0 }
  0xcc   :  { %v283_v58 = vpop.f32.mrf.mxu2 }
  0xcd   :  { %v565_v60 = vpack.c.bf16 %v345_v57, %v344_v56  ;;  %v284_v61 = vadd.f32 %v783_v1, %v283_v58  ;;  %v332_v62 = vpop.f32.mrf.mxu3 }
  0xce   :  { %v266_v63 = vpop.f32.mrf.mxu0 }
  0xcf   :  { %593 = vst [vmem:[%s828_s3 + $0x10] sm:$0xff] %v565_v60   ;;  %v333_v0 = vadd.f32 %v332_v62, %v284_v61  ;;  %v315_v2 = vpop.f32.mrf.mxu1  ;;  %v267_v6 = vadd.f32 %v783_v1, %v266_v63 }
  0xd1   :  { %v353_v4 = vmax.f32 %v333_v0, 0.0  ;;  %v316_v10 = vadd.f32 %v315_v2, %v267_v6 }
  0xd3   :  { %v585_v5 = vpack.c.bf16 %v353_v4, %v352_v3  ;;  %v346_v15 = vmax.f32 %v316_v10, 0.0 }
  0xd4   :  { %v286_v7 = vpop.f32.mrf.mxu2 }
  0xd5   :  { %597 = vst [vmem:[%s828_s3 + $0x30] sm:$0xff] %v585_v5   ;;  %v335_v8 = vpop.f32.mrf.mxu3  ;;  %v287_v13 = vadd.f32 %v783_v1, %v286_v7 }
  0xd6   :  { %v268_v9 = vpop.f32.mrf.mxu0 }
  0xd7   :  { %v269_v11 = vadd.f32 %v783_v1, %v268_v9  ;;  %v317_v12 = vpop.f32.mrf.mxu1  ;;  %v336_v18 = vadd.f32 %v335_v8, %v287_v13 }
  0xd9   :  { %v318_v14 = vadd.f32 %v317_v12, %v269_v11  ;;  %v354_v23 = vmax.f32 %v336_v18, 0.0 }
  0xdb   :  { %v347_v16 = vmax.f32 %v318_v14, 0.0 }
  0xdc   :  { %v288_v17 = vpop.f32.mrf.mxu2 }
  0xdd   :  { %v570_v19 = vpack.c.bf16 %v347_v16, %v346_v15  ;;  %v289_v20 = vadd.f32 %v783_v1, %v288_v17  ;;  %v337_v21 = vpop.f32.mrf.mxu3 }
  0xdf   :  { %594 = vst [vmem:[%s828_s3 + $0x18] sm:$0xff] %v570_v19   ;;  %v338_v22 = vadd.f32 %v337_v21, %v289_v20 }
  0xe1   :  { %v355_v24 = vmax.f32 %v338_v22, 0.0 }
  0xe3   :  { %v590_v25 = vpack.c.bf16 %v355_v24, %v354_v23 }
  0xe5   :  { %598 = vst [vmem:[%s828_s3 + $0x38] sm:$0xff] %v590_v25  }

// kernel: forward.3
= control target key start
LH: loop header
LB: loop body
LE: loop exit
PB: predicated region body
PF: predicated region fallthrough
CT: control target
= control target key end

     0   :  { %vm462_vm0 = vcmask 523264   ;;  %vm3499_vm1 = vcmask 58368   ;;  %s7818_s1 = inlined_call_operand.vmem [shape: bf16[512,64], index: 1, kind: input, shape index: {}]   ;;  %s7819_s2 = inlined_call_operand.vmem [shape: f32[1,64], index: 2, kind: input, shape index: {}]   ;;  %s7820_s0 = inlined_call_operand.vmem [shape: bf16[18,512], index: 0, kind: input, shape index: {}]   ;;  %s7821_s3 = inlined_call_operand.vmem [shape: bf16[9,64,64], index: 3, kind: input, shape index: {}]   ;;  %s7822_s4 = inlined_call_operand.vmem [shape: f32[1,64], index: 4, kind: input, shape index: {}]   ;;  %s7823_s5 = inlined_call_operand.vmem [shape: bf16[64,1024], index: 5, kind: input, shape index: {}]   ;;  %s7824_s7 = inlined_call_operand.vmem [shape: bf16[1024,512], index: 7, kind: input, shape index: {}]   ;;  %s7825_s6 = inlined_call_operand.vmem [shape: f32[1,1024], index: 6, kind: input, shape index: {}]   ;;  %s7826_s8 = inlined_call_operand.vmem [shape: f32[1,512], index: 8, kind: input, shape index: {}]   ;;  %s7827_s9 = inlined_call_operand.vmem [shape: bf16[512,8], index: 9, kind: input, shape index: {}]   ;;  %s7828_s10 = inlined_call_operand.vmem [shape: f32[1,8], index: 10, kind: input, shape index: {}]   ;;  %s7829_s11 = inlined_call_operand.vmem [shape: f32[2,8], index: 11, kind: output, shape index: {}]  }
   0x1   :  { %v5165_v0 = vld [vmem:[%s7818_s1 + $0x38] sm:$0xff]  ;;  %v5164_v4 = vld [vmem:[%s7818_s1 + $0x30] sm:$0xff]  ;;  %v5163_v8 = vld [vmem:[%s7818_s1 + $0x28] sm:$0xff] }
   0x2   :  { %v5173_v1 = vld [vmem:[%s7818_s1 + $0x78] sm:$0xff]  ;;  %339 = vmatpush.bf16.msra.mxu0 %v5165_v0  ;;  %v5172_v5 = vld [vmem:[%s7818_s1 + $0x70] sm:$0xff]  ;;  %v5171_v9 = vld [vmem:[%s7818_s1 + $0x68] sm:$0xff] }
   0x3   :  { %v5181_v2 = vld [vmem:[%s7818_s1 + $0xb8] sm:$0xff]  ;;  %357 = vmatpush.bf16.msra.mxu1 %v5173_v1  ;;  %v5180_v6 = vld [vmem:[%s7818_s1 + $0xb0] sm:$0xff]  ;;  %v5179_v10 = vld [vmem:[%s7818_s1 + $0xa8] sm:$0xff] }
   0x4   :  { %v5189_v3 = vld [vmem:[%s7818_s1 + $0xf8] sm:$0xff]  ;;  %375 = vmatpush.bf16.msra.mxu2 %v5181_v2  ;;  %v5188_v7 = vld [vmem:[%s7818_s1 + $0xf0] sm:$0xff]  ;;  %v5187_v11 = vld [vmem:[%s7818_s1 + $0xe8] sm:$0xff] }
   0x5   :  { %393 = vmatpush.bf16.msra.mxu3 %v5189_v3  ;;  %v5162_v12 = vld [vmem:[%s7818_s1 + $0x20] sm:$0xff]  ;;  %v5161_v16 = vld [vmem:[%s7818_s1 + $0x18] sm:$0xff]  ;;  %v5160_v20 = vld [vmem:[%s7818_s1 + $0x10] sm:$0xff] }
   0x6   :  { %340 = vmatpush.bf16.msra.mxu0 %v5164_v4  ;;  %v5170_v13 = vld [vmem:[%s7818_s1 + $0x60] sm:$0xff]  ;;  %v5169_v17 = vld [vmem:[%s7818_s1 + $0x58] sm:$0xff]  ;;  %v5168_v21 = vld [vmem:[%s7818_s1 + $0x50] sm:$0xff] }
   0x7   :  { %358 = vmatpush.bf16.msra.mxu1 %v5172_v5  ;;  %v5178_v14 = vld [vmem:[%s7818_s1 + $0xa0] sm:$0xff]  ;;  %v5177_v18 = vld [vmem:[%s7818_s1 + $0x98] sm:$0xff]  ;;  %v5176_v22 = vld [vmem:[%s7818_s1 + $0x90] sm:$0xff] }
   0x8   :  { %376 = vmatpush.bf16.msra.mxu2 %v5180_v6  ;;  %v5186_v15 = vld [vmem:[%s7818_s1 + $0xe0] sm:$0xff]  ;;  %v5185_v19 = vld [vmem:[%s7818_s1 + $0xd8] sm:$0xff]  ;;  %v5184_v23 = vld [vmem:[%s7818_s1 + $0xd0] sm:$0xff] }
   0x9   :  { %394 = vmatpush.bf16.msra.mxu3 %v5188_v7  ;;  %v5159_v24 = vld [vmem:[%s7818_s1 + $0x8] sm:$0xff]  ;;  %v5158_v28 = vld [vmem:[%s7818_s1] sm:$0xff]  ;;  %v5156_v33 = vld [vmem:[%s7820_s0 + $0xc] sm:$0xf0] }
   0xa   :  { %341 = vmatpush.bf16.msra.mxu0 %v5163_v8  ;;  %v5167_v25 = vld [vmem:[%s7818_s1 + $0x48] sm:$0xff]  ;;  %v5166_v29 = vld [vmem:[%s7818_s1 + $0x40] sm:$0xff]  ;;  %v3509_v35 = vld [vmem:[%s7820_s0 + $0x10] sm:$0xf0] }
   0xb   :  { %359 = vmatpush.bf16.msra.mxu1 %v5171_v9  ;;  %v5175_v26 = vld [vmem:[%s7818_s1 + $0x88] sm:$0xff]  ;;  %v5174_v30 = vld [vmem:[%s7818_s1 + $0x80] sm:$0xff]  ;;  %v5157_v37 = vld [vmem:[%s7820_s0 + $0x14] sm:$0xf0] }
   0xc   :  { %377 = vmatpush.bf16.msra.mxu2 %v5179_v10  ;;  %v5183_v27 = vld [vmem:[%s7818_s1 + $0xc8] sm:$0xff]  ;;  %v5182_v31 = vld [vmem:[%s7818_s1 + $0xc0] sm:$0xff]  ;;  %v3517_v39 = vld [vmem:[%s7820_s0 + $0x18] sm:$0xf0] }
   0xd   :  { %395 = vmatpush.bf16.msra.mxu3 %v5187_v11  ;;  %v3507_v32 = vld [vmem:[%s7820_s0] sm:$0xf]  ;;  %v5154_v34 = vld [vmem:[%s7820_s0 + $0x4] sm:$0xf]  ;;  %v3515_v36 = vld [vmem:[%s7820_s0 + $0x8] sm:$0xf] }
   0xe   :  { %342 = vmatpush.bf16.msra.mxu0 %v5162_v12  ;;  %v5155_v38 = vld [vmem:[%s7820_s0 + $0xc] sm:$0xf]  ;;  %v3508_v40 = vor.u32 %v5156_v33, %v3507_v32  ;;  %v3512_v41 = vor.u32 %v5154_v34, %v3509_v35  ;;  %v3516_v42 = vor.u32 %v5157_v37, %v3515_v36  ;;  %v43_v44 = vld [vmem:[%s7820_s0 + $0x20] sm:$0x11]  ;;  %v5193_v54 = vld [vmem:[%s7821_s3 + $0x18] sm:$0xff] }
   0xf   :  { %360 = vmatpush.bf16.msra.mxu1 %v5170_v13  ;;  %v3520_v43 = vor.u32 %v5155_v38, %v3517_v39  ;;  %v44_v45 = vld [vmem:[%s7820_s0 + $0x28] sm:$0x11]  ;;  %v127_v46 = vunpack.c.l.b16 %v43_v44  ;;  %v128_v47 = vunpack.c.h.b16 %v43_v44  ;;  %v5192_v55 = vld [vmem:[%s7821_s3 + $0x10] sm:$0xff]  ;;  %v5197_v56 = vld [vmem:[%s7821_s3 + $0x38] sm:$0xff] }
  0x10   :  { %378 = vmatpush.bf16.msra.mxu2 %v5178_v14  ;;  %v129_v48 = vunpack.c.l.b16 %v44_v45  ;;  %v130_v49 = vunpack.c.h.b16 %v44_v45  ;;  %v5201_v57 = vld [vmem:[%s7821_s3 + $0x58] sm:$0xff]  ;;  %v5191_v59 = vld [vmem:[%s7821_s3 + $0x8] sm:$0xff]  ;;  %v5196_v60 = vld [vmem:[%s7821_s3 + $0x30] sm:$0xff] }
  0x11   :  { %396 = vmatpush.bf16.msra.mxu3 %v5186_v15  ;;  %v135_v50 = vpack.c.b16 %v127_v46, %v127_v46  ;;  %v136_v51 = vpack.c.b16 %v128_v47, %v128_v47  ;;  %v5205_v58 = vld [vmem:[%s7821_s3 + $0x78] sm:$0xff]  ;;  %v5200_v61 = vld [vmem:[%s7821_s3 + $0x50] sm:$0xff]  ;;  %v5190_v63 = vld [vmem:[%s7821_s3] sm:$0xff] }
  0x12   :  { %343 = vmatpush.bf16.msra.mxu0 %v5161_v16  ;;  %v137_v52 = vpack.c.b16 %v129_v48, %v129_v48  ;;  %v138_v53 = vpack.c.b16 %v130_v49, %v130_v49  ;;  %v5204_v62 = vld [vmem:[%s7821_s3 + $0x70] sm:$0xff]  ;;  %v5195_v0 = vld [vmem:[%s7821_s3 + $0x28] sm:$0xff]  ;;  %v5213_v3 = vld [vmem:[%s7821_s3 + $0xb8] sm:$0xff] }
  0x13   :  { %361 = vmatpush.bf16.msra.mxu1 %v5169_v17  ;;  %v5199_v1 = vld [vmem:[%s7821_s3 + $0x48] sm:$0xff]  ;;  %v5194_v4 = vld [vmem:[%s7821_s3 + $0x20] sm:$0xff]  ;;  %v5212_v7 = vld [vmem:[%s7821_s3 + $0xb0] sm:$0xff] }
  0x14   :  { %379 = vmatpush.bf16.msra.mxu2 %v5177_v18  ;;  %v5203_v2 = vld [vmem:[%s7821_s3 + $0x68] sm:$0xff]  ;;  %v5198_v5 = vld [vmem:[%s7821_s3 + $0x40] sm:$0xff]  ;;  %v5209_v8 = vld [vmem:[%s7821_s3 + $0x98] sm:$0xff] }
  0x15   :  { %397 = vmatpush.bf16.msra.mxu3 %v5185_v19  ;;  %v5202_v6 = vld [vmem:[%s7821_s3 + $0x60] sm:$0xff]  ;;  %v5217_v9 = vld [vmem:[%s7821_s3 + $0xd8] sm:$0xff]  ;;  %v5211_v11 = vld [vmem:[%s7821_s3 + $0xa8] sm:$0xff] }
  0x16   :  { %344 = vmatpush.bf16.msra.mxu0 %v5160_v20  ;;  %v5221_v10 = vld [vmem:[%s7821_s3 + $0xf8] sm:$0xff]  ;;  %v5208_v12 = vld [vmem:[%s7821_s3 + $0x90] sm:$0xff]  ;;  %v5210_v15 = vld [vmem:[%s7821_s3 + $0xa0] sm:$0xff] }
  0x17   :  { %362 = vmatpush.bf16.msra.mxu1 %v5168_v21  ;;  %v5216_v13 = vld [vmem:[%s7821_s3 + $0xd0] sm:$0xff]  ;;  %v5207_v16 = vld [vmem:[%s7821_s3 + $0x88] sm:$0xff]  ;;  %v5546_v18 = vld [vmem:[%s7819_s2] ss:$0 sm:$0xff] }
  0x18   :  { %380 = vmatpush.bf16.msra.mxu2 %v5176_v22  ;;  %v5220_v14 = vld [vmem:[%s7821_s3 + $0xf0] sm:$0xff]  ;;  %v5215_v17 = vld [vmem:[%s7821_s3 + $0xc8] sm:$0xff]  ;;  %v5206_v22 = vld [vmem:[%s7821_s3 + $0x80] sm:$0xff] }
  0x19   :  { %398 = vmatpush.bf16.msra.mxu3 %v5184_v23  ;;  %v5219_v19 = vld [vmem:[%s7821_s3 + $0xe8] sm:$0xff]  ;;  %v5214_v23 = vld [vmem:[%s7821_s3 + $0xc0] sm:$0xff]  ;;  %v5225_v45 = vld [vmem:[%s7821_s3 + $0x118] sm:$0xff] }
  0x1a   :  { %345 = vmatpush.bf16.msra.mxu0 %v5159_v24 }
  0x1b   :  { %363 = vmatpush.bf16.msra.mxu1 %v5167_v25  ;;  %v5218_v25 = vld [vmem:[%s7821_s3 + $0xe0] sm:$0xff] }
  0x1c   :  { %381 = vmatpush.bf16.msra.mxu2 %v5175_v26 }
  0x1d   :  { %399 = vmatpush.bf16.msra.mxu3 %v5183_v27 }
  0x1e   :  { %346 = vmatpush.bf16.msra.mxu0 %v5158_v28 }
  0x1f   :  { %364 = vmatpush.bf16.msra.mxu1 %v5166_v29 }
  0x20   :  { %382 = vmatpush.bf16.msra.mxu2 %v5174_v30 }
  0x21   :  { %400 = vmatpush.bf16.msra.mxu3 %v5182_v31  ;;  %347 = vmatmul.bf16.vlgmr.msra.gmra.mxu0 %v3508_v40 }
  0x22   :  { %365 = vmatmul.bf16.vlgmr.msra.gmra.mxu1 %v3512_v41  ;;  %470 = vmatpush.bf16.msrb.mxu0 %v5197_v56 }
  0x23   :  { %383 = vmatmul.bf16.vlgmr.msra.gmra.mxu2 %v3516_v42  ;;  %510 = vmatpush.bf16.msrb.mxu1 %v5193_v54 }
  0x24   :  { %401 = vmatmul.bf16.vlgmr.msra.gmra.mxu3 %v3520_v43  ;;  %560 = vmatpush.bf16.msrb.mxu2 %v5201_v57 }
  0x25   :  { %611 = vmatpush.bf16.msrb.mxu3 %v5205_v58  ;;  %v5223_v58 = vld [vmem:[%s7821_s3 + $0x108] sm:$0xff] }
  0x26   :  { %471 = vmatpush.bf16.msrb.mxu0 %v5196_v60 }
  0x27   :  { %511 = vmatpush.bf16.msrb.mxu1 %v5192_v55 }
  0x28   :  { %561 = vmatpush.bf16.msrb.mxu2 %v5200_v61 }
  0x29   :  { %612 = vmatpush.bf16.msrb.mxu3 %v5204_v62 }
  0x2a   :  { %472 = vmatpush.bf16.msrb.mxu0 %v5195_v0 }
  0x2b   :  { %512 = vmatpush.bf16.msrb.mxu1 %v5191_v59 }
  0x2c   :  { %562 = vmatpush.bf16.msrb.mxu2 %v5199_v1 }
  0x2d   :  { %613 = vmatpush.bf16.msrb.mxu3 %v5203_v2 }
  0x2e   :  { %473 = vmatpush.bf16.msrb.mxu0 %v5194_v4 }
  0x2f   :  { %513 = vmatpush.bf16.msrb.mxu1 %v5190_v63  ;;  %v5222_v63 = vld [vmem:[%s7821_s3 + $0x100] sm:$0xff] }
  0x30   :  { %563 = vmatpush.bf16.msrb.mxu2 %v5198_v5 }
  0x31   :  { %352 = vmatmul.bf16.gmra.mxu0 %v135_v50  ;;  %614 = vmatpush.bf16.msrb.mxu3 %v5202_v6 }
  0x32   :  { %370 = vmatmul.bf16.gmra.mxu1 %v136_v51  ;;  %661 = vmatpush.bf16.msra.mxu0 %v5209_v8  ;;  %v5254_v8 = vld [vmem:[%s7823_s5 + $0xdc] sm:$0xf0] }
  0x33   :  { %388 = vmatmul.bf16.gmra.mxu2 %v137_v52  ;;  %715 = vmatpush.bf16.msra.mxu1 %v5213_v3 }
  0x34   :  { %406 = vmatmul.bf16.gmra.mxu3 %v138_v53  ;;  %766 = vmatpush.bf16.msra.mxu2 %v5217_v9  ;;  %v5224_v53 = vld [vmem:[%s7821_s3 + $0x110] sm:$0xff]  ;;  %v5250_v9 = vld [vmem:[%s7823_s5 + $0xc4] sm:$0xf] }
  0x35   :  { %817 = vmatpush.bf16.msra.mxu3 %v5221_v10 }
  0x36   :  { %662 = vmatpush.bf16.msra.mxu0 %v5208_v12  ;;  %v3972_v12 = vld [vmem:[%s7823_s5 + $0xc8] sm:$0xf] }
  0x37   :  { %716 = vmatpush.bf16.msra.mxu1 %v5212_v7  ;;  %v3964_v7 = vld [vmem:[%s7823_s5 + $0xc0] sm:$0xf] }
  0x38   :  { %767 = vmatpush.bf16.msra.mxu2 %v5216_v13  ;;  %v3965_v10 = vor.u32 %v5254_v8, %v3964_v7  ;;  %v5255_v13 = vld [vmem:[%s7823_s5 + $0xe4] sm:$0xf0]  ;;  %v5253_v7 = vld [vmem:[%s7823_s5 + $0xdc] sm:$0xf] }
  0x39   :  { %818 = vmatpush.bf16.msra.mxu3 %v5220_v14  ;;  %v3990_v8 = vld [vmem:[%s7823_s5 + $0xf8] sm:$0xf0] }
  0x3a   :  { %663 = vmatpush.bf16.msra.mxu0 %v5207_v16  ;;  %v3973_v16 = vor.u32 %v5255_v13, %v3972_v12  ;;  %v5244_v12 = vld [vmem:[%s7823_s5 + $0x94] sm:$0xf] }
  0x3b   :  { %717 = vmatpush.bf16.msra.mxu1 %v5211_v11  ;;  %v3966_v11 = vld [vmem:[%s7823_s5 + $0xe0] sm:$0xf0]  ;;  %v3950_v13 = vld [vmem:[%s7823_s5 + $0xb0] sm:$0xf0] }
  0x3c   :  { %768 = vmatpush.bf16.msra.mxu2 %v5215_v17  ;;  %v5251_v17 = vld [vmem:[%s7823_s5 + $0xcc] sm:$0xf] }
  0x3d   :  { %819 = vmatpush.bf16.msra.mxu3 %v5219_v19 }
  0x3e   :  { %664 = vmatpush.bf16.msra.mxu0 %v5206_v22  ;;  %v5242_v22 = vld [vmem:[%s7823_s5 + $0x84] sm:$0xf] }
  0x3f   :  { %718 = vmatpush.bf16.msra.mxu1 %v5210_v15  ;;  %v3969_v15 = vor.u32 %v5250_v9, %v3966_v11  ;;  %v3948_v9 = vld [vmem:[%s7823_s5 + $0x90] sm:$0xf] }
  0x40   :  { %769 = vmatpush.bf16.msra.mxu2 %v5214_v23  ;;  %v5248_v11 = vld [vmem:[%s7823_s5 + $0xac] sm:$0xf0] }
  0x41   :  { %820 = vmatpush.bf16.msra.mxu3 %v5218_v25  ;;  %v3940_v25 = vld [vmem:[%s7823_s5 + $0x88] sm:$0xf] }
  0x9e   :  { %v348_v20 = vpop.f32.mrf.mxu0 }
  0x9f   :  { %v366_v21 = vpop.f32.mrf.mxu1  ;;  %v349_v24 = vadd.f32 %v5546_v18, %v348_v20  ;;  %v3932_v20 = vld [vmem:[%s7823_s5 + $0x80] sm:$0xf] }
  0xa1   :  { %v367_v26 = vadd.f32 %v366_v21, %v349_v24  ;;  %v5246_v21 = vld [vmem:[%s7823_s5 + $0x9c] sm:$0xf0]  ;;  %v3934_v24 = vld [vmem:[%s7823_s5 + $0xa0] sm:$0xf0] }
  0xa2   :  { %v3933_v23 = vor.u32 %v5246_v21, %v3932_v20 }
  0xa6   :  { %v384_v27 = vpop.f32.mrf.mxu2  ;;  %v350_v30 = vpop.f32.mrf.mxu0 }
  0xa7   :  { %v402_v28 = vpop.f32.mrf.mxu3  ;;  %v385_v29 = vadd.f32 %v384_v27, %v367_v26  ;;  %v368_v31 = vpop.f32.mrf.mxu1  ;;  %v351_v33 = vadd.f32 %v5546_v18, %v350_v30  ;;  %v5247_v26 = vld [vmem:[%s7823_s5 + $0xa4] sm:$0xf0]  ;;  %v3937_v27 = vor.u32 %v5242_v22, %v3934_v24  ;;  %v3942_v30 = vld [vmem:[%s7823_s5 + $0xa8] sm:$0xf0]  ;;  %v3958_v22 = vld [vmem:[%s7823_s5 + $0xb8] sm:$0xf0] }
  0xa8   :  { %v5240_v24 = vld [vmem:[%s7823_s5 + $0x6c] sm:$0xf0] }
  0xa9   :  { %v403_v32 = vadd.f32 %v402_v28, %v385_v29  ;;  %v369_v36 = vadd.f32 %v368_v31, %v351_v33  ;;  %v3941_v28 = vor.u32 %v5247_v26, %v3940_v25  ;;  %v5243_v29 = vld [vmem:[%s7823_s5 + $0x8c] sm:$0xf]  ;;  %v3900_v33 = vld [vmem:[%s7823_s5 + $0x40] sm:$0xf] }
  0xaa   :  { %v3945_v31 = vor.u32 %v5243_v29, %v3942_v30 }
  0xab   :  { %v411_v34 = vmax.f32 %v403_v32, 0.0 }
  0xad   :  { %v414_v35 = vpack.c.bf16 %v411_v34, %v411_v34  ;;  %v5238_v34 = vld [vmem:[%s7823_s5 + $0x5c] sm:$0xf0] }
  0xae   :  { %v386_v37 = vpop.f32.mrf.mxu2  ;;  %v353_v41 = vpop.f32.mrf.mxu0 }
  0xaf   :  { %v404_v38 = vpop.f32.mrf.mxu3  ;;  %v435_v39 = vunpack.c.l.b16 %v414_v35  ;;  %v387_v40 = vadd.f32 %v386_v37, %v369_v36  ;;  %3690 = vmatmul.msk.bf16.vlgmr.msrb.gmra.mxu1 %vm462_vm0, %v414_v35  ;;  %v371_v42 = vpop.f32.mrf.mxu1  ;;  %v354_v60 = vadd.f32 %v5546_v18, %v353_v41  ;;  %v3974_v18 = vld [vmem:[%s7823_s5 + $0xe8] sm:$0xf0]  ;;  %v5234_v35 = vld [vmem:[%s7823_s5 + $0x44] sm:$0xf]  ;;  %v3901_v36 = vor.u32 %v5238_v34, %v3900_v33  ;;  %v5239_v41 = vld [vmem:[%s7823_s5 + $0x64] sm:$0xf0] }
  0xb0   :  { %1101 = vmatpush.bf16.msrb.mxu1 %v3965_v10  ;;  %v3977_v19 = vor.u32 %v5251_v17, %v3974_v18  ;;  %v3902_v37 = vld [vmem:[%s7823_s5 + $0x60] sm:$0xf0]  ;;  %v3993_v10 = vor.u32 %v5253_v7, %v3990_v8  ;;  %v3956_v17 = vld [vmem:[%s7823_s5 + $0x98] sm:$0xf]  ;;  %v5237_v33 = vld [vmem:[%s7823_s5 + $0x5c] sm:$0xf] }
  0xb1   :  { %v436_v43 = vpack.c.b16 %v435_v39, %v435_v39  ;;  %v405_v44 = vadd.f32 %v404_v38, %v387_v40  ;;  %v372_v0 = vadd.f32 %v371_v42, %v354_v60  ;;  %v3908_v38 = vld [vmem:[%s7823_s5 + $0x48] sm:$0xf]  ;;  %v3905_v40 = vor.u32 %v5234_v35, %v3902_v37  ;;  %v5235_v42 = vld [vmem:[%s7823_s5 + $0x4c] sm:$0xf]  ;;  %v5249_v18 = vld [vmem:[%s7823_s5 + $0xb4] sm:$0xf0] }
  0xb2   :  { %v3957_v21 = vor.u32 %v5249_v18, %v3956_v17  ;;  %v3926_v34 = vld [vmem:[%s7823_s5 + $0x78] sm:$0xf0]  ;;  %v5320_v7 = vld [vmem:[%s7824_s7 + $0x1ec] sm:$0xf0]  ;;  %v4484_v18 = vld [vmem:[%s7824_s7 + $0x3c0] sm:$0xf] }
  0xb3   :  { %v412_v46 = vmax.f32 %v405_v44, 0.0  ;;  %v437_v47 = vrot.slane %v436_v43, 1  ;;  %v528_v48 = vrot.slane %v436_v43, 2  ;;  %v579_v49 = vrot.slane %v436_v43, 3  ;;  %v3910_v43 = vld [vmem:[%s7823_s5 + $0x68] sm:$0xf0] }
  0xb4   :  { %1102 = vmatpush.bf16.msrb.mxu1 %v3933_v23  ;;  %v3909_v44 = vor.u32 %v5239_v41, %v3908_v38  ;;  %v3916_v23 = vld [vmem:[%s7823_s5 + $0x50] sm:$0xf]  ;;  %v3929_v41 = vor.u32 %v5237_v33, %v3926_v34  ;;  %v4212_v33 = vld [vmem:[%s7824_s7 + $0x1a0] sm:$0xf] }
  0xb5   :  { %v415_v50 = vpack.c.bf16 %v412_v46, %v412_v46  ;;  %3673 = vmatmul.msk.bf16.vlgmr.msrb.gmra.mxu0 %vm462_vm0, %v437_v47  ;;  %3715 = vmatmul.msk.bf16.vlgmr.msrb.gmra.mxu2 %vm462_vm0, %v528_v48  ;;  %v3868_v46 = vld [vmem:[%s7823_s5] sm:$0xf]  ;;  %v5226_v48 = vld [vmem:[%s7823_s5 + $0x4] sm:$0xf]  ;;  %v3884_v38 = vld [vmem:[%s7823_s5 + $0x10] sm:$0xf] }
  0xb6   :  { %3740 = vmatmul.msk.bf16.vlgmr.msrb.gmra.mxu3 %vm462_vm0, %v579_v49  ;;  %v389_v51 = vpop.f32.mrf.mxu2  ;;  %867 = vmatpush.bf16.msrb.mxu0 %v5225_v45  ;;  %v355_v55 = vpop.f32.mrf.mxu0  ;;  %v3913_v45 = vor.u32 %v5235_v42, %v3910_v43  ;;  %v5230_v47 = vld [vmem:[%s7823_s5 + $0x1c] sm:$0xf0]  ;;  %v3886_v42 = vld [vmem:[%s7823_s5 + $0x30] sm:$0xf0]  ;;  %v3892_v43 = vld [vmem:[%s7823_s5 + $0x18] sm:$0xf] }
  0xb7   :  { %v407_v52 = vpop.f32.mrf.mxu3  ;;  %v681_v54 = vunpack.c.l.b16 %v415_v50  ;;  %v373_v56 = vpop.f32.mrf.mxu1  ;;  %v390_v3 = vadd.f32 %v389_v51, %v372_v0  ;;  %1114 = vmatpush.bf16.msrb.mxu2 %v3969_v15  ;;  %1127 = vmatpush.bf16.msrb.mxu3 %v3973_v16  ;;  %v3869_v49 = vor.u32 %v5230_v47, %v3868_v46  ;;  %v3876_v51 = vld [vmem:[%s7823_s5 + $0x8] sm:$0xf]  ;;  %v3949_v15 = vor.u32 %v5248_v11, %v3948_v9  ;;  %v5229_v46 = vld [vmem:[%s7823_s5 + $0x1c] sm:$0xf]  ;;  %v4372_v9 = vld [vmem:[%s7824_s7 + $0x2e0] sm:$0xf] }
  0xb8   :  { %1103 = vmatpush.bf16.msrb.mxu1 %v3901_v36  ;;  %v5227_v56 = vld [vmem:[%s7823_s5 + $0xc] sm:$0xf]  ;;  %v3953_v16 = vor.u32 %v5244_v12, %v3950_v13  ;;  %v3894_v47 = vld [vmem:[%s7823_s5 + $0x38] sm:$0xf0]  ;;  %v5312_v34 = vld [vmem:[%s7824_s7 + $0x1ac] sm:$0xf0] }
  0xb9   :  { %v682_v57 = vpack.c.b16 %v681_v54, %v681_v54  ;;  %v408_v4 = vadd.f32 %v407_v52, %v390_v3  ;;  %v5231_v52 = vld [vmem:[%s7823_s5 + $0x24] sm:$0xf0]  ;;  %v5257_v3 = vld [vmem:[%s7823_s5 + $0xf4] sm:$0xf0] }
  0xba   :  { %868 = vmatpush.bf16.msrb.mxu0 %v5224_v53  ;;  %v3877_v55 = vor.u32 %v5231_v52, %v3876_v51 }
  0xbb   :  { %v683_v59 = vrot.slane %v682_v57, 1  ;;  %v734_v1 = vrot.slane %v682_v57, 2  ;;  %v785_v2 = vrot.slane %v682_v57, 3  ;;  %v413_v5 = vmax.f32 %v408_v4, 0.0  ;;  %1115 = vmatpush.bf16.msrb.mxu2 %v3937_v27  ;;  %1128 = vmatpush.bf16.msrb.mxu3 %v3941_v28  ;;  %v3878_v57 = vld [vmem:[%s7823_s5 + $0x28] sm:$0xf0] }
  0xbc   :  { %1104 = vmatpush.bf16.msrb.mxu1 %v3869_v49  ;;  %v3918_v27 = vld [vmem:[%s7823_s5 + $0x70] sm:$0xf0]  ;;  %v3924_v28 = vld [vmem:[%s7823_s5 + $0x58] sm:$0xf] }
  0xbd   :  { %v416_v6 = vpack.c.bf16 %v413_v5, %v413_v5 }
  0xbe   :  { %v391_v61 = vpop.f32.mrf.mxu2  ;;  %869 = vmatpush.bf16.msrb.mxu0 %v5223_v58 }
  0xbf   :  { %v409_v62 = vpop.f32.mrf.mxu3  ;;  %3790 = vmatmul.msk.bf16.vlgmr.msra.gmra.mxu1 %vm462_vm0, %v683_v59  ;;  %1116 = vmatpush.bf16.msrb.mxu2 %v3905_v40  ;;  %v3881_v59 = vor.u32 %v5227_v56, %v3878_v57  ;;  %v3980_v61 = vld [vmem:[%s7823_s5 + $0xd0] sm:$0xf]  ;;  %v5228_v40 = vld [vmem:[%s7823_s5 + $0x14] sm:$0xf] }
  0xc0   :  { %1129 = vmatpush.bf16.msrb.mxu3 %v3909_v44  ;;  %v5256_v62 = vld [vmem:[%s7823_s5 + $0xec] sm:$0xf0]  ;;  %v5233_v44 = vld [vmem:[%s7823_s5 + $0x34] sm:$0xf0] }
  0xc1   :  { %v3981_v0 = vor.u32 %v5256_v62, %v3980_v61  ;;  %v3893_v51 = vor.u32 %v5233_v44, %v3892_v43  ;;  %v5547_v62 = vld [vmem:[%s7822_s4] ss:$0 sm:$0xff]  ;;  %v4213_v43 = vor.u32 %v5312_v34, %v4212_v33  ;;  %v5292_v34 = vld [vmem:[%s7824_s7 + $0x10c] sm:$0xf0] }
  0xc2   :  { %870 = vmatpush.bf16.msrb.mxu0 %v5222_v63  ;;  %v5252_v63 = vld [vmem:[%s7823_s5 + $0xd4] sm:$0xf]  ;;  %v4132_v33 = vld [vmem:[%s7824_s7 + $0x100] sm:$0xf] }
  0xc3   :  { %1153 = vmatpush.bf16.msra.mxu1 %v3981_v0 }
  0xc4   :  { %1130 = vmatpush.bf16.msrb.mxu3 %v3877_v55 }
  0xc5   :  { %3765 = vmatmul.msk.bf16.vlgmr.msra.gmra.mxu0 %vm462_vm0, %v415_v50  ;;  %3815 = vmatmul.msk.bf16.vlgmr.msra.gmra.mxu2 %vm462_vm0, %v734_v1  ;;  %v3870_v50 = vld [vmem:[%s7823_s5 + $0x20] sm:$0xf0]  ;;  %v3982_v1 = vld [vmem:[%s7823_s5 + $0xf0] sm:$0xf0] }
  0xc6   :  { %3840 = vmatmul.msk.bf16.vlgmr.msra.gmra.mxu3 %vm462_vm0, %v785_v2  ;;  %1140 = vmatpush.bf16.msra.mxu0 %v3977_v19  ;;  %v3873_v54 = vor.u32 %v5226_v48, %v3870_v50  ;;  %v3988_v2 = vld [vmem:[%s7823_s5 + $0xd8] sm:$0xf]  ;;  %v3985_v5 = vor.u32 %v5252_v63, %v3982_v1  ;;  %v5245_v19 = vld [vmem:[%s7823_s5 + $0x9c] sm:$0xf]  ;;  %v3889_v50 = vor.u32 %v5228_v40, %v3886_v42  ;;  %v5276_v40 = vld [vmem:[%s7824_s7 + $0x8c] sm:$0xf0] }
  0xc7   :  { %v3961_v26 = vor.u32 %v5245_v19, %v3958_v22  ;;  %1154 = vmatpush.bf16.msra.mxu1 %v3949_v15  ;;  %v4100_v15 = vld [vmem:[%s7824_s7 + $0xc0] sm:$0xf]  ;;  %v5380_v19 = vld [vmem:[%s7824_s7 + $0x3cc] sm:$0xf0] }
  0xc8   :  { %1117 = vmatpush.bf16.msrb.mxu2 %v3873_v54  ;;  %v4228_v22 = vld [vmem:[%s7824_s7 + $0x1c0] sm:$0xf]  ;;  %v5372_v42 = vld [vmem:[%s7824_s7 + $0x38c] sm:$0xf0] }
  0xca   :  { %1141 = vmatpush.bf16.msra.mxu0 %v3945_v31  ;;  %v3917_v31 = vor.u32 %v5240_v24, %v3916_v23  ;;  %v5316_v23 = vld [vmem:[%s7824_s7 + $0x1cc] sm:$0xf0]  ;;  %v4356_v24 = vld [vmem:[%s7824_s7 + $0x2c0] sm:$0xf] }
  0xcc   :  { %1166 = vmatpush.bf16.msra.mxu2 %v3985_v5  ;;  %1155 = vmatpush.bf16.msra.mxu1 %v3917_v31  ;;  %v5384_v5 = vld [vmem:[%s7824_s7 + $0x3ec] sm:$0xf0]  ;;  %v4229_v31 = vor.u32 %v5316_v23, %v4228_v22  ;;  %v4004_v22 = vld [vmem:[%s7824_s7] sm:$0xf] }
  0xce   :  { %1142 = vmatpush.bf16.msra.mxu0 %v3913_v45 }
  0xd0   :  { %1167 = vmatpush.bf16.msra.mxu2 %v3953_v16  ;;  %v5284_v16 = vld [vmem:[%s7824_s7 + $0xcc] sm:$0xf0] }
  0xd2   :  { %1143 = vmatpush.bf16.msra.mxu0 %v3881_v59 }
  0xd5   :  { %3865 = vmatmul.msk.bf16.vlgmr.msrb.gmra.mxu0 %vm462_vm0, %v416_v6  ;;  %v3989_v6 = vor.u32 %v5257_v3, %v3988_v2  ;;  %v4116_v2 = vld [vmem:[%s7824_s7 + $0xe0] sm:$0xf]  ;;  %v5288_v3 = vld [vmem:[%s7824_s7 + $0xec] sm:$0xf0] }
  0xd6   :  { %1192 = vmatpush.bf16.msrb.mxu0 %v3993_v10  ;;  %v5352_v10 = vld [vmem:[%s7824_s7 + $0x2ec] sm:$0xf0]  ;;  %v4117_v12 = vor.u32 %v5288_v3, %v4116_v2 }
  0xd7   :  { %1179 = vmatpush.bf16.msra.mxu3 %v3989_v6  ;;  %v4244_v6 = vld [vmem:[%s7824_s7 + $0x1e0] sm:$0xf]  ;;  %v5364_v2 = vld [vmem:[%s7824_s7 + $0x34c] sm:$0xf0] }
  0xda   :  { %1193 = vmatpush.bf16.msrb.mxu0 %v3961_v26  ;;  %v4101_v26 = vor.u32 %v5284_v16, %v4100_v15  ;;  %v4404_v15 = vld [vmem:[%s7824_s7 + $0x320] sm:$0xf] }
  0xdb   :  { %1180 = vmatpush.bf16.msra.mxu3 %v3957_v21  ;;  %v4373_v21 = vor.u32 %v5352_v10, %v4372_v9 }
  0xde   :  { %1194 = vmatpush.bf16.msrb.mxu0 %v3929_v41  ;;  %v4452_v41 = vld [vmem:[%s7824_s7 + $0x380] sm:$0xf] }
 0x12c   :  { %v5873_v14 = vpop.f32.mrf.mxu1 }
 0x132   :  { %v5905_v32 = vpop.f32.mrf.mxu0 }
 0x133   :  { %v516_v20 = vadd.f32 %v5873_v14, %v5905_v32  ;;  %v5236_v14 = vld [vmem:[%s7823_s5 + $0x54] sm:$0xf]  ;;  %v5241_v32 = vld [vmem:[%s7823_s5 + $0x74] sm:$0xf0] }
 0x134   :  { %v517_v39 = vpop.f32.mrf.mxu1  ;;  %v3921_v36 = vor.u32 %v5236_v14, %v3918_v27  ;;  %v3925_v37 = vor.u32 %v5241_v32, %v3924_v28  ;;  %v4485_v14 = vor.u32 %v5380_v19, %v4484_v18  ;;  %v4084_v27 = vld [vmem:[%s7824_s7 + $0xa0] sm:$0xf]  ;;  %v5280_v28 = vld [vmem:[%s7824_s7 + $0xac] sm:$0xf0] }
 0x135   :  { %v5232_v39 = vld [vmem:[%s7823_s5 + $0x2c] sm:$0xf0]  ;;  %v4148_v18 = vld [vmem:[%s7824_s7 + $0x120] sm:$0xf] }
 0x136   :  { %v3885_v49 = vor.u32 %v5232_v39, %v3884_v38  ;;  %1168 = vmatpush.bf16.msra.mxu2 %v3921_v36  ;;  %1181 = vmatpush.bf16.msra.mxu3 %v3925_v37  ;;  %v5344_v36 = vld [vmem:[%s7824_s7 + $0x2ac] sm:$0xf0]  ;;  %v4085_v37 = vor.u32 %v5280_v28, %v4084_v27  ;;  %v4068_v39 = vld [vmem:[%s7824_s7 + $0x80] sm:$0xf] }
 0x137   :  { %v5296_v19 = vld [vmem:[%s7824_s7 + $0x12c] sm:$0xf0]  ;;  %v4628_v27 = vld [vmem:[%s7824_s7 + $0x4e0] sm:$0xf] }
 0x138   :  { %v565_v53 = vpop.f32.mrf.mxu2  ;;  %1156 = vmatpush.bf16.msra.mxu1 %v3885_v49  ;;  %v4069_v49 = vor.u32 %v5276_v40, %v4068_v39  ;;  %v5416_v28 = vld [vmem:[%s7824_s7 + $0x4ec] sm:$0xf0] }
 0x139   :  { %v5955_v58 = vpop.f32.mrf.mxu3  ;;  %v569_v29 = vadd.f32 %v565_v53, %v516_v20  ;;  %v3897_v53 = vor.u32 %v5229_v46, %v3894_v47  ;;  %v4245_v20 = vor.u32 %v5320_v7, %v4244_v6  ;;  %v5308_v46 = vld [vmem:[%s7824_s7 + $0x18c] sm:$0xf0]  ;;  %v4324_v47 = vld [vmem:[%s7824_s7 + $0x280] sm:$0xf] }
 0x13a   :  { %v477_v60 = vpop.f32.mrf.mxu0  ;;  %1169 = vmatpush.bf16.msra.mxu2 %v3889_v50  ;;  %1182 = vmatpush.bf16.msra.mxu3 %v3893_v51  ;;  %v4453_v50 = vor.u32 %v5372_v42, %v4452_v41  ;;  %v4052_v51 = vld [vmem:[%s7824_s7 + $0x60] sm:$0xf]  ;;  %v5300_v6 = vld [vmem:[%s7824_s7 + $0x14c] sm:$0xf0] }
 0x13b   :  { %v620_v48 = vadd.f32 %v5955_v58, %v569_v29  ;;  %1195 = vmatpush.bf16.msrb.mxu0 %v3897_v53  ;;  %v4468_v29 = vld [vmem:[%s7824_s7 + $0x3a0] sm:$0xf]  ;;  %v5448_v40 = vld [vmem:[%s7824_s7 + $0x5ec] sm:$0xf0] }
 0x13c   :  { %v5975_v4 = vpop.f32.mrf.mxu1  ;;  %v4436_v53 = vld [vmem:[%s7824_s7 + $0x360] sm:$0xf]  ;;  %v5480_v42 = vld [vmem:[%s7824_s7 + $0x6ec] sm:$0xf0] }
 0x13d   :  { %v4292_v7 = vld [vmem:[%s7824_s7 + $0x240] sm:$0xf] }
 0x13e   :  { %v4884_v41 = vld [vmem:[%s7824_s7 + $0x6e0] sm:$0xf] }
 0x140   :  { %v567_v25 = vpop.f32.mrf.mxu2 }
 0x141   :  { %v618_v30 = vpop.f32.mrf.mxu3  ;;  %v5348_v25 = vld [vmem:[%s7824_s7 + $0x2cc] sm:$0xf0] }
 0x142   :  { %v666_v35 = vpop.f32.mrf.mxu0  ;;  %v5376_v30 = vld [vmem:[%s7824_s7 + $0x3ac] sm:$0xf0]  ;;  %v4357_v32 = vor.u32 %v5348_v25, %v4356_v24 }
 0x143   :  { %v670_v52 = vadd.f32 %v666_v35, %v620_v48  ;;  %v4340_v35 = vld [vmem:[%s7824_s7 + $0x2a0] sm:$0xf]  ;;  %v4469_v38 = vor.u32 %v5376_v30, %v4468_v29  ;;  %v5340_v48 = vld [vmem:[%s7824_s7 + $0x28c] sm:$0xf0]  ;;  %v4149_v30 = vor.u32 %v5296_v19, %v4148_v18 }
 0x144   :  { %v722_v45 = vpop.f32.mrf.mxu1  ;;  %v4341_v44 = vor.u32 %v5344_v36, %v4340_v35  ;;  %v5260_v25 = vld [vmem:[%s7824_s7 + $0xc] sm:$0xf0]  ;;  %v5012_v29 = vld [vmem:[%s7824_s7 + $0x7e0] sm:$0xf] }
 0x145   :  { %v724_v57 = vadd.f32 %v5975_v4, %v670_v52  ;;  %v4500_v4 = vld [vmem:[%s7824_s7 + $0x3e0] sm:$0xf]  ;;  %v5272_v52 = vld [vmem:[%s7824_s7 + $0x6c] sm:$0xf0] }
 0x146   :  { %v4501_v13 = vor.u32 %v5384_v5, %v4500_v4  ;;  %v4196_v45 = vld [vmem:[%s7824_s7 + $0x180] sm:$0xf]  ;;  %v5324_v36 = vld [vmem:[%s7824_s7 + $0x20c] sm:$0xf0] }
 0x147   :  { %v4164_v5 = vld [vmem:[%s7824_s7 + $0x140] sm:$0xf] }
 0x148   :  { %v771_v54 = vpop.f32.mrf.mxu2  ;;  %v4165_v16 = vor.u32 %v5300_v6, %v4164_v5  ;;  %v4260_v35 = vld [vmem:[%s7824_s7 + $0x200] sm:$0xf] }
 0x149   :  { %v822_v55 = vpop.f32.mrf.mxu3  ;;  %v775_v59 = vadd.f32 %v771_v54, %v724_v57  ;;  %v5368_v54 = vld [vmem:[%s7824_s7 + $0x36c] sm:$0xf0]  ;;  %v4180_v57 = vld [vmem:[%s7824_s7 + $0x160] sm:$0xf] }
 0x14a   :  { %v668_v56 = vpop.f32.mrf.mxu0 }
 0x14b   :  { %v826_v60 = vadd.f32 %v822_v55, %v775_v59  ;;  %v4197_v55 = vor.u32 %v5308_v46, %v4196_v45  ;;  %v4325_v56 = vor.u32 %v5340_v48, %v4324_v47  ;;  %v5304_v59 = vld [vmem:[%s7824_s7 + $0x16c] sm:$0xf0]  ;;  %v4612_v45 = vld [vmem:[%s7824_s7 + $0x4c0] sm:$0xf] }
 0x14c   :  { %v4181_v3 = vor.u32 %v5304_v59, %v4180_v57  ;;  %v5412_v46 = vld [vmem:[%s7824_s7 + $0x4cc] sm:$0xf0]  ;;  %v4996_v47 = vld [vmem:[%s7824_s7 + $0x7c0] sm:$0xf] }
 0x14d   :  { %v5508_v48 = vld [vmem:[%s7824_s7 + $0x7cc] sm:$0xf0]  ;;  %v4613_v57 = vor.u32 %v5412_v46, %v4612_v45  ;;  %v4676_v45 = vld [vmem:[%s7824_s7 + $0x540] sm:$0xf] }
 0x14e   :  { %v4997_v59 = vor.u32 %v5508_v48, %v4996_v47  ;;  %v5428_v46 = vld [vmem:[%s7824_s7 + $0x54c] sm:$0xf0]  ;;  %v4804_v47 = vld [vmem:[%s7824_s7 + $0x640] sm:$0xf] }
 0x14f   :  { %v4677_v48 = vor.u32 %v5428_v46, %v4676_v45  ;;  %v5374_v45 = vld [vmem:[%s7824_s7 + $0x3a4] sm:$0xf]  ;;  %v4470_v46 = vld [vmem:[%s7824_s7 + $0x3b0] sm:$0xf0] }
 0x150   :  { %v773_v58 = vpop.f32.mrf.mxu2 }
 0x151   :  { %v824_v61 = vpop.f32.mrf.mxu3  ;;  %v4308_v58 = vld [vmem:[%s7824_s7 + $0x260] sm:$0xf] }
 0x152   :  { %v872_v63 = vpop.f32.mrf.mxu0  ;;  %v4053_v61 = vor.u32 %v5272_v52, %v4052_v51  ;;  %v4885_v52 = vor.u32 %v5480_v42, %v4884_v41  ;;  %v4916_v42 = vld [vmem:[%s7824_s7 + $0x720] sm:$0xf] }
 0x153   :  { %v876_v0 = vadd.f32 %v872_v63, %v826_v60  ;;  %v5336_v60 = vld [vmem:[%s7824_s7 + $0x26c] sm:$0xf0]  ;;  %v4036_v63 = vld [vmem:[%s7824_s7 + $0x40] sm:$0xf] }
 0x154   :  { %v4309_v4 = vor.u32 %v5336_v60, %v4308_v58  ;;  %v4596_v58 = vld [vmem:[%s7824_s7 + $0x4a0] sm:$0xf]  ;;  %v5408_v60 = vld [vmem:[%s7824_s7 + $0x4ac] sm:$0xf0] }
 0x155   :  { %v881_v1 = vadd.f32 %v5547_v62, %v876_v0  ;;  %v4437_v62 = vor.u32 %v5368_v54, %v4436_v53  ;;  %v5268_v0 = vld [vmem:[%s7824_s7 + $0x4c] sm:$0xf0]  ;;  %v4740_v53 = vld [vmem:[%s7824_s7 + $0x5c0] sm:$0xf]  ;;  %v4597_v5 = vor.u32 %v5408_v60, %v4596_v58 }
 0x156   :  { %v4037_v9 = vor.u32 %v5268_v0, %v4036_v63  ;;  %v5444_v54 = vld [vmem:[%s7824_s7 + $0x5cc] sm:$0xf0]  ;;  %v4788_v58 = vld [vmem:[%s7824_s7 + $0x620] sm:$0xf] }
 0x157   :  { %v882_v8 = vmax.f32 %v881_v1, 0.0  ;;  %v4420_v1 = vld [vmem:[%s7824_s7 + $0x340] sm:$0xf]  ;;  %v4741_v63 = vor.u32 %v5444_v54, %v4740_v53 }
 0x158   :  { %v4421_v10 = vor.u32 %v5364_v2, %v4420_v1  ;;  %v4724_v1 = vld [vmem:[%s7824_s7 + $0x5a0] sm:$0xf]  ;;  %v5440_v2 = vld [vmem:[%s7824_s7 + $0x5ac] sm:$0xf0] }
 0x159   :  { %v6086_v11 = vpack.c.bf16 %v882_v8, %v882_v8  ;;  %v5332_v8 = vld [vmem:[%s7824_s7 + $0x24c] sm:$0xf0]  ;;  %v4900_v53 = vld [vmem:[%s7824_s7 + $0x700] sm:$0xf] }
 0x15a   :  { %v874_v17 = vpop.f32.mrf.mxu0 }
 0x15b   :  { %3994 = vmatmul.msk.bf16.vlgmr.msrb.gmra.mxu1 %vm462_vm0, %v6086_v11  ;;  %3995 = vmatmul.msk.bf16.vlgmr.msrb.gmra.mxu2 %vm462_vm0, %v6086_v11  ;;  %v4293_v17 = vor.u32 %v5332_v8, %v4292_v7  ;;  %v4580_v7 = vld [vmem:[%s7824_s7 + $0x480] sm:$0xf]  ;;  %v5404_v8 = vld [vmem:[%s7824_s7 + $0x48c] sm:$0xf0] }
 0x15c   :  { %3996 = vmatmul.msk.bf16.vlgmr.msrb.gmra.mxu3 %vm462_vm0, %v6086_v11  ;;  %3997 = vmatmul.msk.bf16.vlgmr.msra.gmra.mxu0 %vm462_vm0, %v6086_v11  ;;  %v4581_v18 = vor.u32 %v5404_v8, %v4580_v7 }
 0x15d   :  { %2763 = vmatpush.bf16.msrb.mxu1 %v4117_v12  ;;  %2802 = vmatpush.bf16.msra.mxu0 %v4501_v13  ;;  %v4020_v12 = vld [vmem:[%s7824_s7 + $0x20] sm:$0xf]  ;;  %v5264_v13 = vld [vmem:[%s7824_s7 + $0x2c] sm:$0xf0] }
 0x15e   :  { %2776 = vmatpush.bf16.msrb.mxu2 %v4245_v20  ;;  %2789 = vmatpush.bf16.msrb.mxu3 %v4373_v21  ;;  %v4276_v20 = vld [vmem:[%s7824_s7 + $0x220] sm:$0xf]  ;;  %v5328_v21 = vld [vmem:[%s7824_s7 + $0x22c] sm:$0xf0]  ;;  %v4021_v23 = vor.u32 %v5264_v13, %v4020_v12  ;;  %v4725_v12 = vor.u32 %v5440_v2, %v4724_v1 }
 0x15f   :  { %v4772_v2 = vld [vmem:[%s7824_s7 + $0x600] sm:$0xf] }
 0x161   :  { %2764 = vmatpush.bf16.msrb.mxu1 %v4101_v26  ;;  %2803 = vmatpush.bf16.msra.mxu0 %v4485_v14  ;;  %v4388_v26 = vld [vmem:[%s7824_s7 + $0x300] sm:$0xf]  ;;  %v5356_v14 = vld [vmem:[%s7824_s7 + $0x30c] sm:$0xf0] }
 0x162   :  { %2777 = vmatpush.bf16.msrb.mxu2 %v4229_v31  ;;  %2790 = vmatpush.bf16.msrb.mxu3 %v4357_v32  ;;  %v4277_v31 = vor.u32 %v5328_v21, %v4276_v20  ;;  %v5512_v32 = vld [vmem:[%s7824_s7 + $0x7ec] sm:$0xf0]  ;;  %v4389_v39 = vor.u32 %v5356_v14, %v4388_v26  ;;  %v4564_v20 = vld [vmem:[%s7824_s7 + $0x460] sm:$0xf] }
 0x163   :  { %v5400_v21 = vld [vmem:[%s7824_s7 + $0x46c] sm:$0xf0] }
 0x164   :  { %v4565_v26 = vor.u32 %v5400_v21, %v4564_v20 }
 0x165   :  { %2765 = vmatpush.bf16.msrb.mxu1 %v4085_v37  ;;  %2804 = vmatpush.bf16.msra.mxu0 %v4469_v38  ;;  %v4756_v37 = vld [vmem:[%s7824_s7 + $0x5e0] sm:$0xf]  ;;  %v4005_v38 = vor.u32 %v5260_v25, %v4004_v22 }
 0x166   :  { %2778 = vmatpush.bf16.msrb.mxu2 %v4213_v43  ;;  %2791 = vmatpush.bf16.msrb.mxu3 %v4341_v44  ;;  %v4629_v43 = vor.u32 %v5416_v28, %v4628_v27  ;;  %v5013_v44 = vor.u32 %v5512_v32, %v5012_v29  ;;  %v4757_v51 = vor.u32 %v5448_v40, %v4756_v37  ;;  %v4948_v22 = vld [vmem:[%s7824_s7 + $0x760] sm:$0xf]  ;;  %v5396_v28 = vld [vmem:[%s7824_s7 + $0x44c] sm:$0xf0] }
 0x167   :  { %v4548_v27 = vld [vmem:[%s7824_s7 + $0x440] sm:$0xf]  ;;  %v5464_v37 = vld [vmem:[%s7824_s7 + $0x66c] sm:$0xf0] }
 0x168   :  { %v4932_v29 = vld [vmem:[%s7824_s7 + $0x740] sm:$0xf]  ;;  %v5392_v40 = vld [vmem:[%s7824_s7 + $0x42c] sm:$0xf0] }
 0x169   :  { %2766 = vmatpush.bf16.msrb.mxu1 %v4069_v49  ;;  %2805 = vmatpush.bf16.msra.mxu0 %v4453_v50  ;;  %v4133_v49 = vor.u32 %v5292_v34, %v4132_v33  ;;  %v4261_v50 = vor.u32 %v5324_v36, %v4260_v35  ;;  %v4692_v33 = vld [vmem:[%s7824_s7 + $0x560] sm:$0xf]  ;;  %v5432_v34 = vld [vmem:[%s7824_s7 + $0x56c] sm:$0xf0] }
 0x16a   :  { %2779 = vmatpush.bf16.msrb.mxu2 %v4197_v55  ;;  %2792 = vmatpush.bf16.msrb.mxu3 %v4325_v56  ;;  %v4868_v55 = vld [vmem:[%s7824_s7 + $0x6c0] sm:$0xf]  ;;  %v5476_v56 = vld [vmem:[%s7824_s7 + $0x6cc] sm:$0xf0]  ;;  %v4693_v36 = vor.u32 %v5432_v34, %v4692_v33 }
 0x16b   :  { %3998 = vmatmul.msk.bf16.vlgmr.msra.gmra.mxu1 %vm462_vm0, %v6086_v11  ;;  %3999 = vmatmul.msk.bf16.vlgmr.msra.gmra.mxu2 %vm462_vm0, %v6086_v11  ;;  %v4869_v0 = vor.u32 %v5476_v56, %v4868_v55  ;;  %v4820_v35 = vld [vmem:[%s7824_s7 + $0x660] sm:$0xf]  ;;  %v5484_v55 = vld [vmem:[%s7824_s7 + $0x70c] sm:$0xf0] }
 0x16c   :  { %4000 = vmatmul.msk.bf16.vlgmr.msra.gmra.mxu3 %vm462_vm0, %v6086_v11  ;;  %4001 = vmatmul.msk.bf16.vlgmr.msrb.gmra.mxu0 %vm462_vm0, %v6086_v11  ;;  %v5360_v11 = vld [vmem:[%s7824_s7 + $0x32c] sm:$0xf0]  ;;  %v4901_v56 = vor.u32 %v5484_v55, %v4900_v53  ;;  %v5346_v53 = vld [vmem:[%s7824_s7 + $0x2c4] sm:$0xf]  ;;  %v4473_v55 = vor.u32 %v5374_v45, %v4470_v46 }
 0x16d   :  { %2767 = vmatpush.bf16.msrb.mxu1 %v4053_v61  ;;  %2806 = vmatpush.bf16.msra.mxu0 %v4437_v62  ;;  %v4405_v24 = vor.u32 %v5360_v11, %v4404_v15  ;;  %v4980_v61 = vld [vmem:[%s7824_s7 + $0x7a0] sm:$0xf]  ;;  %v5504_v62 = vld [vmem:[%s7824_s7 + $0x7ac] sm:$0xf0]  ;;  %v5334_v46 = vld [vmem:[%s7824_s7 + $0x264] sm:$0xf] }
 0x16e   :  { %2780 = vmatpush.bf16.msrb.mxu2 %v4181_v3  ;;  %2793 = vmatpush.bf16.msrb.mxu3 %v4309_v4  ;;  %v4852_v3 = vld [vmem:[%s7824_s7 + $0x6a0] sm:$0xf]  ;;  %v5472_v4 = vld [vmem:[%s7824_s7 + $0x6ac] sm:$0xf0]  ;;  %v4981_v6 = vor.u32 %v5504_v62, %v4980_v61 }
 0x16f   :  { %v4853_v13 = vor.u32 %v5472_v4, %v4852_v3  ;;  %v4708_v15 = vld [vmem:[%s7824_s7 + $0x580] sm:$0xf]  ;;  %v5436_v11 = vld [vmem:[%s7824_s7 + $0x58c] sm:$0xf0] }
 0x170   :  { %v5456_v61 = vld [vmem:[%s7824_s7 + $0x62c] sm:$0xf0] }
 0x171   :  { %2768 = vmatpush.bf16.msrb.mxu1 %v4037_v9  ;;  %2807 = vmatpush.bf16.msra.mxu0 %v4421_v10  ;;  %v4964_v9 = vld [vmem:[%s7824_s7 + $0x780] sm:$0xf]  ;;  %v5500_v10 = vld [vmem:[%s7824_s7 + $0x78c] sm:$0xf0]  ;;  %v4789_v62 = vor.u32 %v5456_v61, %v4788_v58 }
 0x172   :  { %2781 = vmatpush.bf16.msrb.mxu2 %v4165_v16  ;;  %2794 = vmatpush.bf16.msrb.mxu3 %v4293_v17  ;;  %v4836_v16 = vld [vmem:[%s7824_s7 + $0x680] sm:$0xf]  ;;  %v5468_v17 = vld [vmem:[%s7824_s7 + $0x68c] sm:$0xf0]  ;;  %v4965_v19 = vor.u32 %v5500_v10, %v4964_v9 }
 0x173   :  { %v4837_v25 = vor.u32 %v5468_v17, %v4836_v16  ;;  %v5452_v3 = vld [vmem:[%s7824_s7 + $0x60c] sm:$0xf0]  ;;  %v4502_v16 = vld [vmem:[%s7824_s7 + $0x3f0] sm:$0xf0] }
 0x174   :  { %v4773_v4 = vor.u32 %v5452_v3, %v4772_v2  ;;  %v5310_v2 = vld [vmem:[%s7824_s7 + $0x1a4] sm:$0xf]  ;;  %v4214_v3 = vld [vmem:[%s7824_s7 + $0x1b0] sm:$0xf0] }
 0x175   :  { %2769 = vmatpush.bf16.msrb.mxu1 %v4021_v23  ;;  %2808 = vmatpush.bf16.msra.mxu0 %v4405_v24  ;;  %v5496_v23 = vld [vmem:[%s7824_s7 + $0x76c] sm:$0xf0]  ;;  %v4709_v24 = vor.u32 %v5436_v11, %v4708_v15  ;;  %v5382_v11 = vld [vmem:[%s7824_s7 + $0x3e4] sm:$0xf] }
 0x176   :  { %2782 = vmatpush.bf16.msrb.mxu2 %v4149_v30  ;;  %2795 = vmatpush.bf16.msrb.mxu3 %v4277_v31  ;;  %v4949_v14 = vor.u32 %v5496_v23, %v4948_v22  ;;  %v5492_v30 = vld [vmem:[%s7824_s7 + $0x74c] sm:$0xf0]  ;;  %v4549_v31 = vor.u32 %v5396_v28, %v4548_v27  ;;  %v4505_v23 = vor.u32 %v5382_v11, %v4502_v16  ;;  %v5378_v27 = vld [vmem:[%s7824_s7 + $0x3c4] sm:$0xf]  ;;  %v4486_v28 = vld [vmem:[%s7824_s7 + $0x3d0] sm:$0xf0] }
 0x177   :  { %v4933_v32 = vor.u32 %v5492_v30, %v4932_v29  ;;  %v4217_v16 = vor.u32 %v5310_v2, %v4214_v3  ;;  %v4294_v2 = vld [vmem:[%s7824_s7 + $0x250] sm:$0xf0]  ;;  %v5258_v3 = vld [vmem:[%s7824_s7 + $0x4] sm:$0xf] }
 0x179   :  { %2770 = vmatpush.bf16.msrb.mxu1 %v4005_v38  ;;  %2809 = vmatpush.bf16.msra.mxu0 %v4389_v39  ;;  %v4821_v38 = vor.u32 %v5464_v37, %v4820_v35  ;;  %v4532_v39 = vld [vmem:[%s7824_s7 + $0x420] sm:$0xf]  ;;  %v4374_v37 = vld [vmem:[%s7824_s7 + $0x2f0] sm:$0xf0] }
 0x17a   :  { %2783 = vmatpush.bf16.msrb.mxu2 %v4133_v49  ;;  %2796 = vmatpush.bf16.msrb.mxu3 %v4261_v50  ;;  %v4533_v41 = vor.u32 %v5392_v40, %v4532_v39  ;;  %v5460_v49 = vld [vmem:[%s7824_s7 + $0x64c] sm:$0xf0]  ;;  %v4489_v40 = vor.u32 %v5378_v27, %v4486_v28  ;;  %v5338_v28 = vld [vmem:[%s7824_s7 + $0x284] sm:$0xf] }
 0x17b   :  { %v4805_v50 = vor.u32 %v5460_v49, %v4804_v47  ;;  %v5314_v49 = vld [vmem:[%s7824_s7 + $0x1c4] sm:$0xf] }
 0x17d   :  { %2815 = vmatpush.bf16.msra.mxu1 %v4629_v43  ;;  %2854 = vmatpush.bf16.msrb.mxu0 %v5013_v44  ;;  %v5488_v43 = vld [vmem:[%s7824_s7 + $0x72c] sm:$0xf0] }
 0x17e   :  { %2828 = vmatpush.bf16.msra.mxu2 %v4757_v51  ;;  %2841 = vmatpush.bf16.msra.mxu3 %v4885_v52  ;;  %v4917_v44 = vor.u32 %v5488_v43, %v4916_v42  ;;  %v4516_v51 = vld [vmem:[%s7824_s7 + $0x400] sm:$0xf]  ;;  %v5388_v52 = vld [vmem:[%s7824_s7 + $0x40c] sm:$0xf0]  ;;  %v4086_v42 = vld [vmem:[%s7824_s7 + $0xb0] sm:$0xf0] }
 0x17f   :  { %v4517_v54 = vor.u32 %v5388_v52, %v4516_v51 }
 0x181   :  { %2816 = vmatpush.bf16.msra.mxu1 %v4613_v57  ;;  %2855 = vmatpush.bf16.msrb.mxu0 %v4997_v59  ;;  %v4660_v57 = vld [vmem:[%s7824_s7 + $0x520] sm:$0xf]  ;;  %v5424_v59 = vld [vmem:[%s7824_s7 + $0x52c] sm:$0xf0] }
 0x182   :  { %2829 = vmatpush.bf16.msra.mxu2 %v4741_v63  ;;  %2842 = vmatpush.bf16.msra.mxu3 %v4869_v0  ;;  %v4661_v60 = vor.u32 %v5424_v59, %v4660_v57  ;;  %v4644_v63 = vld [vmem:[%s7824_s7 + $0x500] sm:$0xf]  ;;  %v5420_v0 = vld [vmem:[%s7824_s7 + $0x50c] sm:$0xf0]  ;;  %v5274_v57 = vld [vmem:[%s7824_s7 + $0x84] sm:$0xf] }
 0x183   :  { %v4645_v1 = vor.u32 %v5420_v0, %v4644_v63  ;;  %v4070_v59 = vld [vmem:[%s7824_s7 + $0x90] sm:$0xf0] }
 0x184   :  { %v4454_v63 = vld [vmem:[%s7824_s7 + $0x390] sm:$0xf0] }
 0x185   :  { %2817 = vmatpush.bf16.msra.mxu1 %v4597_v5  ;;  %2856 = vmatpush.bf16.msrb.mxu0 %v4981_v6  ;;  %v6467_v5 = vld [vmem:[%s7825_s6] sm:$0xff] }
 0x186   :  { %2830 = vmatpush.bf16.msra.mxu2 %v4725_v12  ;;  %2843 = vmatpush.bf16.msra.mxu3 %v4853_v13  ;;  %v918_v6 = vperm.slane %v6467_v5, 0  ;;  %v921_v7 = vperm.slane %v6467_v5, 3  ;;  %v5286_v12 = vld [vmem:[%s7824_s7 + $0xe4] sm:$0xf]  ;;  %v4118_v13 = vld [vmem:[%s7824_s7 + $0xf0] sm:$0xf0] }
 0x187   :  { %v920_v20 = vperm.slane %v6467_v5, 2  ;;  %v4121_v21 = vor.u32 %v5286_v12, %v4118_v13  ;;  %v5270_v13 = vld [vmem:[%s7824_s7 + $0x64] sm:$0xf] }
 0x189   :  { %2818 = vmatpush.bf16.msra.mxu1 %v4581_v18  ;;  %2857 = vmatpush.bf16.msrb.mxu0 %v4965_v19  ;;  %v919_v18 = vperm.slane %v6467_v5, 1 }
 0x18a   :  { %2831 = vmatpush.bf16.msra.mxu2 %v4709_v24  ;;  %2844 = vmatpush.bf16.msra.mxu3 %v4837_v25  ;;  %v5282_v24 = vld [vmem:[%s7824_s7 + $0xc4] sm:$0xf]  ;;  %v4102_v25 = vld [vmem:[%s7824_s7 + $0xd0] sm:$0xf0] }
 0x18b   :  { %v4105_v35 = vor.u32 %v5282_v24, %v4102_v25  ;;  %v4198_v24 = vld [vmem:[%s7824_s7 + $0x190] sm:$0xf0] }
 0x18d   :  { %2819 = vmatpush.bf16.msra.mxu1 %v4565_v26  ;;  %2858 = vmatpush.bf16.msrb.mxu0 %v4949_v14 }
 0x18e   :  { %2832 = vmatpush.bf16.msra.mxu2 %v4693_v36  ;;  %2845 = vmatpush.bf16.msra.mxu3 %v4821_v38  ;;  %v5350_v36 = vld [vmem:[%s7824_s7 + $0x2e4] sm:$0xf] }
 0x191   :  { %2820 = vmatpush.bf16.msra.mxu1 %v4549_v31  ;;  %2859 = vmatpush.bf16.msrb.mxu0 %v4933_v32  ;;  %v5318_v31 = vld [vmem:[%s7824_s7 + $0x1e4] sm:$0xf]  ;;  %v4246_v32 = vld [vmem:[%s7824_s7 + $0x1f0] sm:$0xf0] }
 0x192   :  { %2833 = vmatpush.bf16.msra.mxu2 %v4677_v48  ;;  %2846 = vmatpush.bf16.msra.mxu3 %v4805_v50  ;;  %v4377_v48 = vor.u32 %v5350_v36, %v4374_v37  ;;  %v4230_v50 = vld [vmem:[%s7824_s7 + $0x1d0] sm:$0xf0]  ;;  %v5362_v36 = vld [vmem:[%s7824_s7 + $0x344] sm:$0xf] }
 0x193   :  { %v4233_v61 = vor.u32 %v5314_v49, %v4230_v50  ;;  %v4422_v37 = vld [vmem:[%s7824_s7 + $0x350] sm:$0xf0] }
 0x195   :  { %2821 = vmatpush.bf16.msra.mxu1 %v4533_v41  ;;  %2860 = vmatpush.bf16.msrb.mxu0 %v4917_v44  ;;  %v5278_v41 = vld [vmem:[%s7824_s7 + $0xa4] sm:$0xf]  ;;  %v4249_v44 = vor.u32 %v5318_v31, %v4246_v32 }
 0x196   :  { %2834 = vmatpush.bf16.msra.mxu2 %v4661_v60  ;;  %2847 = vmatpush.bf16.msra.mxu3 %v4789_v62  ;;  %v4089_v52 = vor.u32 %v5278_v41, %v4086_v42  ;;  %v925_v60 = vperm.slane %v6467_v5, 7  ;;  %v5370_v62 = vld [vmem:[%s7824_s7 + $0x384] sm:$0xf]  ;;  %v4182_v42 = vld [vmem:[%s7824_s7 + $0x170] sm:$0xf0] }
 0x197   :  { %v4457_v12 = vor.u32 %v5370_v62, %v4454_v63  ;;  %v5266_v32 = vld [vmem:[%s7824_s7 + $0x44] sm:$0xf]  ;;  %v4166_v62 = vld [vmem:[%s7824_s7 + $0x150] sm:$0xf0] }
 0x198   :  { %v5302_v41 = vld [vmem:[%s7824_s7 + $0x164] sm:$0xf] }
 0x199   :  { %2822 = vmatpush.bf16.msra.mxu1 %v4517_v54  ;;  %2861 = vmatpush.bf16.msrb.mxu0 %v4901_v56  ;;  %v4358_v54 = vld [vmem:[%s7824_s7 + $0x2d0] sm:$0xf0]  ;;  %v922_v56 = vperm.slane %v6467_v5, 4 }
 0x19a   :  { %2835 = vmatpush.bf16.msra.mxu2 %v4645_v1  ;;  %2848 = vmatpush.bf16.msra.mxu3 %v4773_v4  ;;  %v4361_v1 = vor.u32 %v5346_v53, %v4358_v54  ;;  %v5262_v53 = vld [vmem:[%s7824_s7 + $0x24] sm:$0xf]  ;;  %v4022_v54 = vld [vmem:[%s7824_s7 + $0x30] sm:$0xf0] }
 0x1d8   :  { %v1106_v8 = vpop.f32.mrf.mxu1 }
 0x1d9   :  { %v1107_v9 = vadd.f32 %v1106_v8, %v918_v6  ;;  %v1145_v10 = vpop.f32.mrf.mxu0  ;;  %v4073_v6 = vor.u32 %v5274_v57, %v4070_v59  ;;  %v4342_v8 = vld [vmem:[%s7824_s7 + $0x2b0] sm:$0xf0]  ;;  %v5358_v57 = vld [vmem:[%s7824_s7 + $0x324] sm:$0xf] }
 0x1da   :  { %v1146_v15 = vadd.f32 %v1145_v10, %v921_v7  ;;  %v5342_v7 = vld [vmem:[%s7824_s7 + $0x2a4] sm:$0xf]  ;;  %v4406_v59 = vld [vmem:[%s7824_s7 + $0x330] sm:$0xf0] }
 0x1db   :  { %v1201_v17 = vmax.f32 %v1107_v9, 0.0 }
 0x1dc   :  { %v1204_v19 = vmax.f32 %v1146_v15, 0.0  ;;  %v4054_v15 = vld [vmem:[%s7824_s7 + $0x70] sm:$0xf0] }
 0x1dd   :  { %v6485_v22 = vpack.c.bf16 %v1201_v17, %v1201_v17  ;;  %v5366_v17 = vld [vmem:[%s7824_s7 + $0x364] sm:$0xf]  ;;  %v4057_v27 = vor.u32 %v5270_v13, %v4054_v15  ;;  %v4630_v13 = vld [vmem:[%s7824_s7 + $0x4f0] sm:$0xf0] }
 0x1de   :  { %v6493_v26 = vpack.c.bf16 %v1204_v19, %v1204_v19  ;;  %v1119_v14 = vpop.f32.mrf.mxu2  ;;  %v5510_v15 = vld [vmem:[%s7824_s7 + $0x7e4] sm:$0xf] }
 0x1df   :  { %v1120_v29 = vadd.f32 %v1119_v14, %v919_v18  ;;  %v1132_v30 = vpop.f32.mrf.mxu3  ;;  %2771 = vmatmul.bf16.vlgmr.msrb.gmra.mxu1 %v6485_v22  ;;  %v4438_v18 = vld [vmem:[%s7824_s7 + $0x370] sm:$0xf0]  ;;  %v924_v14 = vperm.slane %v6467_v5, 6 }
 0x1e0   :  { %v1133_v33 = vadd.f32 %v1132_v30, %v920_v20  ;;  %2810 = vmatmul.bf16.vlgmr.msra.gmra.mxu0 %v6493_v26  ;;  %2867 = vmatpush.bf16.msrb.mxu1 %v4121_v21  ;;  %v1108_v34 = vpop.f32.mrf.mxu1  ;;  %v4345_v20 = vor.u32 %v5342_v7, %v4342_v8  ;;  %v923_v21 = vperm.slane %v6467_v5, 5  ;;  %v4441_v31 = vor.u32 %v5366_v17, %v4438_v18  ;;  %v4038_v5 = vld [vmem:[%s7824_s7 + $0x50] sm:$0xf0]  ;;  %v5354_v7 = vld [vmem:[%s7824_s7 + $0x304] sm:$0xf] }
 0x1e1   :  { %v1202_v38 = vmax.f32 %v1120_v29, 0.0  ;;  %2906 = vmatpush.bf16.msra.mxu0 %v4505_v23  ;;  %v1147_v39 = vpop.f32.mrf.mxu0  ;;  %v5306_v23 = vld [vmem:[%s7824_s7 + $0x184] sm:$0xf]  ;;  %v4326_v29 = vld [vmem:[%s7824_s7 + $0x290] sm:$0xf0]  ;;  %v4041_v45 = vor.u32 %v5266_v32, %v4038_v5 }
 0x1e2   :  { %v1203_v43 = vmax.f32 %v1133_v33, 0.0  ;;  %v4390_v8 = vld [vmem:[%s7824_s7 + $0x310] sm:$0xf0]  ;;  %v5294_v18 = vld [vmem:[%s7824_s7 + $0x124] sm:$0xf] }
 0x1e3   :  { %v6527_v47 = vpack.c.bf16 %v1202_v38, %v1202_v38  ;;  %v5014_v17 = vld [vmem:[%s7824_s7 + $0x7f0] sm:$0xf0] }
 0x1e4   :  { %v6535_v51 = vpack.c.bf16 %v1203_v43, %v1203_v43  ;;  %2868 = vmatpush.bf16.msrb.mxu1 %v4105_v35  ;;  %v4201_v35 = vor.u32 %v5306_v23, %v4198_v24  ;;  %v4278_v23 = vld [vmem:[%s7824_s7 + $0x230] sm:$0xf0]  ;;  %v4393_v24 = vor.u32 %v5354_v7, %v4390_v8  ;;  %v5470_v8 = vld [vmem:[%s7824_s7 + $0x6a4] sm:$0xf] }
 0x1e5   :  { %2907 = vmatpush.bf16.msra.mxu0 %v4489_v40  ;;  %2784 = vmatmul.bf16.vlgmr.msrb.gmra.mxu2 %v6527_v47  ;;  %v4329_v40 = vor.u32 %v5338_v28, %v4326_v29  ;;  %v4614_v29 = vld [vmem:[%s7824_s7 + $0x4d0] sm:$0xf0] }
 0x1e6   :  { %2797 = vmatmul.bf16.vlgmr.msrb.gmra.mxu3 %v6535_v51  ;;  %2880 = vmatpush.bf16.msrb.mxu2 %v4249_v44  ;;  %v1121_v58 = vpop.f32.mrf.mxu2  ;;  %v4998_v32 = vld [vmem:[%s7824_s7 + $0x7d0] sm:$0xf0] }
 0x1e7   :  { %2893 = vmatpush.bf16.msrb.mxu3 %v4377_v48  ;;  %v1134_v0 = vpop.f32.mrf.mxu3  ;;  %v4310_v48 = vld [vmem:[%s7824_s7 + $0x270] sm:$0xf0] }
 0x1e8   :  { %2869 = vmatpush.bf16.msrb.mxu1 %v4089_v52  ;;  %v1158_v4 = vpop.f32.mrf.mxu1  ;;  %v4425_v52 = vor.u32 %v5362_v36, %v4422_v37  ;;  %v4025_v0 = vor.u32 %v5262_v53, %v4022_v54  ;;  %v5322_v36 = vld [vmem:[%s7824_s7 + $0x204] sm:$0xf]  ;;  %v4262_v37 = vld [vmem:[%s7824_s7 + $0x210] sm:$0xf0] }
 0x1e9   :  { %2908 = vmatpush.bf16.msra.mxu0 %v4473_v55  ;;  %v1159_v9 = vadd.f32 %v1158_v4, %v922_v56  ;;  %v1197_v10 = vpop.f32.mrf.mxu0  ;;  %v4185_v56 = vor.u32 %v5302_v41, %v4182_v42  ;;  %v4409_v4 = vor.u32 %v5358_v57, %v4406_v59  ;;  %v5478_v41 = vld [vmem:[%s7824_s7 + $0x6e4] sm:$0xf]  ;;  %v4886_v42 = vld [vmem:[%s7824_s7 + $0x6f0] sm:$0xf0] }
 0x1ea   :  { %v1198_v11 = vadd.f32 %v1197_v10, %v925_v60  ;;  %2881 = vmatpush.bf16.msrb.mxu2 %v4233_v61  ;;  %v4313_v60 = vor.u32 %v5334_v46, %v4310_v48  ;;  %v5298_v61 = vld [vmem:[%s7824_s7 + $0x144] sm:$0xf]  ;;  %v4598_v46 = vld [vmem:[%s7824_s7 + $0x4b0] sm:$0xf0]  ;;  %v4265_v48 = vor.u32 %v5322_v36, %v4262_v37  ;;  %v4889_v53 = vor.u32 %v5478_v41, %v4886_v42 }
 0x1eb   :  { %v1205_v19 = vmax.f32 %v1159_v9, 0.0  ;;  %2894 = vmatpush.bf16.msrb.mxu3 %v4361_v1  ;;  %v5330_v1 = vld [vmem:[%s7824_s7 + $0x244] sm:$0xf]  ;;  %v4169_v10 = vor.u32 %v5298_v61, %v4166_v62  ;;  %v4870_v59 = vld [vmem:[%s7824_s7 + $0x6d0] sm:$0xf0] }
 0x1ec   :  { %v1208_v25 = vmax.f32 %v1198_v11, 0.0  ;;  %2870 = vmatpush.bf16.msrb.mxu1 %v4073_v6  ;;  %v4006_v6 = vld [vmem:[%s7824_s7 + $0x10] sm:$0xf0]  ;;  %v5442_v54 = vld [vmem:[%s7824_s7 + $0x5c4] sm:$0xf] }
 0x1ed   :  { %v6597_v30 = vpack.c.bf16 %v1205_v19, %v1205_v19  ;;  %2909 = vmatpush.bf16.msra.mxu0 %v4457_v12  ;;  %v5414_v12 = vld [vmem:[%s7824_s7 + $0x4e4] sm:$0xf]  ;;  %v4150_v19 = vld [vmem:[%s7824_s7 + $0x130] sm:$0xf0] }
 0x1ee   :  { %v6605_v33 = vpack.c.bf16 %v1208_v25, %v1208_v25  ;;  %2882 = vmatpush.bf16.msrb.mxu2 %v4217_v16  ;;  %v1171_v34 = vpop.f32.mrf.mxu2  ;;  %v4297_v16 = vor.u32 %v5330_v1, %v4294_v2  ;;  %v4633_v25 = vor.u32 %v5414_v12, %v4630_v13  ;;  %v4153_v28 = vor.u32 %v5294_v18, %v4150_v19  ;;  %v5474_v57 = vld [vmem:[%s7824_s7 + $0x6c4] sm:$0xf]  ;;  %v4582_v62 = vld [vmem:[%s7824_s7 + $0x490] sm:$0xf0] }
 0x1ef   :  { %2895 = vmatpush.bf16.msrb.mxu3 %v4345_v20  ;;  %v1172_v38 = vadd.f32 %v1171_v34, %v923_v21  ;;  %v1184_v39 = vpop.f32.mrf.mxu3  ;;  %2823 = vmatmul.bf16.vlgmr.msra.gmra.mxu1 %v6597_v30  ;;  %v4009_v20 = vor.u32 %v5258_v3, %v4006_v6  ;;  %v5326_v21 = vld [vmem:[%s7824_s7 + $0x224] sm:$0xf]  ;;  %v4966_v2 = vld [vmem:[%s7824_s7 + $0x790] sm:$0xf0]  ;;  %v4873_v3 = vor.u32 %v5474_v57, %v4870_v59  ;;  %v4124_v57 = vld [vmem:[%s7824_s7 + $0xe8] sm:$0xf] }
 0x1f0   :  { %v1185_v43 = vadd.f32 %v1184_v39, %v924_v14  ;;  %2862 = vmatmul.bf16.vlgmr.msrb.gmra.mxu0 %v6605_v33  ;;  %2871 = vmatpush.bf16.msrb.mxu1 %v4057_v27  ;;  %v1160_v44 = vpop.f32.mrf.mxu1  ;;  %v5410_v14 = vld [vmem:[%s7824_s7 + $0x4c4] sm:$0xf]  ;;  %v5017_v27 = vor.u32 %v5510_v15, %v5014_v17  ;;  %v4281_v5 = vor.u32 %v5326_v21, %v4278_v23  ;;  %v4758_v39 = vld [vmem:[%s7824_s7 + $0x5f0] sm:$0xf0]  ;;  %v5289_v59 = vld [vmem:[%s7824_s7 + $0xf4] sm:$0xf0] }
 0x1f1   :  { %v1206_v49 = vmax.f32 %v1172_v38, 0.0  ;;  %2910 = vmatpush.bf16.msra.mxu0 %v4441_v31  ;;  %v1199_v50 = vpop.f32.mrf.mxu0  ;;  %v5506_v31 = vld [vmem:[%s7824_s7 + $0x7c4] sm:$0xf]  ;;  %v4726_v6 = vld [vmem:[%s7824_s7 + $0x5b0] sm:$0xf0] }
 0x1f2   :  { %v1207_v55 = vmax.f32 %v1185_v43, 0.0  ;;  %2883 = vmatpush.bf16.msrb.mxu2 %v4201_v35  ;;  %v5290_v34 = vld [vmem:[%s7824_s7 + $0x104] sm:$0xf]  ;;  %v4134_v35 = vld [vmem:[%s7824_s7 + $0x110] sm:$0xf0]  ;;  %v5001_v43 = vor.u32 %v5506_v31, %v4998_v32 }
 0x1f3   :  { %v6639_v58 = vpack.c.bf16 %v1206_v49, %v1206_v49  ;;  %2896 = vmatpush.bf16.msrb.mxu3 %v4329_v40  ;;  %v5446_v38 = vld [vmem:[%s7824_s7 + $0x5e4] sm:$0xf]  ;;  %v4617_v40 = vor.u32 %v5410_v14, %v4614_v29  ;;  %v4137_v44 = vor.u32 %v5290_v34, %v4134_v35  ;;  %v4566_v13 = vld [vmem:[%s7824_s7 + $0x470] sm:$0xf0] }
 0x1f4   :  { %v6647_v63 = vpack.c.bf16 %v1207_v55, %v1207_v55  ;;  %2872 = vmatpush.bf16.msrb.mxu1 %v4041_v45  ;;  %v5406_v45 = vld [vmem:[%s7824_s7 + $0x4a4] sm:$0xf]  ;;  %v4761_v49 = vor.u32 %v5446_v38, %v4758_v39  ;;  %v4742_v55 = vld [vmem:[%s7824_s7 + $0x5d0] sm:$0xf0] }
 0x1f5   :  { %2911 = vmatpush.bf16.msra.mxu0 %v4425_v52  ;;  %2836 = vmatmul.bf16.vlgmr.msra.gmra.mxu2 %v6639_v58  ;;  %v5502_v50 = vld [vmem:[%s7824_s7 + $0x7a4] sm:$0xf]  ;;  %v4982_v52 = vld [vmem:[%s7824_s7 + $0x7b0] sm:$0xf0] }
 0x1f6   :  { %2849 = vmatmul.bf16.vlgmr.msra.gmra.mxu3 %v6647_v63  ;;  %2884 = vmatpush.bf16.msrb.mxu2 %v4185_v56  ;;  %v1173_v9 = vpop.f32.mrf.mxu2  ;;  %v4601_v56 = vor.u32 %v5406_v45, %v4598_v46  ;;  %v5402_v61 = vld [vmem:[%s7824_s7 + $0x484] sm:$0xf]  ;;  %v4710_v19 = vld [vmem:[%s7824_s7 + $0x590] sm:$0xf0] }
 0x1f7   :  { %2897 = vmatpush.bf16.msrb.mxu3 %v4313_v60  ;;  %v1186_v11 = vpop.f32.mrf.mxu3  ;;  %v4985_v60 = vor.u32 %v5502_v50, %v4982_v52  ;;  %v5498_v1 = vld [vmem:[%s7824_s7 + $0x784] sm:$0xf]  ;;  %v4585_v7 = vor.u32 %v5402_v61, %v4582_v62  ;;  %v4854_v9 = vld [vmem:[%s7824_s7 + $0x6b0] sm:$0xf0]  ;;  %v5385_v62 = vld [vmem:[%s7824_s7 + $0x3f4] sm:$0xf0] }
 0x1f8   :  { %2873 = vmatpush.bf16.msrb.mxu1 %v4025_v0  ;;  %v4745_v0 = vor.u32 %v5442_v54, %v4742_v55  ;;  %v5398_v12 = vld [vmem:[%s7824_s7 + $0x464] sm:$0xf]  ;;  %v4857_v17 = vor.u32 %v5470_v8, %v4854_v9  ;;  %v4838_v23 = vld [vmem:[%s7824_s7 + $0x690] sm:$0xf0]  ;;  %v4108_v8 = vld [vmem:[%s7824_s7 + $0xc8] sm:$0xf] }
 0x1f9   :  { %2912 = vmatpush.bf16.msra.mxu0 %v4409_v4  ;;  %v5438_v4 = vld [vmem:[%s7824_s7 + $0x5a4] sm:$0xf]  ;;  %v4550_v14 = vld [vmem:[%s7824_s7 + $0x450] sm:$0xf0] }
 0x1fa   :  { %2885 = vmatpush.bf16.msrb.mxu2 %v4169_v10  ;;  %v4969_v10 = vor.u32 %v5498_v1, %v4966_v2  ;;  %v4729_v15 = vor.u32 %v5438_v4, %v4726_v6  ;;  %v5494_v11 = vld [vmem:[%s7824_s7 + $0x764] sm:$0xf]  ;;  %v4934_v29 = vld [vmem:[%s7824_s7 + $0x750] sm:$0xf0] }
 0x1fb   :  { %2898 = vmatpush.bf16.msrb.mxu3 %v4297_v16  ;;  %v4950_v16 = vld [vmem:[%s7824_s7 + $0x770] sm:$0xf0]  ;;  %v5434_v18 = vld [vmem:[%s7824_s7 + $0x584] sm:$0xf] }
 0x1fc   :  { %2874 = vmatpush.bf16.msrb.mxu1 %v4009_v20  ;;  %v4569_v20 = vor.u32 %v5398_v12, %v4566_v13  ;;  %v5466_v21 = vld [vmem:[%s7824_s7 + $0x684] sm:$0xf]  ;;  %v4822_v36 = vld [vmem:[%s7824_s7 + $0x670] sm:$0xf0]  ;;  %v5285_v12 = vld [vmem:[%s7824_s7 + $0xd4] sm:$0xf0] }
 0x1fd   :  { %2913 = vmatpush.bf16.msra.mxu0 %v4393_v24  ;;  %v4953_v24 = vor.u32 %v5494_v11, %v4950_v16  ;;  %v4841_v31 = vor.u32 %v5466_v21, %v4838_v23  ;;  %v5430_v32 = vld [vmem:[%s7824_s7 + $0x564] sm:$0xf]  ;;  %v4534_v39 = vld [vmem:[%s7824_s7 + $0x430] sm:$0xf0]  ;;  %v4492_v13 = vld [vmem:[%s7824_s7 + $0x3c8] sm:$0xf]  ;;  %v4109_v23 = vor.u32 %v5285_v12, %v4108_v8 }
 0x1fe   :  { %2886 = vmatpush.bf16.msrb.mxu2 %v4153_v28  ;;  %v5490_v28 = vld [vmem:[%s7824_s7 + $0x744] sm:$0xf]  ;;  %v4918_v42 = vld [vmem:[%s7824_s7 + $0x730] sm:$0xf0]  ;;  %v5321_v21 = vld [vmem:[%s7824_s7 + $0x1f4] sm:$0xf0] }
 0x1ff   :  { %2899 = vmatpush.bf16.msrb.mxu3 %v4281_v5  ;;  %2875 = vmatmul.bf16.vlgmr.msrb.gmra.mxu1 %v6485_v22  ;;  %v4694_v5 = vld [vmem:[%s7824_s7 + $0x570] sm:$0xf0]  ;;  %v5462_v35 = vld [vmem:[%s7824_s7 + $0x664] sm:$0xf]  ;;  %v4937_v37 = vor.u32 %v5490_v28, %v4934_v29  ;;  %v4092_v28 = vld [vmem:[%s7824_s7 + $0xa8] sm:$0xf] }
 0x200   :  { %2919 = vmatpush.bf16.msra.mxu1 %v4633_v25  ;;  %2914 = vmatmul.bf16.vlgmr.msra.gmra.mxu0 %v6493_v26  ;;  %v5394_v25 = vld [vmem:[%s7824_s7 + $0x444] sm:$0xf]  ;;  %v4678_v45 = vld [vmem:[%s7824_s7 + $0x550] sm:$0xf0]  ;;  %v5281_v29 = vld [vmem:[%s7824_s7 + $0xb4] sm:$0xf0] }
 0x201   :  { %2958 = vmatpush.bf16.msrb.mxu0 %v5017_v27  ;;  %v4713_v27 = vor.u32 %v5434_v18, %v4710_v19  ;;  %v4553_v34 = vor.u32 %v5394_v25, %v4550_v14  ;;  %v5390_v38 = vld [vmem:[%s7824_s7 + $0x424] sm:$0xf]  ;;  %v4902_v55 = vld [vmem:[%s7824_s7 + $0x710] sm:$0xf0]  ;;  %v5353_v25 = vld [vmem:[%s7824_s7 + $0x2f4] sm:$0xf0] }
 0x202   :  { %2887 = vmatpush.bf16.msrb.mxu2 %v4137_v44  ;;  %v5486_v41 = vld [vmem:[%s7824_s7 + $0x724] sm:$0xf]  ;;  %v4537_v46 = vor.u32 %v5390_v38, %v4534_v39  ;;  %v4662_v1 = vld [vmem:[%s7824_s7 + $0x530] sm:$0xf0]  ;;  %v4093_v38 = vor.u32 %v5281_v29, %v4092_v28  ;;  %v4364_v39 = vld [vmem:[%s7824_s7 + $0x2c8] sm:$0xf] }
 0x203   :  { %2900 = vmatpush.bf16.msrb.mxu3 %v4265_v48  ;;  %v5426_v44 = vld [vmem:[%s7824_s7 + $0x544] sm:$0xf]  ;;  %v4921_v52 = vor.u32 %v5486_v41, %v4918_v42  ;;  %v4790_v4 = vld [vmem:[%s7824_s7 + $0x630] sm:$0xf0]  ;;  %v4076_v42 = vld [vmem:[%s7824_s7 + $0x88] sm:$0xf] }
 0x204   :  { %2920 = vmatpush.bf16.msra.mxu1 %v4617_v40  ;;  %v4697_v40 = vor.u32 %v5430_v32, %v4694_v5  ;;  %v5458_v48 = vld [vmem:[%s7824_s7 + $0x644] sm:$0xf]  ;;  %v4774_v19 = vld [vmem:[%s7824_s7 + $0x610] sm:$0xf0]  ;;  %v4476_v5 = vld [vmem:[%s7824_s7 + $0x3a8] sm:$0xf] }
 0x205   :  { %2959 = vmatpush.bf16.msrb.mxu0 %v5001_v43  ;;  %2888 = vmatmul.bf16.vlgmr.msrb.gmra.mxu2 %v6527_v47  ;;  %v4825_v43 = vor.u32 %v5462_v35, %v4822_v36  ;;  %v5386_v50 = vld [vmem:[%s7824_s7 + $0x404] sm:$0xf]  ;;  %v4236_v36 = vld [vmem:[%s7824_s7 + $0x1c8] sm:$0xf]  ;;  %v5269_v8 = vld [vmem:[%s7824_s7 + $0x54] sm:$0xf0] }
 0x206   :  { %2932 = vmatpush.bf16.msra.mxu2 %v4761_v49  ;;  %2901 = vmatmul.bf16.vlgmr.msrb.gmra.mxu3 %v6535_v51  ;;  %v4806_v49 = vld [vmem:[%s7824_s7 + $0x650] sm:$0xf0]  ;;  %v5482_v54 = vld [vmem:[%s7824_s7 + $0x704] sm:$0xf]  ;;  %v5365_v12 = vld [vmem:[%s7824_s7 + $0x354] sm:$0xf0] }
 0x207   :  { %2945 = vmatpush.bf16.msra.mxu3 %v4889_v53  ;;  %v4518_v53 = vld [vmem:[%s7824_s7 + $0x410] sm:$0xf0]  ;;  %v4809_v61 = vor.u32 %v5458_v48, %v4806_v49  ;;  %v4905_v6 = vor.u32 %v5482_v54, %v4902_v55  ;;  %v5418_v16 = vld [vmem:[%s7824_s7 + $0x504] sm:$0xf]  ;;  %v4220_v49 = vld [vmem:[%s7824_s7 + $0x1a8] sm:$0xf] }
 0x208   :  { %2921 = vmatpush.bf16.msra.mxu1 %v4601_v56  ;;  %v4681_v56 = vor.u32 %v5426_v44, %v4678_v45  ;;  %v4521_v2 = vor.u32 %v5386_v50, %v4518_v53  ;;  %v5450_v18 = vld [vmem:[%s7824_s7 + $0x604] sm:$0xf]  ;;  %v4460_v45 = vld [vmem:[%s7824_s7 + $0x388] sm:$0xf]  ;;  %v5313_v50 = vld [vmem:[%s7824_s7 + $0x1b4] sm:$0xf0] }
 0x209   :  { %2960 = vmatpush.bf16.msrb.mxu0 %v4985_v60  ;;  %v4508_v60 = vld [vmem:[%s7824_s7 + $0x3e8] sm:$0xf]  ;;  %v5345_v54 = vld [vmem:[%s7824_s7 + $0x2b4] sm:$0xf0] }
 0x20a   :  { %2933 = vmatpush.bf16.msra.mxu2 %v4745_v0  ;;  %v5422_v0 = vld [vmem:[%s7824_s7 + $0x524] sm:$0xf]  ;;  %v4509_v9 = vor.u32 %v5385_v62, %v4508_v60  ;;  %v4348_v53 = vld [vmem:[%s7824_s7 + $0x2a8] sm:$0xf]  ;;  %v5301_v28 = vld [vmem:[%s7824_s7 + $0x154] sm:$0xf0] }
 0x20b   :  { %2946 = vmatpush.bf16.msra.mxu3 %v4873_v3  ;;  %v5454_v3 = vld [vmem:[%s7824_s7 + $0x624] sm:$0xf]  ;;  %v4444_v60 = vld [vmem:[%s7824_s7 + $0x368] sm:$0xf]  ;;  %v4349_v62 = vor.u32 %v5345_v54, %v4348_v53 }
 0x20c   :  { %2922 = vmatpush.bf16.msra.mxu1 %v4585_v7  ;;  %v4125_v7 = vor.u32 %v5289_v59, %v4124_v57  ;;  %v4793_v11 = vor.u32 %v5454_v3, %v4790_v4  ;;  %v5273_v57 = vld [vmem:[%s7824_s7 + $0x74] sm:$0xf0]  ;;  %v4221_v59 = vor.u32 %v5313_v50, %v4220_v49  ;;  %v4332_v3 = vld [vmem:[%s7824_s7 + $0x288] sm:$0xf] }
 0x20d   :  { %2961 = vmatpush.bf16.msrb.mxu0 %v4969_v10  ;;  %v4665_v10 = vor.u32 %v5422_v0, %v4662_v1  ;;  %v4204_v0 = vld [vmem:[%s7824_s7 + $0x188] sm:$0xf]  ;;  %v5309_v1 = vld [vmem:[%s7824_s7 + $0x194] sm:$0xf0] }
 0x20e   :  { %2934 = vmatpush.bf16.msra.mxu2 %v4729_v15  ;;  %v5381_v15 = vld [vmem:[%s7824_s7 + $0x3d4] sm:$0xf0]  ;;  %v4620_v53 = vld [vmem:[%s7824_s7 + $0x4c8] sm:$0xf] }
 0x20f   :  { %2947 = vmatpush.bf16.msra.mxu3 %v4857_v17  ;;  %v4646_v17 = vld [vmem:[%s7824_s7 + $0x510] sm:$0xf0]  ;;  %v4493_v14 = vor.u32 %v5381_v15, %v4492_v13  ;;  %v5341_v4 = vld [vmem:[%s7824_s7 + $0x294] sm:$0xf0]  ;;  %v4188_v15 = vld [vmem:[%s7824_s7 + $0x168] sm:$0xf] }
 0x210   :  { %2923 = vmatpush.bf16.msra.mxu1 %v4569_v20  ;;  %v4252_v20 = vld [vmem:[%s7824_s7 + $0x1e8] sm:$0xf]  ;;  %v4333_v13 = vor.u32 %v5341_v4, %v4332_v3  ;;  %v5329_v49 = vld [vmem:[%s7824_s7 + $0x234] sm:$0xf0] }
 0x211   :  { %2962 = vmatpush.bf16.msrb.mxu0 %v4953_v24  ;;  %v4380_v24 = vld [vmem:[%s7824_s7 + $0x2e8] sm:$0xf]  ;;  %v4253_v32 = vor.u32 %v5321_v21, %v4252_v20  ;;  %v5265_v21 = vld [vmem:[%s7824_s7 + $0x34] sm:$0xf0] }
 0x212   :  { %2935 = vmatpush.bf16.msra.mxu2 %v4713_v27  ;;  %v4649_v27 = vor.u32 %v5418_v16, %v4646_v17  ;;  %v4381_v35 = vor.u32 %v5353_v25, %v4380_v24  ;;  %v4316_v17 = vld [vmem:[%s7824_s7 + $0x268] sm:$0xf]  ;;  %v5361_v25 = vld [vmem:[%s7824_s7 + $0x334] sm:$0xf0] }
 0x213   :  { %2948 = vmatpush.bf16.msra.mxu3 %v4841_v31  ;;  %v4777_v31 = vor.u32 %v5450_v18, %v4774_v19  ;;  %v5337_v18 = vld [vmem:[%s7824_s7 + $0x274] sm:$0xf0]  ;;  %v4028_v20 = vld [vmem:[%s7824_s7 + $0x28] sm:$0xf] }
 0x214   :  { %2924 = vmatpush.bf16.msra.mxu1 %v4553_v34  ;;  %v5377_v34 = vld [vmem:[%s7824_s7 + $0x3b4] sm:$0xf0]  ;;  %v4412_v24 = vld [vmem:[%s7824_s7 + $0x328] sm:$0xf]  ;;  %v4029_v29 = vor.u32 %v5265_v21, %v4028_v20 }
 0x215   :  { %2963 = vmatpush.bf16.msrb.mxu0 %v4937_v37  ;;  %v5317_v37 = vld [vmem:[%s7824_s7 + $0x1d4] sm:$0xf0]  ;;  %v4477_v41 = vor.u32 %v5377_v34, %v4476_v5  ;;  %v4012_v5 = vld [vmem:[%s7824_s7 + $0x8] sm:$0xf]  ;;  %v4413_v34 = vor.u32 %v5361_v25, %v4412_v24 }
 0x216   :  { %2936 = vmatpush.bf16.msra.mxu2 %v4697_v40  ;;  %v5349_v40 = vld [vmem:[%s7824_s7 + $0x2d4] sm:$0xf0]  ;;  %v4237_v44 = vor.u32 %v5317_v37, %v4236_v36  ;;  %v4396_v36 = vld [vmem:[%s7824_s7 + $0x308] sm:$0xf] }
 0x217   :  { %2949 = vmatpush.bf16.msra.mxu3 %v4825_v43  ;;  %v5277_v43 = vld [vmem:[%s7824_s7 + $0x94] sm:$0xf0]  ;;  %v4365_v48 = vor.u32 %v5349_v40, %v4364_v39  ;;  %v4636_v39 = vld [vmem:[%s7824_s7 + $0x4e8] sm:$0xf] }
 0x218   :  { %2925 = vmatpush.bf16.msra.mxu1 %v4537_v46  ;;  %v5373_v46 = vld [vmem:[%s7824_s7 + $0x394] sm:$0xf0]  ;;  %v4876_v21 = vld [vmem:[%s7824_s7 + $0x6c8] sm:$0xf] }
 0x219   :  { %2964 = vmatpush.bf16.msrb.mxu0 %v4921_v52  ;;  %v4077_v52 = vor.u32 %v5277_v43, %v4076_v42  ;;  %v4461_v55 = vor.u32 %v5373_v46, %v4460_v45  ;;  %v5357_v37 = vld [vmem:[%s7824_s7 + $0x314] sm:$0xf0]  ;;  %v4588_v25 = vld [vmem:[%s7824_s7 + $0x488] sm:$0xf] }
 0x21a   :  { %2937 = vmatpush.bf16.msra.mxu2 %v4681_v56  ;;  %v4060_v56 = vld [vmem:[%s7824_s7 + $0x68] sm:$0xf]  ;;  %v5417_v40 = vld [vmem:[%s7824_s7 + $0x4f4] sm:$0xf0]  ;;  %v4397_v50 = vor.u32 %v5357_v37, %v4396_v36 }
 0x21b   :  { %2950 = vmatpush.bf16.msra.mxu3 %v4809_v61  ;;  %v5369_v61 = vld [vmem:[%s7824_s7 + $0x374] sm:$0xf0] }
 0x21c   :  { %2926 = vmatpush.bf16.msra.mxu1 %v4521_v2  ;;  %v4061_v2 = vor.u32 %v5273_v57, %v4060_v56  ;;  %v5513_v43 = vld [vmem:[%s7824_s7 + $0x7f4] sm:$0xf0]  ;;  %v5004_v57 = vld [vmem:[%s7824_s7 + $0x7c8] sm:$0xf] }
 0x21d   :  { %2965 = vmatpush.bf16.msrb.mxu0 %v4905_v6  ;;  %v4445_v6 = vor.u32 %v5369_v61, %v4444_v60  ;;  %v5297_v45 = vld [vmem:[%s7824_s7 + $0x134] sm:$0xf0]  ;;  %v4140_v61 = vld [vmem:[%s7824_s7 + $0x108] sm:$0xf] }
 0x21e   :  { %2938 = vmatpush.bf16.msra.mxu2 %v4665_v10  ;;  %v4428_v10 = vld [vmem:[%s7824_s7 + $0x348] sm:$0xf]  ;;  %v5413_v56 = vld [vmem:[%s7824_s7 + $0x4d4] sm:$0xf0] }
 0x21f   :  { %2951 = vmatpush.bf16.msra.mxu3 %v4793_v11  ;;  %2927 = vmatmul.bf16.vlgmr.msra.gmra.mxu1 %v6597_v30  ;;  %v5305_v11 = vld [vmem:[%s7824_s7 + $0x174] sm:$0xf0]  ;;  %v4429_v19 = vor.u32 %v5365_v12, %v4428_v10  ;;  %v4621_v4 = vor.u32 %v5413_v56, %v4620_v53  ;;  %v4604_v10 = vld [vmem:[%s7824_s7 + $0x4a8] sm:$0xf] }
 0x220   :  { %2971 = vmatpush.bf16.msrb.mxu1 %v4125_v7  ;;  %2966 = vmatmul.bf16.vlgmr.msrb.gmra.mxu0 %v6605_v33  ;;  %v4044_v7 = vld [vmem:[%s7824_s7 + $0x48] sm:$0xf]  ;;  %v5449_v3 = vld [vmem:[%s7824_s7 + $0x5f4] sm:$0xf0] }
 0x221   :  { %3010 = vmatpush.bf16.msra.mxu0 %v4509_v9  ;;  %v4205_v9 = vor.u32 %v5309_v1, %v4204_v0  ;;  %v4045_v16 = vor.u32 %v5269_v8, %v4044_v7  ;;  %v4268_v0 = vld [vmem:[%s7824_s7 + $0x208] sm:$0xf]  ;;  %v5325_v1 = vld [vmem:[%s7824_s7 + $0x214] sm:$0xf0] }
 0x222   :  { %2939 = vmatpush.bf16.msra.mxu2 %v4649_v27  ;;  %v4172_v27 = vld [vmem:[%s7824_s7 + $0x148] sm:$0xf]  ;;  %v5481_v7 = vld [vmem:[%s7824_s7 + $0x6f4] sm:$0xf0] }
 0x223   :  { %2952 = vmatpush.bf16.msra.mxu3 %v4777_v31  ;;  %v4300_v31 = vld [vmem:[%s7824_s7 + $0x248] sm:$0xf]  ;;  %v5409_v12 = vld [vmem:[%s7824_s7 + $0x4b4] sm:$0xf0] }
 0x224   :  { %2972 = vmatpush.bf16.msrb.mxu1 %v4109_v23  ;;  %v4189_v23 = vor.u32 %v5305_v11, %v4188_v15  ;;  %v4988_v11 = vld [vmem:[%s7824_s7 + $0x7a8] sm:$0xf]  ;;  %v4605_v20 = vor.u32 %v5409_v12, %v4604_v10  ;;  %v5473_v36 = vld [vmem:[%s7824_s7 + $0x6b4] sm:$0xf0] }
 0x225   :  { %3011 = vmatpush.bf16.msra.mxu0 %v4493_v14  ;;  %2940 = vmatmul.bf16.vlgmr.msra.gmra.mxu2 %v6639_v58  ;;  %v4317_v14 = vor.u32 %v5337_v18, %v4316_v17  ;;  %v4748_v18 = vld [vmem:[%s7824_s7 + $0x5c8] sm:$0xf]  ;;  %v5397_v53 = vld [vmem:[%s7824_s7 + $0x454] sm:$0xf0] }
 0x226   :  { %2984 = vmatpush.bf16.msrb.mxu2 %v4253_v32  ;;  %2953 = vmatmul.bf16.vlgmr.msra.gmra.mxu3 %v6647_v63  ;;  %v5333_v32 = vld [vmem:[%s7824_s7 + $0x254] sm:$0xf0] }
 0x227   :  { %2997 = vmatpush.bf16.msrb.mxu3 %v4381_v35  ;;  %v5261_v35 = vld [vmem:[%s7824_s7 + $0x14] sm:$0xf0]  ;;  %v4301_v42 = vor.u32 %v5333_v32, %v4300_v31  ;;  %v4732_v32 = vld [vmem:[%s7824_s7 + $0x5a8] sm:$0xf] }
 0x228   :  { %2973 = vmatpush.bf16.msrb.mxu1 %v4093_v38  ;;  %v4173_v38 = vor.u32 %v5301_v28, %v4172_v27  ;;  %v4013_v46 = vor.u32 %v5261_v35, %v4012_v5  ;;  %v4972_v28 = vld [vmem:[%s7824_s7 + $0x788] sm:$0xf]  ;;  %v5441_v5 = vld [vmem:[%s7824_s7 + $0x5b4] sm:$0xf0] }
 0x229   :  { %3012 = vmatpush.bf16.msra.mxu0 %v4477_v41  ;;  %v5020_v41 = vld [vmem:[%s7824_s7 + $0x7e8] sm:$0xf]  ;;  %v5493_v56 = vld [vmem:[%s7824_s7 + $0x754] sm:$0xf0] }
 0x22a   :  { %2985 = vmatpush.bf16.msrb.mxu2 %v4237_v44  ;;  %v4156_v44 = vld [vmem:[%s7824_s7 + $0x128] sm:$0xf]  ;;  %v5021_v54 = vor.u32 %v5513_v43, %v5020_v41  ;;  %v5429_v10 = vld [vmem:[%s7824_s7 + $0x554] sm:$0xf0] }
 0x22b   :  { %2998 = vmatpush.bf16.msrb.mxu3 %v4365_v48  ;;  %v4284_v48 = vld [vmem:[%s7824_s7 + $0x228] sm:$0xf] }
 0x22c   :  { %2974 = vmatpush.bf16.msrb.mxu1 %v4077_v52  ;;  %v4637_v52 = vor.u32 %v5417_v40, %v4636_v39  ;;  %v4285_v60 = vor.u32 %v5329_v49, %v4284_v48  ;;  %v4860_v35 = vld [vmem:[%s7824_s7 + $0x6a8] sm:$0xf]  ;;  %v5401_v39 = vld [vmem:[%s7824_s7 + $0x474] sm:$0xf0]  ;;  %v4733_v40 = vor.u32 %v5441_v5, %v4732_v32 }
 0x22d   :  { %3013 = vmatpush.bf16.msra.mxu0 %v4461_v55  ;;  %v4157_v55 = vor.u32 %v5297_v45, %v4156_v44  ;;  %v4956_v41 = vld [vmem:[%s7824_s7 + $0x768] sm:$0xf]  ;;  %v4861_v43 = vor.u32 %v5473_v36, %v4860_v35  ;;  %v5437_v45 = vld [vmem:[%s7824_s7 + $0x594] sm:$0xf0]  ;;  %v5283_v35 = vld [vmem:[%s7824_s7 + $0xcc] sm:$0xf] }
 0x22e   :  { %2986 = vmatpush.bf16.msrb.mxu2 %v4221_v59  ;;  %v5509_v59 = vld [vmem:[%s7824_s7 + $0x7d4] sm:$0xf0]  ;;  %v4716_v44 = vld [vmem:[%s7824_s7 + $0x588] sm:$0xf] }
 0x22f   :  { %2999 = vmatpush.bf16.msrb.mxu3 %v4349_v62  ;;  %v5293_v62 = vld [vmem:[%s7824_s7 + $0x114] sm:$0xf0]  ;;  %v5005_v8 = vor.u32 %v5509_v59, %v5004_v57  ;;  %v4844_v48 = vld [vmem:[%s7824_s7 + $0x688] sm:$0xf] }
 0x230   :  { %2975 = vmatpush.bf16.msrb.mxu1 %v4061_v2  ;;  %v4764_v2 = vld [vmem:[%s7824_s7 + $0x5e8] sm:$0xf]  ;;  %v5469_v49 = vld [vmem:[%s7824_s7 + $0x694] sm:$0xf0] }
 0x231   :  { %3014 = vmatpush.bf16.msra.mxu0 %v4445_v6  ;;  %v4892_v6 = vld [vmem:[%s7824_s7 + $0x6e8] sm:$0xf]  ;;  %v4765_v15 = vor.u32 %v5449_v3, %v4764_v2  ;;  %v4845_v57 = vor.u32 %v5469_v49, %v4844_v48  ;;  %v5393_v3 = vld [vmem:[%s7824_s7 + $0x434] sm:$0xf0]  ;;  %v4254_v48 = vld [vmem:[%s7824_s7 + $0x1f8] sm:$0xf0] }
 0x232   :  { %2987 = vmatpush.bf16.msrb.mxu2 %v4205_v9  ;;  %v4141_v9 = vor.u32 %v5293_v62, %v4140_v61  ;;  %v4893_v17 = vor.u32 %v5481_v7, %v4892_v6  ;;  %v4700_v59 = vld [vmem:[%s7824_s7 + $0x568] sm:$0xf]  ;;  %v5489_v7 = vld [vmem:[%s7824_s7 + $0x734] sm:$0xf0] }
 0x233   :  { %3000 = vmatpush.bf16.msrb.mxu3 %v4333_v13  ;;  %v4269_v13 = vor.u32 %v5325_v1, %v4268_v0  ;;  %v4828_v62 = vld [vmem:[%s7824_s7 + $0x668] sm:$0xf]  ;;  %v5465_v0 = vld [vmem:[%s7824_s7 + $0x674] sm:$0xf0] }
 0x234   :  { %2976 = vmatpush.bf16.msrb.mxu1 %v4045_v16  ;;  %v5505_v16 = vld [vmem:[%s7824_s7 + $0x7b4] sm:$0xf0]  ;;  %v4540_v2 = vld [vmem:[%s7824_s7 + $0x428] sm:$0xf] }
 0x235   :  { %3015 = vmatpush.bf16.msra.mxu0 %v4429_v19  ;;  %v5445_v19 = vld [vmem:[%s7824_s7 + $0x5d4] sm:$0xf0]  ;;  %v4989_v24 = vor.u32 %v5505_v16, %v4988_v11  ;;  %v4924_v6 = vld [vmem:[%s7824_s7 + $0x728] sm:$0xf]  ;;  %v4541_v12 = vor.u32 %v5393_v3, %v4540_v2  ;;  %v5347_v3 = vld [vmem:[%s7824_s7 + $0x2cc] sm:$0xf] }
 0x236   :  { %2988 = vmatpush.bf16.msrb.mxu2 %v4189_v23  ;;  %v5477_v23 = vld [vmem:[%s7824_s7 + $0x6d4] sm:$0xf0]  ;;  %v4749_v27 = vor.u32 %v5445_v19, %v4748_v18  ;;  %v4524_v11 = vld [vmem:[%s7824_s7 + $0x408] sm:$0xf]  ;;  %v4925_v16 = vor.u32 %v5489_v7, %v4924_v6  ;;  %v5275_v7 = vld [vmem:[%s7824_s7 + $0x8c] sm:$0xf] }
 0x237   :  { %3001 = vmatpush.bf16.msrb.mxu3 %v4317_v14  ;;  %v5405_v14 = vld [vmem:[%s7824_s7 + $0x494] sm:$0xf0]  ;;  %v4877_v31 = vor.u32 %v5477_v23, %v4876_v21  ;;  %v4908_v18 = vld [vmem:[%s7824_s7 + $0x708] sm:$0xf]  ;;  %v5287_v21 = vld [vmem:[%s7824_s7 + $0xec] sm:$0xf] }
 0x238   :  { %2977 = vmatpush.bf16.msrb.mxu1 %v4029_v29  ;;  %v5501_v29 = vld [vmem:[%s7824_s7 + $0x794] sm:$0xf0]  ;;  %v4126_v23 = vld [vmem:[%s7824_s7 + $0xf8] sm:$0xf0] }
 0x239   :  { %3016 = vmatpush.bf16.msra.mxu0 %v4413_v34  ;;  %v4589_v34 = vor.u32 %v5405_v14, %v4588_v25  ;;  %v4973_v37 = vor.u32 %v5501_v29, %v4972_v28  ;;  %v5485_v19 = vld [vmem:[%s7824_s7 + $0x714] sm:$0xf0]  ;;  %v4510_v14 = vld [vmem:[%s7824_s7 + $0x3f8] sm:$0xf0] }
 0x23a   :  { %2989 = vmatpush.bf16.msrb.mxu2 %v4173_v38  ;;  %v4572_v38 = vld [vmem:[%s7824_s7 + $0x468] sm:$0xf]  ;;  %v5425_v28 = vld [vmem:[%s7824_s7 + $0x534] sm:$0xf0]  ;;  %v4909_v5 = vor.u32 %v5485_v19, %v4908_v18  ;;  %v5343_v18 = vld [vmem:[%s7824_s7 + $0x2ac] sm:$0xf] }
 0x23b   :  { %3002 = vmatpush.bf16.msrb.mxu3 %v4301_v42  ;;  %v5497_v42 = vld [vmem:[%s7824_s7 + $0x774] sm:$0xf0]  ;;  %v4350_v19 = vld [vmem:[%s7824_s7 + $0x2b8] sm:$0xf0] }
 0x23c   :  { %2978 = vmatpush.bf16.msrb.mxu1 %v4013_v46  ;;  %v4573_v46 = vor.u32 %v5401_v39, %v4572_v38  ;;  %v5457_v32 = vld [vmem:[%s7824_s7 + $0x634] sm:$0xf0]  ;;  %v4110_v38 = vld [vmem:[%s7824_s7 + $0xd8] sm:$0xf0]  ;;  %v5379_v39 = vld [vmem:[%s7824_s7 + $0x3cc] sm:$0xf] }
 0x23d   :  { %3017 = vmatpush.bf16.msra.mxu0 %v4397_v50  ;;  %v4957_v50 = vor.u32 %v5497_v42, %v4956_v41  ;;  %v4652_v42 = vld [vmem:[%s7824_s7 + $0x508] sm:$0xf]  ;;  %v4113_v49 = vor.u32 %v5283_v35, %v4110_v38 }
 0x23e   :  { %2990 = vmatpush.bf16.msrb.mxu2 %v4157_v55  ;;  %v4940_v55 = vld [vmem:[%s7824_s7 + $0x748] sm:$0xf] }
 0x23f   :  { %3003 = vmatpush.bf16.msrb.mxu3 %v4285_v60  ;;  %2979 = vmatmul.bf16.vlgmr.msrb.gmra.mxu1 %v6485_v22  ;;  %v5433_v60 = vld [vmem:[%s7824_s7 + $0x574] sm:$0xf0]  ;;  %v4941_v1 = vor.u32 %v5493_v56, %v4940_v55  ;;  %v5279_v55 = vld [vmem:[%s7824_s7 + $0xac] sm:$0xf]  ;;  %v4094_v56 = vld [vmem:[%s7824_s7 + $0xb8] sm:$0xf0] }
 0x240   :  { %3023 = vmatpush.bf16.msra.mxu1 %v4637_v52  ;;  %3018 = vmatmul.bf16.vlgmr.msra.gmra.mxu0 %v6493_v26  ;;  %v4556_v52 = vld [vmem:[%s7824_s7 + $0x448] sm:$0xf]  ;;  %v4097_v2 = vor.u32 %v5279_v55, %v4094_v56  ;;  %v5359_v55 = vld [vmem:[%s7824_s7 + $0x32c] sm:$0xf]  ;;  %v4414_v56 = vld [vmem:[%s7824_s7 + $0x338] sm:$0xf0] }
 0x241   :  { %3062 = vmatpush.bf16.msrb.mxu0 %v5021_v54  ;;  %v4717_v54 = vor.u32 %v5437_v45, %v4716_v44  ;;  %v4557_v61 = vor.u32 %v5397_v53, %v4556_v52  ;;  %v4780_v44 = vld [vmem:[%s7824_s7 + $0x608] sm:$0xf]  ;;  %v5453_v45 = vld [vmem:[%s7824_s7 + $0x614] sm:$0xf0]  ;;  %v4382_v52 = vld [vmem:[%s7824_s7 + $0x2f8] sm:$0xf0] }
 0x242   :  { %2991 = vmatpush.bf16.msrb.mxu2 %v4141_v9  ;;  %v4684_v9 = vld [vmem:[%s7824_s7 + $0x548] sm:$0xf] }
 0x243   :  { %3004 = vmatpush.bf16.msrb.mxu3 %v4269_v13  ;;  %v4812_v13 = vld [vmem:[%s7824_s7 + $0x648] sm:$0xf] }
 0x244   :  { %3024 = vmatpush.bf16.msra.mxu1 %v4621_v4  ;;  %v4701_v4 = vor.u32 %v5433_v60, %v4700_v59  ;;  %v5375_v60 = vld [vmem:[%s7824_s7 + $0x3ac] sm:$0xf] }
 0x245   :  { %3063 = vmatpush.bf16.msrb.mxu0 %v5005_v8  ;;  %2992 = vmatmul.bf16.vlgmr.msrb.gmra.mxu2 %v6527_v47  ;;  %v4829_v8 = vor.u32 %v5465_v0, %v4828_v62  ;;  %v5315_v0 = vld [vmem:[%s7824_s7 + $0x1cc] sm:$0xf] }
 0x246   :  { %3036 = vmatpush.bf16.msra.mxu2 %v4765_v15  ;;  %3005 = vmatmul.bf16.vlgmr.msrb.gmra.mxu3 %v6535_v51  ;;  %v5461_v15 = vld [vmem:[%s7824_s7 + $0x654] sm:$0xf0] }
 0x247   :  { %3049 = vmatpush.bf16.msra.mxu3 %v4893_v17  ;;  %v5389_v17 = vld [vmem:[%s7824_s7 + $0x414] sm:$0xf0]  ;;  %v4813_v25 = vor.u32 %v5461_v15, %v4812_v13  ;;  %v5311_v15 = vld [vmem:[%s7824_s7 + $0x1ac] sm:$0xf] }
 0x248   :  { %3025 = vmatpush.bf16.msra.mxu1 %v4605_v20  ;;  %v4685_v20 = vor.u32 %v5429_v10, %v4684_v9  ;;  %v4525_v29 = vor.u32 %v5389_v17, %v4524_v11  ;;  %v5371_v10 = vld [vmem:[%s7824_s7 + $0x38c] sm:$0xf]  ;;  %v4222_v11 = vld [vmem:[%s7824_s7 + $0x1b8] sm:$0xf0] }
 0x249   :  { %3064 = vmatpush.bf16.msrb.mxu0 %v4989_v24  ;;  %v5383_v24 = vld [vmem:[%s7824_s7 + $0x3ec] sm:$0xf] }
 0x24a   :  { %3037 = vmatpush.bf16.msra.mxu2 %v4749_v27  ;;  %v4668_v27 = vld [vmem:[%s7824_s7 + $0x528] sm:$0xf]  ;;  %v4513_v36 = vor.u32 %v5383_v24, %v4510_v14  ;;  %v4062_v24 = vld [vmem:[%s7824_s7 + $0x78] sm:$0xf0]  ;;  %v5367_v14 = vld [vmem:[%s7824_s7 + $0x36c] sm:$0xf] }
 0x24b   :  { %3050 = vmatpush.bf16.msra.mxu3 %v4877_v31  ;;  %v4796_v31 = vld [vmem:[%s7824_s7 + $0x628] sm:$0xf] }
 0x24c   :  { %3026 = vmatpush.bf16.msra.mxu1 %v4589_v34  ;;  %v4129_v34 = vor.u32 %v5287_v21, %v4126_v23  ;;  %v4797_v41 = vor.u32 %v5457_v32, %v4796_v31  ;;  %v5271_v23 = vld [vmem:[%s7824_s7 + $0x6c] sm:$0xf]  ;;  %v4206_v31 = vld [vmem:[%s7824_s7 + $0x198] sm:$0xf0] }
 0x24d   :  { %3065 = vmatpush.bf16.msrb.mxu0 %v4973_v37  ;;  %v4669_v37 = vor.u32 %v5425_v28, %v4668_v27  ;;  %v4446_v27 = vld [vmem:[%s7824_s7 + $0x378] sm:$0xf0]  ;;  %v4353_v28 = vor.u32 %v5343_v18, %v4350_v19  ;;  %v4065_v32 = vor.u32 %v5271_v23, %v4062_v24  ;;  %v5327_v23 = vld [vmem:[%s7824_s7 + $0x22c] sm:$0xf] }
 0x24e   :  { %3038 = vmatpush.bf16.msra.mxu2 %v4733_v40  ;;  %v4494_v40 = vld [vmem:[%s7824_s7 + $0x3d8] sm:$0xf0]  ;;  %v4449_v35 = vor.u32 %v5367_v14, %v4446_v27 }
 0x24f   :  { %3051 = vmatpush.bf16.msra.mxu3 %v4861_v43  ;;  %v5421_v43 = vld [vmem:[%s7824_s7 + $0x514] sm:$0xf0]  ;;  %v4497_v53 = vor.u32 %v5379_v39, %v4494_v40  ;;  %v5363_v39 = vld [vmem:[%s7824_s7 + $0x34c] sm:$0xf]  ;;  %v4430_v40 = vld [vmem:[%s7824_s7 + $0x358] sm:$0xf0] }
 0x250   :  { %3027 = vmatpush.bf16.msra.mxu1 %v4573_v46  ;;  %v5319_v46 = vld [vmem:[%s7824_s7 + $0x1ec] sm:$0xf]  ;;  %v4158_v18 = vld [vmem:[%s7824_s7 + $0x138] sm:$0xf0] }
 0x251   :  { %3066 = vmatpush.bf16.msrb.mxu0 %v4957_v50  ;;  %v5351_v50 = vld [vmem:[%s7824_s7 + $0x2ec] sm:$0xf]  ;;  %v4257_v59 = vor.u32 %v5319_v46, %v4254_v48  ;;  %v4318_v48 = vld [vmem:[%s7824_s7 + $0x278] sm:$0xf0] }
 0x252   :  { %3039 = vmatpush.bf16.msra.mxu2 %v4717_v54  ;;  %v4653_v54 = vor.u32 %v5421_v43, %v4652_v42  ;;  %v4385_v62 = vor.u32 %v5351_v50, %v4382_v52  ;;  %v5303_v42 = vld [vmem:[%s7824_s7 + $0x16c] sm:$0xf]  ;;  %v4190_v43 = vld [vmem:[%s7824_s7 + $0x178] sm:$0xf0]  ;;  %v4433_v50 = vor.u32 %v5363_v39, %v4430_v40 }
 0x253   :  { %3052 = vmatpush.bf16.msra.mxu3 %v4845_v57  ;;  %v4781_v57 = vor.u32 %v5453_v45, %v4780_v44  ;;  %v5335_v46 = vld [vmem:[%s7824_s7 + $0x26c] sm:$0xf]  ;;  %v4286_v24 = vld [vmem:[%s7824_s7 + $0x238] sm:$0xf0] }
 0x254   :  { %3028 = vmatpush.bf16.msra.mxu1 %v4557_v61  ;;  %v4478_v61 = vld [vmem:[%s7824_s7 + $0x3b8] sm:$0xf0]  ;;  %v5263_v52 = vld [vmem:[%s7824_s7 + $0x2c] sm:$0xf] }
 0x255   :  { %3067 = vmatpush.bf16.msrb.mxu0 %v4941_v1  ;;  %v4238_v1 = vld [vmem:[%s7824_s7 + $0x1d8] sm:$0xf0]  ;;  %v4481_v6 = vor.u32 %v5375_v60, %v4478_v61 }
 0x256   :  { %3040 = vmatpush.bf16.msra.mxu2 %v4701_v4  ;;  %v4366_v4 = vld [vmem:[%s7824_s7 + $0x2d8] sm:$0xf0]  ;;  %v4241_v9 = vor.u32 %v5315_v0, %v4238_v1  ;;  %v5331_v0 = vld [vmem:[%s7824_s7 + $0x24c] sm:$0xf] }
 0x257   :  { %3053 = vmatpush.bf16.msra.mxu3 %v4829_v8  ;;  %v4078_v8 = vld [vmem:[%s7824_s7 + $0x98] sm:$0xf0]  ;;  %v4369_v13 = vor.u32 %v5347_v3, %v4366_v4  ;;  %v4417_v4 = vor.u32 %v5359_v55, %v4414_v56  ;;  %v5503_v55 = vld [vmem:[%s7824_s7 + $0x7ac] sm:$0xf] }
 0x258   :  { %3029 = vmatpush.bf16.msra.mxu1 %v4541_v12  ;;  %v4462_v12 = vld [vmem:[%s7824_s7 + $0x398] sm:$0xf0]  ;;  %v4081_v17 = vor.u32 %v5275_v7, %v4078_v8  ;;  %v5355_v7 = vld [vmem:[%s7824_s7 + $0x30c] sm:$0xf] }
 0x259   :  { %3068 = vmatpush.bf16.msrb.mxu0 %v4925_v16  ;;  %v4465_v21 = vor.u32 %v5371_v10, %v4462_v12  ;;  %v4174_v60 = vld [vmem:[%s7824_s7 + $0x158] sm:$0xf0]  ;;  %v5415_v10 = vld [vmem:[%s7824_s7 + $0x4ec] sm:$0xf] }
 0x25a   :  { %3041 = vmatpush.bf16.msra.mxu2 %v4685_v20  ;;  %v4302_v1 = vld [vmem:[%s7824_s7 + $0x258] sm:$0xf0] }
 0x25b   :  { %3054 = vmatpush.bf16.msra.mxu3 %v4813_v25  ;;  %v4225_v25 = vor.u32 %v5311_v15, %v4222_v11  ;;  %v4398_v8 = vld [vmem:[%s7824_s7 + $0x318] sm:$0xf0]  ;;  %v4305_v15 = vor.u32 %v5331_v0, %v4302_v1  ;;  %v5475_v1 = vld [vmem:[%s7824_s7 + $0x6cc] sm:$0xf] }
 0x25c   :  { %3030 = vmatpush.bf16.msra.mxu1 %v4525_v29  ;;  %v7362_v16 = vpop.f32.mrf.mxu1  ;;  %v5307_v29 = vld [vmem:[%s7824_s7 + $0x18c] sm:$0xf]  ;;  %v4638_v12 = vld [vmem:[%s7824_s7 + $0x4f8] sm:$0xf0]  ;;  %v4401_v14 = vor.u32 %v5355_v7, %v4398_v8 }
 0x25d   :  { %3069 = vmatpush.bf16.msrb.mxu0 %v4909_v5  ;;  %v7371_v20 = vpop.f32.mrf.mxu0  ;;  %v5339_v5 = vld [vmem:[%s7824_s7 + $0x28c] sm:$0xf]  ;;  %v4209_v38 = vor.u32 %v5307_v29, %v4206_v31  ;;  %v5022_v11 = vld [vmem:[%s7824_s7 + $0x7f8] sm:$0xf0]  ;;  %v4641_v27 = vor.u32 %v5415_v10, %v4638_v12 }
 0x25e   :  { %3042 = vmatpush.bf16.msra.mxu2 %v4669_v37  ;;  %v4046_v37 = vld [vmem:[%s7824_s7 + $0x58] sm:$0xf0]  ;;  %v5499_v8 = vld [vmem:[%s7824_s7 + $0x78c] sm:$0xf] }
 0x25f   :  { %3055 = vmatpush.bf16.msra.mxu3 %v4797_v41  ;;  %3031 = vmatmul.bf16.vlgmr.msra.gmra.mxu1 %v6597_v30  ;;  %v4270_v40 = vld [vmem:[%s7824_s7 + $0x218] sm:$0xf0] }
 0x260   :  { %3075 = vmatpush.bf16.msrb.mxu1 %v4129_v34  ;;  %3070 = vmatmul.bf16.vlgmr.msrb.gmra.mxu0 %v6605_v33  ;;  %v4334_v34 = vld [vmem:[%s7824_s7 + $0x298] sm:$0xf0] }
 0x261   :  { %3114 = vmatpush.bf16.msra.mxu0 %v4513_v36  ;;  %v5267_v36 = vld [vmem:[%s7824_s7 + $0x4c] sm:$0xf]  ;;  %v4337_v41 = vor.u32 %v5339_v5, %v4334_v34  ;;  %v5006_v34 = vld [vmem:[%s7824_s7 + $0x7d8] sm:$0xf0] }
 0x262   :  { %3043 = vmatpush.bf16.msra.mxu2 %v4653_v54  ;;  %v4049_v45 = vor.u32 %v5267_v36, %v4046_v37  ;;  %v4193_v54 = vor.u32 %v5303_v42, %v4190_v43  ;;  %v5507_v5 = vld [vmem:[%s7824_s7 + $0x7cc] sm:$0xf]  ;;  %v4142_v37 = vld [vmem:[%s7824_s7 + $0x118] sm:$0xf0] }
 0x263   :  { %3056 = vmatpush.bf16.msra.mxu3 %v4781_v57  ;;  %v4321_v57 = vor.u32 %v5335_v46, %v4318_v48  ;;  %v5291_v36 = vld [vmem:[%s7824_s7 + $0x10c] sm:$0xf]  ;;  %v4766_v42 = vld [vmem:[%s7824_s7 + $0x5f8] sm:$0xf0]  ;;  %v5009_v48 = vor.u32 %v5507_v5, %v5006_v34 }
 0x264   :  { %3076 = vmatpush.bf16.msrb.mxu1 %v4113_v49  ;;  %v2774_v44 = vpop.f32.mrf.mxu1  ;;  %v4894_v46 = vld [vmem:[%s7824_s7 + $0x6f8] sm:$0xf0] }
 0x265   :  { %3115 = vmatpush.bf16.msra.mxu0 %v4497_v53  ;;  %3044 = vmatmul.bf16.vlgmr.msra.gmra.mxu2 %v6639_v58  ;;  %v2813_v49 = vpop.f32.mrf.mxu0  ;;  %v4030_v53 = vld [vmem:[%s7824_s7 + $0x38] sm:$0xf0] }
 0x266   :  { %3088 = vmatpush.bf16.msrb.mxu2 %v4257_v59  ;;  %3057 = vmatmul.bf16.vlgmr.msra.gmra.mxu3 %v6647_v63  ;;  %v5299_v59 = vld [vmem:[%s7824_s7 + $0x14c] sm:$0xf]  ;;  %v4145_v49 = vor.u32 %v5291_v36, %v4142_v37  ;;  %v4990_v56 = vld [vmem:[%s7824_s7 + $0x7b8] sm:$0xf0] }
 0x267   :  { %3101 = vmatpush.bf16.msrb.mxu3 %v4385_v62  ;;  %v4033_v62 = vor.u32 %v5263_v52, %v4030_v53  ;;  %v4606_v52 = vld [vmem:[%s7824_s7 + $0x4b8] sm:$0xf0] }
 0x268   :  { %3077 = vmatpush.bf16.msrb.mxu1 %v4097_v2  ;;  %v7439_v61 = vpop.f32.mrf.mxu2  ;;  %v5259_v2 = vld [vmem:[%s7824_s7 + $0xc] sm:$0xf]  ;;  %v4846_v36 = vld [vmem:[%s7824_s7 + $0x698] sm:$0xf0] }
 0x269   :  { %3116 = vmatpush.bf16.msra.mxu0 %v4481_v6  ;;  %v7450_v3 = vpop.f32.mrf.mxu3  ;;  %v4014_v6 = vld [vmem:[%s7824_s7 + $0x18] sm:$0xf0] }
 0x26a   :  { %3089 = vmatpush.bf16.msrb.mxu2 %v4241_v9  ;;  %v4177_v9 = vor.u32 %v5299_v59, %v4174_v60  ;;  %v5443_v60 = vld [vmem:[%s7824_s7 + $0x5cc] sm:$0xf] }
 0x26b   :  { %3102 = vmatpush.bf16.msrb.mxu3 %v4369_v13  ;;  %v5511_v13 = vld [vmem:[%s7824_s7 + $0x7ec] sm:$0xf] }
 0x26c   :  { %3078 = vmatpush.bf16.msrb.mxu1 %v4081_v17  ;;  %v5295_v17 = vld [vmem:[%s7824_s7 + $0x12c] sm:$0xf]  ;;  %v7479_v19 = vpop.f32.mrf.mxu1  ;;  %v5025_v29 = vor.u32 %v5511_v13, %v5022_v11 }
 0x26d   :  { %3117 = vmatpush.bf16.msra.mxu0 %v4465_v21  ;;  %v4017_v21 = vor.u32 %v5259_v2, %v4014_v6  ;;  %v4161_v31 = vor.u32 %v5295_v17, %v4158_v18  ;;  %v4993_v2 = vor.u32 %v5503_v55, %v4990_v56  ;;  %v4590_v6 = vld [vmem:[%s7824_s7 + $0x498] sm:$0xf0]  ;;  %v5439_v13 = vld [vmem:[%s7824_s7 + $0x5ac] sm:$0xf] }
 0x26e   :  { %3090 = vmatpush.bf16.msrb.mxu2 %v4225_v25  ;;  %v7487_v25 = vpop.f32.mrf.mxu0  ;;  %v5471_v18 = vld [vmem:[%s7824_s7 + $0x6ac] sm:$0xf]  ;;  %v4542_v55 = vld [vmem:[%s7824_s7 + $0x438] sm:$0xf0] }
 0x26f   :  { %3103 = vmatpush.bf16.msrb.mxu3 %v4353_v28  ;;  %v5411_v28 = vld [vmem:[%s7824_s7 + $0x4cc] sm:$0xf] }
 0x270   :  { %3079 = vmatpush.bf16.msrb.mxu1 %v4065_v32  ;;  %v4622_v32 = vld [vmem:[%s7824_s7 + $0x4d8] sm:$0xf0]  ;;  %v2787_v39 = vpop.f32.mrf.mxu2 }
 0x271   :  { %3118 = vmatpush.bf16.msra.mxu0 %v4449_v35  ;;  %v4289_v35 = vor.u32 %v5327_v23, %v4286_v24  ;;  %v2800_v43 = vpop.f32.mrf.mxu3  ;;  %v4625_v44 = vor.u32 %v5411_v28, %v4622_v32  ;;  %v5399_v24 = vld [vmem:[%s7824_s7 + $0x46c] sm:$0xf]  ;;  %v4718_v32 = vld [vmem:[%s7824_s7 + $0x598] sm:$0xf0] }
 0x272   :  { %3091 = vmatpush.bf16.msrb.mxu2 %v4209_v38  ;;  %v5323_v38 = vld [vmem:[%s7824_s7 + $0x20c] sm:$0xf]  ;;  %v4558_v39 = vld [vmem:[%s7824_s7 + $0x458] sm:$0xf0] }
 0x273   :  { %3104 = vmatpush.bf16.msrb.mxu3 %v4337_v41  ;;  %v5447_v41 = vld [vmem:[%s7824_s7 + $0x5ec] sm:$0xf]  ;;  %v4273_v53 = vor.u32 %v5323_v38, %v4270_v40 }
 0x274   :  { %3080 = vmatpush.bf16.msrb.mxu1 %v4049_v45  ;;  %v5479_v45 = vld [vmem:[%s7824_s7 + $0x6ec] sm:$0xf] }
 0x275   :  { %3119 = vmatpush.bf16.msra.mxu0 %v4433_v50  ;;  %v5407_v50 = vld [vmem:[%s7824_s7 + $0x4ac] sm:$0xf]  ;;  %v4897_v59 = vor.u32 %v5479_v45, %v4894_v46  ;;  %v4702_v46 = vld [vmem:[%s7824_s7 + $0x578] sm:$0xf0] }
 0x276   :  { %3092 = vmatpush.bf16.msrb.mxu2 %v4193_v54  ;;  %v4769_v54 = vor.u32 %v5447_v41, %v4766_v42  ;;  %v4609_v0 = vor.u32 %v5407_v50, %v4606_v52  ;;  %v5395_v38 = vld [vmem:[%s7824_s7 + $0x44c] sm:$0xf]  ;;  %v4942_v42 = vld [vmem:[%s7824_s7 + $0x758] sm:$0xf0] }
 0x277   :  { %3105 = vmatpush.bf16.msrb.mxu3 %v4321_v57  ;;  %v2826_v57 = vpop.f32.mrf.mxu1  ;;  %v5491_v41 = vld [vmem:[%s7824_s7 + $0x74c] sm:$0xf]  ;;  %v4830_v52 = vld [vmem:[%s7824_s7 + $0x678] sm:$0xf0] }
 0x278   :  { %3081 = vmatpush.bf16.msrb.mxu1 %v4033_v62  ;;  %v2865_v62 = vpop.f32.mrf.mxu0  ;;  %v7563_v10 = vpop.f32.mrf.mxu2  ;;  %v5431_v45 = vld [vmem:[%s7824_s7 + $0x56c] sm:$0xf] }
 0x279   :  { %3120 = vmatpush.bf16.msra.mxu0 %v4417_v4  ;;  %v5403_v4 = vld [vmem:[%s7824_s7 + $0x48c] sm:$0xf]  ;;  %v7571_v11 = vpop.f32.mrf.mxu3  ;;  %v4705_v56 = vor.u32 %v5431_v45, %v4702_v46 }
 0x27a   :  { %3093 = vmatpush.bf16.msrb.mxu2 %v4177_v9  ;;  %v4974_v9 = vld [vmem:[%s7824_s7 + $0x798] sm:$0xf0]  ;;  %v4593_v17 = vor.u32 %v5403_v4, %v4590_v6  ;;  %v5463_v50 = vld [vmem:[%s7824_s7 + $0x66c] sm:$0xf] }
 0x27b   :  { %3106 = vmatpush.bf16.msrb.mxu3 %v4305_v15  ;;  %v4734_v15 = vld [vmem:[%s7824_s7 + $0x5b8] sm:$0xf0]  ;;  %v4977_v23 = vor.u32 %v5499_v8, %v4974_v9  ;;  %v5487_v57 = vld [vmem:[%s7824_s7 + $0x72c] sm:$0xf]  ;;  %v4833_v62 = vor.u32 %v5463_v50, %v4830_v52 }
 0x27c   :  { %3082 = vmatpush.bf16.msrb.mxu1 %v4017_v21  ;;  %v4862_v21 = vld [vmem:[%s7824_s7 + $0x6b8] sm:$0xf0]  ;;  %v5459_v4 = vld [vmem:[%s7824_s7 + $0x64c] sm:$0xf] }
 0x27d   :  { %3121 = vmatpush.bf16.msra.mxu0 %v4401_v14  ;;  %v4737_v14 = vor.u32 %v5439_v13, %v4734_v15  ;;  %v4814_v6 = vld [vmem:[%s7824_s7 + $0x658] sm:$0xf0]  ;;  %v5387_v8 = vld [vmem:[%s7824_s7 + $0x40c] sm:$0xf] }
 0x27e   :  { %3094 = vmatpush.bf16.msrb.mxu2 %v4161_v31  ;;  %v5435_v31 = vld [vmem:[%s7824_s7 + $0x58c] sm:$0xf]  ;;  %v4526_v9 = vld [vmem:[%s7824_s7 + $0x418] sm:$0xf0] }
 0x27f   :  { %3107 = vmatpush.bf16.msrb.mxu3 %v4289_v35  ;;  %3083 = vmatmul.bf16.vlgmr.msrb.gmra.mxu1 %v6485_v22  ;;  %v4750_v22 = vld [vmem:[%s7824_s7 + $0x5d8] sm:$0xf0]  ;;  %v7593_v28 = vpop.f32.mrf.mxu1  ;;  %v5467_v35 = vld [vmem:[%s7824_s7 + $0x68c] sm:$0xf]  ;;  %v4721_v40 = vor.u32 %v5435_v31, %v4718_v32 }
 0x280   :  { %3127 = vmatpush.bf16.msra.mxu1 %v4641_v27  ;;  %3122 = vmatmul.bf16.vlgmr.msra.gmra.mxu0 %v6493_v26  ;;  %v4878_v26 = vld [vmem:[%s7824_s7 + $0x6d8] sm:$0xf0]  ;;  %v4753_v7 = vor.u32 %v5443_v60, %v4750_v22  ;;  %v5495_v27 = vld [vmem:[%s7824_s7 + $0x76c] sm:$0xf]  ;;  %v7601_v5 = vpop.f32.mrf.mxu0  ;;  %v2839_v43 = vpop.f32.mrf.mxu2  ;;  %v7648_v60 = vld [vmem:[%s7826_s8] sm:$0xf] }
 0x281   :  { %3166 = vmatpush.bf16.msrb.mxu0 %v5025_v29  ;;  %v4881_v12 = vor.u32 %v5475_v1, %v4878_v26  ;;  %v4865_v29 = vor.u32 %v5471_v18, %v4862_v21  ;;  %v4686_v1 = vld [vmem:[%s7824_s7 + $0x558] sm:$0xf0]  ;;  %v5483_v15 = vld [vmem:[%s7824_s7 + $0x70c] sm:$0xf]  ;;  %v4817_v21 = vor.u32 %v5459_v4, %v4814_v6 }
 0x282   :  { %3095 = vmatpush.bf16.msrb.mxu2 %v4145_v49  ;;  %v4561_v49 = vor.u32 %v5395_v38, %v4558_v39  ;;  %v5521_v31 = vld [vmem:[%s7827_s9 + $0x38] sm:$0xff]  ;;  %v5451_v39 = vld [vmem:[%s7824_s7 + $0x60c] sm:$0xf] }
 0x283   :  { %3108 = vmatpush.bf16.msrb.mxu3 %v4273_v53  ;;  %v4945_v53 = vor.u32 %v5491_v41, %v4942_v42  ;;  %v5529_v43 = vld [vmem:[%s7827_s9 + $0x78] sm:$0xff]  ;;  %v5519_v46 = vld [vmem:[%s7827_s9 + $0x28] sm:$0xff] }
 0x284   :  { %3128 = vmatpush.bf16.msra.mxu1 %v4625_v44  ;;  %v4849_v44 = vor.u32 %v5467_v35, %v4846_v36  ;;  %v5419_v36 = vld [vmem:[%s7824_s7 + $0x50c] sm:$0xf] }
 0x285   :  { %3167 = vmatpush.bf16.msrb.mxu0 %v5009_v48  ;;  %3096 = vmatmul.bf16.vlgmr.msrb.gmra.mxu2 %v6527_v47  ;;  %v4574_v47 = vld [vmem:[%s7824_s7 + $0x478] sm:$0xf0]  ;;  %v2852_v48 = vpop.f32.mrf.mxu3  ;;  %v5527_v50 = vld [vmem:[%s7827_s9 + $0x68] sm:$0xff] }
 0x286   :  { %3140 = vmatpush.bf16.msra.mxu2 %v4769_v54  ;;  %3109 = vmatmul.bf16.vlgmr.msrb.gmra.mxu3 %v6535_v51  ;;  %v4958_v51 = vld [vmem:[%s7824_s7 + $0x778] sm:$0xf0]  ;;  %v4577_v34 = vor.u32 %v5399_v24, %v4574_v47  ;;  %v5391_v54 = vld [vmem:[%s7824_s7 + $0x42c] sm:$0xf]  ;;  %v1476_v48 = vperm.slane %v7648_v60, 1 }
 0x287   :  { %3153 = vmatpush.bf16.msra.mxu3 %v4897_v59  ;;  %v4961_v37 = vor.u32 %v5495_v27, %v4958_v51  ;;  %v4926_v59 = vld [vmem:[%s7824_s7 + $0x738] sm:$0xf0]  ;;  %v2878_v22 = vpop.f32.mrf.mxu1  ;;  %v5455_v27 = vld [vmem:[%s7824_s7 + $0x62c] sm:$0xf] }
 0x288   :  { %3129 = vmatpush.bf16.msra.mxu1 %v4609_v0  ;;  %v5427_v0 = vld [vmem:[%s7824_s7 + $0x54c] sm:$0xf]  ;;  %v2917_v26 = vpop.f32.mrf.mxu0  ;;  %v2889_v18 = vpop.f32.mrf.mxu2  ;;  %v4670_v24 = vld [vmem:[%s7824_s7 + $0x538] sm:$0xf0] }
 0x289   :  { %3168 = vmatpush.bf16.msrb.mxu0 %v4993_v2  ;;  %v4545_v2 = vor.u32 %v5391_v54, %v4542_v55  ;;  %v4689_v13 = vor.u32 %v5427_v0, %v4686_v1  ;;  %v4798_v51 = vld [vmem:[%s7824_s7 + $0x638] sm:$0xf0] }
 0x28a   :  { %3141 = vmatpush.bf16.msra.mxu2 %v4753_v7  ;;  %v4929_v7 = vor.u32 %v5487_v57, %v4926_v59  ;;  %v4801_v35 = vor.u32 %v5455_v27, %v4798_v51  ;;  %v5525_v57 = vld [vmem:[%s7827_s9 + $0x58] sm:$0xff] }
 0x28b   :  { %3154 = vmatpush.bf16.msra.mxu3 %v4881_v12  ;;  %v1475_v12 = vperm.slane %v7648_v60, 0  ;;  %v5533_v51 = vld [vmem:[%s7827_s9 + $0x98] sm:$0xff] }
 0x28c   :  { %3130 = vmatpush.bf16.msra.mxu1 %v4593_v17  ;;  %v4910_v17 = vld [vmem:[%s7824_s7 + $0x718] sm:$0xf0] }
 0x28d   :  { %3169 = vmatpush.bf16.msrb.mxu0 %v4977_v23  ;;  %v5423_v23 = vld [vmem:[%s7824_s7 + $0x52c] sm:$0xf]  ;;  %v2902_v47 = vpop.f32.mrf.mxu3  ;;  %v2773_v32 = vadd.f32 %v7362_v16, %v1475_v12  ;;  %v4782_v16 = vld [vmem:[%s7824_s7 + $0x618] sm:$0xf0] }
 0x28e   :  { %3142 = vmatpush.bf16.msra.mxu2 %v4737_v14  ;;  %v4529_v14 = vor.u32 %v5387_v8, %v4526_v9  ;;  %v4785_v42 = vor.u32 %v5451_v39, %v4782_v16  ;;  %v5537_v9 = vld [vmem:[%s7827_s9 + $0xb8] sm:$0xff]  ;;  %v1477_v16 = vperm.slane %v7648_v60, 2 }
 0x28f   :  { %3155 = vmatpush.bf16.msra.mxu3 %v4865_v29  ;;  %v4913_v29 = vor.u32 %v5483_v15, %v4910_v17  ;;  %v2786_v38 = vadd.f32 %v7439_v61, %v2773_v32  ;;  %v5536_v15 = vld [vmem:[%s7827_s9 + $0xb0] sm:$0xff] }
 0x290   :  { %3131 = vmatpush.bf16.msra.mxu1 %v4577_v34  ;;  %v4673_v34 = vor.u32 %v5423_v23, %v4670_v24  ;;  %v2891_v61 = vpop.f32.mrf.mxu2  ;;  %v5535_v24 = vld [vmem:[%s7827_s9 + $0xa8] sm:$0xff] }
 0x291   :  { %3170 = vmatpush.bf16.msrb.mxu0 %v4961_v37  ;;  %v4654_v37 = vld [vmem:[%s7824_s7 + $0x518] sm:$0xf0] }
 0x292   :  { %3143 = vmatpush.bf16.msra.mxu2 %v4721_v40  ;;  %v5520_v40 = vld [vmem:[%s7827_s9 + $0x30] sm:$0xff]  ;;  %v4657_v41 = vor.u32 %v5419_v36, %v4654_v37  ;;  %v5530_v37 = vld [vmem:[%s7827_s9 + $0x80] sm:$0xff] }
 0x293   :  { %3156 = vmatpush.bf16.msra.mxu3 %v4849_v44  ;;  %v2799_v44 = vadd.f32 %v7450_v3, %v2786_v38  ;;  %v2877_v3 = vadd.f32 %v7593_v28, %v1476_v48 }
 0x294   :  { %3132 = vmatpush.bf16.msra.mxu1 %v4561_v49 }
 0x295   :  { %3171 = vmatpush.bf16.msrb.mxu0 %v4945_v53  ;;  %v2904_v45 = vpop.f32.mrf.mxu3  ;;  %v2812_v49 = vadd.f32 %v7371_v20, %v2799_v44  ;;  %v2890_v20 = vadd.f32 %v2889_v18, %v2877_v3 }
 0x296   :  { %3144 = vmatpush.bf16.msra.mxu2 %v4705_v56 }
 0x297   :  { %3157 = vmatpush.bf16.msra.mxu3 %v4833_v62  ;;  %v2825_v52 = vadd.f32 %v7479_v19, %v2812_v49  ;;  %v2903_v28 = vadd.f32 %v2902_v47, %v2890_v20  ;;  %v5516_v19 = vld [vmem:[%s7827_s9 + $0x10] sm:$0xff]  ;;  %v5515_v62 = vld [vmem:[%s7827_s9 + $0x8] sm:$0xff]  ;;  %v5534_v47 = vld [vmem:[%s7827_s9 + $0xa0] sm:$0xff] }
 0x298   :  { %3133 = vmatpush.bf16.msra.mxu1 %v4545_v2  ;;  %v5544_v20 = vld [vmem:[%s7827_s9 + $0xf0] sm:$0xff] }
 0x299   :  { %3172 = vmatpush.bf16.msrb.mxu0 %v4929_v7  ;;  %v2838_v55 = vadd.f32 %v7563_v10, %v2825_v52  ;;  %v2916_v10 = vadd.f32 %v7601_v5, %v2903_v28  ;;  %v5514_v5 = vld [vmem:[%s7827_s9] sm:$0xff]  ;;  %v5545_v52 = vld [vmem:[%s7827_s9 + $0xf8] sm:$0xff] }
 0x29a   :  { %3145 = vmatpush.bf16.msra.mxu2 %v4689_v13  ;;  %v5522_v13 = vld [vmem:[%s7827_s9 + $0x40] sm:$0xff] }
 0x29b   :  { %3158 = vmatpush.bf16.msra.mxu3 %v4817_v21  ;;  %v2851_v56 = vadd.f32 %v7571_v11, %v2838_v55  ;;  %v5524_v11 = vld [vmem:[%s7827_s9 + $0x50] sm:$0xff]  ;;  %v5542_v28 = vld [vmem:[%s7827_s9 + $0xe0] sm:$0xff] }
 0x29c   :  { %3134 = vmatpush.bf16.msra.mxu1 %v4529_v14  ;;  %v2928_v53 = vpop.f32.mrf.mxu1 }
 0x29d   :  { %3173 = vmatpush.bf16.msrb.mxu0 %v4913_v29  ;;  %v2967_v54 = vpop.f32.mrf.mxu0  ;;  %v2864_v0 = vadd.f32 %v7487_v25, %v2851_v56  ;;  %v2929_v1 = vadd.f32 %v2928_v53, %v2916_v10  ;;  %v5523_v25 = vld [vmem:[%s7827_s9 + $0x48] sm:$0xff]  ;;  %v5540_v10 = vld [vmem:[%s7827_s9 + $0xd0] sm:$0xff] }
 0x29e   :  { %3146 = vmatpush.bf16.msra.mxu2 %v4673_v34 }
 0x29f   :  { %3159 = vmatpush.bf16.msra.mxu3 %v4801_v35  ;;  %3135 = vmatmul.bf16.vlgmr.msra.gmra.mxu1 %v6597_v30  ;;  %v5528_v30 = vld [vmem:[%s7827_s9 + $0x70] sm:$0xff]  ;;  %v3179_v6 = vmax.f32 %v2864_v0, 0.0  ;;  %v5531_v35 = vld [vmem:[%s7827_s9 + $0x88] sm:$0xff] }
 0x2a0   :  { %3447 = vmatpush.bf16.msrb.mxu1 %v5521_v31  ;;  %3174 = vmatmul.bf16.vlgmr.msrb.gmra.mxu0 %v6605_v33  ;;  %v5518_v33 = vld [vmem:[%s7827_s9 + $0x20] sm:$0xff]  ;;  %v5532_v31 = vld [vmem:[%s7827_s9 + $0x90] sm:$0xff]  ;;  %v5539_v0 = vld [vmem:[%s7827_s9 + $0xc8] sm:$0xff] }
 0x2a1   :  { %v3183_v12 = vpack.c.bf16 %v3179_v6, %v3179_v6  ;;  %3486 = vmatpush.bf16.msra.mxu0 %v5545_v52 }
 0x2a2   :  { %3147 = vmatpush.bf16.msra.mxu2 %v4657_v41 }
 0x2a3   :  { %3160 = vmatpush.bf16.msra.mxu3 %v4785_v42 }
 0x2a4   :  { %3448 = vmatpush.bf16.msrb.mxu1 %v5520_v40  ;;  %v2930_v59 = vpop.f32.mrf.mxu1 }
 0x2a5   :  { %3148 = vmatmul.bf16.vlgmr.msra.gmra.mxu2 %v6639_v58  ;;  %v5517_v58 = vld [vmem:[%s7827_s9 + $0x18] sm:$0xff]  ;;  %v2969_v22 = vpop.f32.mrf.mxu0  ;;  %3487 = vmatpush.bf16.msra.mxu0 %v5544_v20 }
 0x2a6   :  { %3460 = vmatpush.bf16.msrb.mxu2 %v5529_v43  ;;  %3161 = vmatmul.bf16.vlgmr.msra.gmra.mxu3 %v6647_v63  ;;  %v5526_v63 = vld [vmem:[%s7827_s9 + $0x60] sm:$0xff] }
 0x2a7   :  { %3473 = vmatpush.bf16.msrb.mxu3 %v5537_v9 }
 0x2a8   :  { %3449 = vmatpush.bf16.msrb.mxu1 %v5519_v46  ;;  %v2941_v26 = vpop.f32.mrf.mxu2 }
 0x2a9   :  { %v2942_v2 = vadd.f32 %v2941_v26, %v2929_v1  ;;  %v2954_v4 = vpop.f32.mrf.mxu3 }
 0x2aa   :  { %3461 = vmatpush.bf16.msrb.mxu2 %v5528_v30 }
 0x2ab   :  { %v2955_v7 = vadd.f32 %v2954_v4, %v2942_v2  ;;  %3474 = vmatpush.bf16.msrb.mxu3 %v5536_v15  ;;  %v1478_v4 = vperm.slane %v7648_v60, 3 }
 0x2ac   :  { %3450 = vmatpush.bf16.msrb.mxu1 %v5518_v33 }
 0x2ad   :  { %v2968_v8 = vadd.f32 %v2967_v54, %v2955_v7 }
 0x2ae   :  { %3462 = vmatpush.bf16.msrb.mxu2 %v5527_v50 }
 0x2af   :  { %v3180_v17 = vmax.f32 %v2968_v8, 0.0  ;;  %3475 = vmatpush.bf16.msrb.mxu3 %v5535_v24 }
 0x2b0   :  { %3451 = vmatpush.bf16.msrb.mxu1 %v5517_v58  ;;  %v2943_v18 = vpop.f32.mrf.mxu2 }
 0x2b1   :  { %v2956_v21 = vpop.f32.mrf.mxu3  ;;  %v3184_v23 = vpack.c.bf16 %v3180_v17, %v3180_v17 }
 0x2b2   :  { %3463 = vmatpush.bf16.msrb.mxu2 %v5526_v63  ;;  %v5543_v63 = vld [vmem:[%s7827_s9 + $0xe8] sm:$0xff] }
 0x2b3   :  { %3476 = vmatpush.bf16.msrb.mxu3 %v5534_v47  ;;  %3488 = vmatpush.bf16.msra.mxu0 %v5543_v63 }
 0x2b4   :  { %3452 = vmatpush.bf16.msrb.mxu1 %v5516_v19 }
 0x2b6   :  { %3464 = vmatpush.bf16.msrb.mxu2 %v5525_v57  ;;  %v5541_v57 = vld [vmem:[%s7827_s9 + $0xd8] sm:$0xff] }
 0x2b7   :  { %3477 = vmatpush.bf16.msrb.mxu3 %v5533_v51  ;;  %3489 = vmatpush.bf16.msra.mxu0 %v5542_v28 }
 0x2b8   :  { %3453 = vmatpush.bf16.msrb.mxu1 %v5515_v62 }
 0x2ba   :  { %3465 = vmatpush.bf16.msrb.mxu2 %v5524_v11  ;;  %v5538_v11 = vld [vmem:[%s7827_s9 + $0xc0] sm:$0xff] }
 0x2bb   :  { %3478 = vmatpush.bf16.msrb.mxu3 %v5532_v31  ;;  %3490 = vmatpush.bf16.msra.mxu0 %v5541_v57 }
 0x2bc   :  { %3454 = vmatpush.bf16.msrb.mxu1 %v5514_v5  ;;  %v2980_v14 = vpop.f32.mrf.mxu1 }
 0x2bd   :  { %v3019_v27 = vpop.f32.mrf.mxu0  ;;  %v2981_v40 = vadd.f32 %v2980_v14, %v1477_v16 }
 0x2be   :  { %3466 = vmatpush.bf16.msrb.mxu2 %v5523_v25 }
 0x2bf   :  { %3455 = vmatmul.bf16.vlgmr.msrb.gmra.mxu1 %v3183_v12  ;;  %3479 = vmatpush.bf16.msrb.mxu3 %v5531_v35 }
 0x2c0   :  { %3491 = vmatpush.bf16.msra.mxu0 %v5540_v10 }
 0x2c2   :  { %3467 = vmatpush.bf16.msrb.mxu2 %v5522_v13 }
 0x2c3   :  { %3480 = vmatpush.bf16.msrb.mxu3 %v5530_v37 }
 0x2c4   :  { %v2982_v29 = vpop.f32.mrf.mxu1  ;;  %3492 = vmatpush.bf16.msra.mxu0 %v5539_v0 }
 0x2c5   :  { %3468 = vmatmul.bf16.vlgmr.msrb.gmra.mxu2 %v3184_v23  ;;  %v3021_v32 = vpop.f32.mrf.mxu0  ;;  %v5548_v29 = vld [vmem:[%s7828_s10] ss:$0 sm:$0xff] }
 0x2c8   :  { %v2993_v34 = vpop.f32.mrf.mxu2  ;;  %3493 = vmatpush.bf16.msra.mxu0 %v5538_v11 }
 0x2c9   :  { %v3006_v36 = vpop.f32.mrf.mxu3  ;;  %v2994_v61 = vadd.f32 %v2993_v34, %v2981_v40 }
 0x2cb   :  { %v3007_v43 = vadd.f32 %v3006_v36, %v2994_v61 }
 0x2cd   :  { %v3020_v45 = vadd.f32 %v3019_v27, %v3007_v43 }
 0x2d0   :  { %v2995_v38 = vpop.f32.mrf.mxu2 }
 0x2d1   :  { %v3008_v39 = vpop.f32.mrf.mxu3 }
 0x2dc   :  { %v3032_v41 = vpop.f32.mrf.mxu1 }
 0x2dd   :  { %v3071_v42 = vpop.f32.mrf.mxu0  ;;  %v3033_v48 = vadd.f32 %v3032_v41, %v3020_v45 }
 0x2e4   :  { %v3034_v44 = vpop.f32.mrf.mxu1 }
 0x2e5   :  { %v3073_v46 = vpop.f32.mrf.mxu0 }
 0x2e8   :  { %v3045_v30 = vpop.f32.mrf.mxu2 }
 0x2e9   :  { %v3046_v49 = vadd.f32 %v3045_v30, %v3033_v48  ;;  %v3058_v33 = vpop.f32.mrf.mxu3 }
 0x2eb   :  { %v3059_v3 = vadd.f32 %v3058_v33, %v3046_v49 }
 0x2ed   :  { %v3072_v50 = vadd.f32 %v3071_v42, %v3059_v3 }
 0x2ef   :  { %v3181_v53 = vmax.f32 %v3072_v50, 0.0 }
 0x2f0   :  { %v3047_v54 = vpop.f32.mrf.mxu2 }
 0x2f1   :  { %v3185_v58 = vpack.c.bf16 %v3181_v53, %v3181_v53  ;;  %v3060_v55 = vpop.f32.mrf.mxu3 }
 0x2f3   :  { %3481 = vmatmul.bf16.vlgmr.msrb.gmra.mxu3 %v3185_v58 }
 0x2fc   :  { %v3084_v19 = vpop.f32.mrf.mxu1 }
 0x2fd   :  { %v3123_v56 = vpop.f32.mrf.mxu0  ;;  %v3085_v5 = vadd.f32 %v3084_v19, %v1478_v4 }
 0x304   :  { %v3086_v59 = vpop.f32.mrf.mxu1 }
 0x305   :  { %v3125_v22 = vpop.f32.mrf.mxu0 }
 0x308   :  { %v3097_v62 = vpop.f32.mrf.mxu2 }
 0x309   :  { %v3110_v1 = vpop.f32.mrf.mxu3  ;;  %v3098_v7 = vadd.f32 %v3097_v62, %v3085_v5 }
 0x30b   :  { %v3111_v8 = vadd.f32 %v3110_v1, %v3098_v7 }
 0x30d   :  { %v3124_v12 = vadd.f32 %v3123_v56, %v3111_v8 }
 0x310   :  { %v3099_v26 = vpop.f32.mrf.mxu2 }
 0x311   :  { %v3112_v2 = vpop.f32.mrf.mxu3 }
 0x31c   :  { %v3136_v6 = vpop.f32.mrf.mxu1 }
 0x31d   :  { %v3175_v25 = vpop.f32.mrf.mxu0  ;;  %v3137_v15 = vadd.f32 %v3136_v6, %v3124_v12 }
 0x324   :  { %v3138_v9 = vpop.f32.mrf.mxu1 }
 0x325   :  { %v3177_v13 = vpop.f32.mrf.mxu0 }
 0x328   :  { %v3149_v17 = vpop.f32.mrf.mxu2 }
 0x329   :  { %v3150_v18 = vadd.f32 %v3149_v17, %v3137_v15  ;;  %v3162_v21 = vpop.f32.mrf.mxu3 }
 0x32b   :  { %v3163_v23 = vadd.f32 %v3162_v21, %v3150_v18 }
 0x32d   :  { %v3176_v24 = vadd.f32 %v3175_v25, %v3163_v23 }
 0x32f   :  { %v3182_v47 = vmax.f32 %v3176_v24, 0.0 }
 0x330   :  { %v3151_v14 = vpop.f32.mrf.mxu2 }
 0x331   :  { %v3186_v27 = vpack.c.bf16 %v3182_v47, %v3182_v47  ;;  %v3164_v51 = vpop.f32.mrf.mxu3 }
 0x333   :  { %3494 = vmatmul.bf16.vlgmr.msra.gmra.mxu0 %v3186_v27 }
 0x33c   :  { %v3456_v60 = vpop.f32.mrf.mxu1 }
 0x33d   :  { %v3457_v32 = vadd.f32 %v5548_v29, %v3456_v60 }
 0x344   :  { %v3458_v31 = vpop.f32.mrf.mxu1 }
 0x348   :  { %v3469_v34 = vpop.f32.mrf.mxu2 }
 0x349   :  { %v3470_v35 = vadd.f32 %v3469_v34, %v3457_v32 }
 0x350   :  { %v3471_v36 = vpop.f32.mrf.mxu2 }
 0x376   :  { %v3482_v37 = vpop.f32.mrf.mxu3 }
 0x377   :  { %v3483_v39 = vadd.f32 %v3482_v37, %v3470_v35 }
 0x37e   :  { %v3484_v38 = vpop.f32.mrf.mxu3 }
 0x3b0   :  { %v3495_v16 = vpop.f32.mrf.mxu0 }
 0x3b1   :  { %v3496_v40 = vadd.f32 %v3495_v16, %v3483_v39 }
 0x3b3   :  { %3500 = vst.msk [vmem:[%s7829_s11] sm:$0x3] %vm3499_vm1, %v3496_v40 }
 0x3b8   :  { %v3497_v41 = vpop.f32.mrf.mxu0 }

</bundles_post_ra>
